<compile_context>
chip_gen: v7x
topology: tpu7x:2x2x1
jax: 0.10.0
libtpu: 0.0.40
codegen_flags: <defaults>
</compile_context>

<pallas_src>
import functools

import jax
import jax.numpy as jnp
from jax.experimental import pallas as pl
from jax.experimental.pallas import tpu as pltpu

# e3nn "integral" normalization constants
_SH_C0 = 0.28209479177387814   # 1 / (2*sqrt(pi))
_SH_C1 = 0.4886025119029199    # sqrt(3 / (4*pi))
_SH_C2 = 0.6307831305050401    # sqrt(5 / (4*pi))
_SQRT3 = 1.7320508075688772


def sh_features(x, y, z, max_degree):
    """Real spherical harmonics (e3nn ordering, 'integral' normalization) on unit vecs."""
    feats = [jnp.full_like(x, _SH_C0)]
    if max_degree >= 1:
        feats += [_SH_C1 * x, _SH_C1 * y, _SH_C1 * z]
    if max_degree >= 2:
        feats += [
            _SH_C2 * _SQRT3 * x * z,
            _SH_C2 * _SQRT3 * x * y,
            _SH_C2 * (y * y - 0.5 * (x * x + z * z)),
            _SH_C2 * _SQRT3 * y * z,
            _SH_C2 * (_SQRT3 / 2.0) * (z * z - x * x),
        ]
    if max_degree >= 3:
        # TODO(synk): spherical harmonics for l >= 3 not implemented.
        raise NotImplementedError("max_degree > 2 not supported")
    return feats


def _silu(x):
    # x * sigmoid(x), sigmoid via tanh -> a single EUP transcendental per element.
    return x * (0.5 * jnp.tanh(0.5 * x) + 0.5)


def _sh_bias_kernel(ci_ref, cj_ref, w1_ref, b1_ref, w2_ref, b2_ref, w3_ref,
                    b3_ref, out_ref, f_scr,
                    *, max_degree, eps, fold_l0, ti_sub, act_dtype):
    # ci_ref:  (1, TI_BLK, 3)          row-side coords tile (pair index i)
    # cj_ref:  (1, 3, TJ)              col-side coords tile (pair index j)
    # w*_ref:  striped weights (kron(W.T, eye(ti_sub)))  bf16
    # b*_ref:  striped biases (rows, 1)                  f32
    # out_ref: (1, H, TI_BLK, TJ)
    # f_scr:   (K_eff*ti_sub, TJ) f32  feature operand scratch (k-major, i-minor)
    ci = ci_ref[0]                                      # (TI_BLK, 3)
    cj = cj_ref[0]                                      # (3, TJ)
    xj, yj, zj = cj[0:1, :], cj[1:2, :], cj[2:3, :]     # (1, TJ)

    w1 = w1_ref[...]                                    # (hidden*8, K_eff*8)  bf16
    w2 = w2_ref[...]                                    # (hidden*8, hidden*8) bf16
    w3 = w3_ref[...]                                    # (H*8,      hidden*8) bf16
    b1 = b1_ref[...]                                    # (hidden*8, 1)        f32
    b2 = b2_ref[...]
    b3 = b3_ref[...]

    n_heads = out_ref.shape[1]
    ti_blk = ci.shape[0]

    for r in range(ti_blk // ti_sub):                   # unrolled: 2-4 groups of 8 rows
        r0 = r * ti_sub
        csub = ci[r0:r0 + ti_sub, :]                    # (8, 3)
        xi, yi, zi = csub[:, 0:1], csub[:, 1:2], csub[:, 2:3]   # (8, 1)

        # relative displacement r[i, j] = coords[i] - coords[j]
        rx = xi - xj                                    # (8, TJ)
        ry = yi - yj
        rz = zi - zj
        norm = jnp.sqrt(rx * rx + ry * ry + rz * rz)
        # PyTorch: u = r/(norm+eps); e3nn re-normalizes u/max(|u|, 1e-12).
        # Collapsed (exactly equivalent): x = r / max(norm, (norm+eps)*1e-12).
        inv = 1.0 / jnp.maximum(norm, (norm + eps) * 1e-12)
        x = rx * inv
        y = ry * inv
        z = rz * inv

        feats = sh_features(x, y, z, max_degree)        # K planes of (8, TJ)
        if fold_l0:
            feats = feats[1:]                           # constant plane folded into b1
        # Dense, sublane-aligned plane writes -> (K_eff*8, TJ), k-major / i-minor.
        for k, fk in enumerate(feats):
            f_scr[k * ti_sub:(k + 1) * ti_sub, :] = fk
        g = f_scr[...].astype(jnp.bfloat16)             # (K_eff*8, TJ)

        # One MXU call per layer for all 8 pair-rows (striped weights handle the
        # per-row block structure); activations stay lane-dense (rows*8, TJ).
        a1 = jnp.dot(w1, g, preferred_element_type=jnp.float32) + b1
        h1 = _silu(a1.astype(act_dtype)).astype(jnp.bfloat16)
        a2 = jnp.dot(w2, h1, preferred_element_type=jnp.float32) + b2
        h2 = _silu(a2.astype(act_dtype)).astype(jnp.bfloat16)
        o = jnp.dot(w3, h2, preferred_element_type=jnp.float32) + b3   # (H*8, TJ) f32

        # Head-major row layout -> each head is a contiguous (8, TJ) slab: dense stores.
        for h in range(n_heads):
            out_ref[0, h, r0:r0 + ti_sub, :] = o[h * ti_sub:(h + 1) * ti_sub, :]


def _round_up(x, m):
    return ((x + m - 1) // m) * m


def spherical_harmonics_attention_bias(coords, params, *, max_degree, num_heads,
                                       eps=1e-6, act_dtype=None):
    """coords: [B, T, N, 3] -> bias: [B, num_heads, S, S], S = T * N."""
    w1, b1, w2, b2, w3, b3 = params
    coords = coords[..., :3]
    B, T, N, _ = coords.shape
    S = T * N
    K, hidden = w1.shape
    H = num_heads

    if act_dtype is None:
        kind = jax.devices()[0].device_kind.lower()
        # v5 and older: no bf16 VPU/EUP -> keep elementwise math in f32 there.
        old_gen = any(v in kind for v in ("v2", "v3", "v4", "v5"))
        act_dtype = jnp.float32 if old_gen else jnp.bfloat16

    # Tiling: 8-row pair groups (striped weights), large lane-dense column tile.
    TI_SUB = 8
    S128 = _round_up(max(S, 1), 128)
    if S128 <= 2048:
        TJ = S128                        # one column block, zero extra pad waste
        S_pad = S128
    else:
        TJ = 1024                        # fixed big tile, pad S up to a multiple
        S_pad = _round_up(S128, TJ)
    TI_BLK = 32 if TJ <= 1024 else 16    # 16K-32K pairs per grid step

    c = coords.reshape(B, S, 3).astype(jnp.float32)
    if S_pad != S:
        c = jnp.pad(c, ((0, 0), (0, S_pad - S), (0, 0)))
    c_rows = c                                    # [B, S_pad, 3]
    c_cols = jnp.transpose(c, (0, 2, 1))          # [B, 3, S_pad]  (tiny glue)

    w1 = jnp.asarray(w1, jnp.float32)
    w2 = jnp.asarray(w2, jnp.float32)
    w3 = jnp.asarray(w3, jnp.float32)
    b1 = jnp.asarray(b1, jnp.float32).reshape(-1)
    b2 = jnp.asarray(b2, jnp.float32).reshape(-1)
    b3 = jnp.asarray(b3, jnp.float32).reshape(-1)

    # Fold the constant l=0 plane into the first-layer bias (K -> K-1 = 8 planes).
    fold_l0 = max_degree >= 1
    if fold_l0:
        b1_eff = b1 + _SH_C0 * w1[0]
        w1_eff = w1[1:]
    else:
        b1_eff = b1
        w1_eff = w1
    K_eff = w1_eff.shape[0]

    # Striped weights: W_hat[c*8+i, k*8+j] = W.T[c,k] * I[i,j].  One matmul per
    # layer per 8-row group; layer-2 lhs is (256, 256) = native v6e/v7x MXU tile.
    eye = jnp.eye(TI_SUB, dtype=jnp.float32)
    W1 = jnp.kron(w1_eff.T, eye).astype(jnp.bfloat16)   # (hidden*8, K_eff*8)
    W2 = jnp.kron(w2.T, eye).astype(jnp.bfloat16)       # (hidden*8, hidden*8)
    W3 = jnp.kron(w3.T, eye).astype(jnp.bfloat16)       # (H*8,      hidden*8)
    B1 = jnp.repeat(b1_eff, TI_SUB).reshape(-1, 1)      # (hidden*8, 1) f32
    B2 = jnp.repeat(b2, TI_SUB).reshape(-1, 1)
    B3 = jnp.repeat(b3, TI_SUB).reshape(-1, 1)

    grid = (B, S_pad // TI_BLK, S_pad // TJ)
    kernel = functools.partial(_sh_bias_kernel, max_degree=max_degree, eps=eps,
                               fold_l0=fold_l0, ti_sub=TI_SUB, act_dtype=act_dtype)

    out = pl.pallas_call(
        kernel,
        out_shape=jax.ShapeDtypeStruct((B, H, S_pad, S_pad), jnp.float32),
        grid=grid,
        in_specs=[
            pl.BlockSpec((1, TI_BLK, 3), lambda b, i, j: (b, i, 0)),          # rows
            pl.BlockSpec((1, 3, TJ), lambda b, i, j: (b, 0, j)),              # cols
            pl.BlockSpec((hidden * TI_SUB, K_eff * TI_SUB), lambda b, i, j: (0, 0)),
            pl.BlockSpec((hidden * TI_SUB, 1), lambda b, i, j: (0, 0)),
            pl.BlockSpec((hidden * TI_SUB, hidden * TI_SUB), lambda b, i, j: (0, 0)),
            pl.BlockSpec((hidden * TI_SUB, 1), lambda b, i, j: (0, 0)),
            pl.BlockSpec((H * TI_SUB, hidden * TI_SUB), lambda b, i, j: (0, 0)),
            pl.BlockSpec((H * TI_SUB, 1), lambda b, i, j: (0, 0)),
        ],
        out_specs=pl.BlockSpec((1, H, TI_BLK, TJ), lambda b, i, j: (b, 0, i, j)),
        scratch_shapes=[pltpu.VMEM((K_eff * TI_SUB, TJ), jnp.float32)],
        compiler_params=pltpu.CompilerParams(
            dimension_semantics=("parallel", "parallel", "parallel"),
            vmem_limit_bytes=32 * 1024 * 1024),
    )(c_rows, c_cols, W1, B1, W2, B2, W3, B3)

    if S_pad != S:
        out = out[:, :, :S, :S]
    return out


def reference(coords, params, *, max_degree, eps=1e-6):
    """Pure-JAX reference matching the PyTorch forward."""
    w1, b1, w2, b2, w3, b3 = params
    B, T, N, _ = coords.shape
    S = T * N
    c = coords.reshape(B, S, 3)
    rel = c[:, :, None, :] - c[:, None, :, :]
    norm = jnp.sqrt(jnp.sum(rel * rel, axis=-1, keepdims=True))
    u = rel / (norm + eps)
    n2 = jnp.maximum(jnp.sqrt(jnp.sum(u * u, axis=-1, keepdims=True)), 1e-12)
    u = u / n2
    x, y, z = u[..., 0], u[..., 1], u[..., 2]
    feats = jnp.stack(sh_features(x, y, z, max_degree), axis=-1)   # (B, S, S, K)
    hp = jax.lax.Precision.HIGHEST
    h = jax.nn.silu(jnp.dot(feats, w1, precision=hp) + b1[0])
    h = jax.nn.silu(jnp.dot(h, w2, precision=hp) + b2[0])
    o = jnp.dot(h, w3, precision=hp) + b3[0]
    return jnp.transpose(o, (0, 3, 1, 2))


if __name__ == "__main__":
    B, T, N = 2, 2, 4                  # S = 8
    num_heads, hidden, max_degree = 4, 32, 2
    K = (max_degree + 1) ** 2          # num_coeff = 9

    key = jax.random.PRNGKey(0)
    kc, k1, k2, k3, k4, k5, k6 = jax.random.split(key, 7)
    coords = jax.random.normal(kc, (B, T, N, 3), dtype=jnp.float32)

    w1 = jax.random.normal(k1, (K, hidden), dtype=jnp.float32) * 0.3
    b1 = jax.random.normal(k2, (1, hidden), dtype=jnp.float32) * 0.05
    w2 = jax.random.normal(k3, (hidden, hidden), dtype=jnp.float32) * 0.18
    b2 = jax.random.normal(k4, (1, hidden), dtype=jnp.float32) * 0.05
    w3 = jax.random.normal(k5, (hidden, num_heads), dtype=jnp.float32) * 0.18
    b3 = jax.random.normal(k6, (1, num_heads), dtype=jnp.float32) * 0.05
    params = (w1, b1, w2, b2, w3, b3)

    out = spherical_harmonics_attention_bias(
        coords, params, max_degree=max_degree, num_heads=num_heads)
    out = jax.block_until_ready(out)

    ref = reference(coords, params, max_degree=max_degree)
    assert out.shape == (B, num_heads, T * N, T * N), out.shape
    max_err = float(jnp.max(jnp.abs(out - ref)))
    assert jnp.allclose(out, ref, atol=5e-2, rtol=5e-2), f"max_err={max_err}"

    print("KERNEL_OK")
</pallas_src>

<mosaic_0001>
module attributes {stable_mosaic.version = 11 : i64} {
  func.func @_sh_bias_kernel(%arg0: i32, %arg1: i32, %arg2: i32, %arg3: memref<1x32x3xf32, #tpu.memory_space<vmem>>, %arg4: memref<1x3x128xf32, #tpu.memory_space<vmem>>, %arg5: memref<256x64xbf16, #tpu.memory_space<vmem>>, %arg6: memref<256x1xf32, #tpu.memory_space<vmem>>, %arg7: memref<256x256xbf16, #tpu.memory_space<vmem>>, %arg8: memref<256x1xf32, #tpu.memory_space<vmem>>, %arg9: memref<32x256xbf16, #tpu.memory_space<vmem>>, %arg10: memref<32x1xf32, #tpu.memory_space<vmem>>, %arg11: memref<1x4x32x128xf32, #tpu.memory_space<vmem>>, %arg12: memref<64x128xf32, #tpu.memory_space<vmem>>) attributes {dimension_semantics = [#tpu.dimension_semantics<parallel>, #tpu.dimension_semantics<parallel>, #tpu.dimension_semantics<parallel>], iteration_bounds = array<i64: 2, 4, 1>, scalar_prefetch = 0 : i64, scratch_operands = 1 : i64, tpu.core_type = #tpu.core_type<tc>, window_params = [{transform_indices = @transform_0, window_bounds = array<i64: 1, 32, 3>}, {transform_indices = @transform_1, window_bounds = array<i64: 1, 3, 128>}, {pipeline_mode = #tpu.pipeline_mode<synchronous>, transform_indices = @transform_2, window_bounds = array<i64: 256, 64>}, {pipeline_mode = #tpu.pipeline_mode<synchronous>, transform_indices = @transform_3, window_bounds = array<i64: 256, 1>}, {pipeline_mode = #tpu.pipeline_mode<synchronous>, transform_indices = @transform_4, window_bounds = array<i64: 256, 256>}, {pipeline_mode = #tpu.pipeline_mode<synchronous>, transform_indices = @transform_5, window_bounds = array<i64: 256, 1>}, {pipeline_mode = #tpu.pipeline_mode<synchronous>, transform_indices = @transform_6, window_bounds = array<i64: 32, 256>}, {pipeline_mode = #tpu.pipeline_mode<synchronous>, transform_indices = @transform_7, window_bounds = array<i64: 32, 1>}, {transform_indices = @transform_8, window_bounds = array<i64: 1, 4, 32, 128>}]} {
    %c0 = arith.constant 0 : index
    %c0_0 = arith.constant 0 : index
    %c0_1 = arith.constant 0 : index
    %0 = vector.load %arg3[%c0, %c0_0, %c0_1] : memref<1x32x3xf32, #tpu.memory_space<vmem>>, vector<1x32x3xf32>
    %1 = vector.shape_cast %0 : vector<1x32x3xf32> to vector<32x3xf32>
    %c0_2 = arith.constant 0 : index
    %c0_3 = arith.constant 0 : index
    %c0_4 = arith.constant 0 : index
    %2 = vector.load %arg4[%c0_2, %c0_3, %c0_4] : memref<1x3x128xf32, #tpu.memory_space<vmem>>, vector<1x3x128xf32>
    %3 = vector.shape_cast %2 : vector<1x3x128xf32> to vector<3x128xf32>
    %4 = vector.extract_strided_slice %3 {offsets = [0, 0], sizes = [1, 128], strides = [1, 1]} : vector<3x128xf32> to vector<1x128xf32>
    %5 = vector.extract_strided_slice %3 {offsets = [1, 0], sizes = [1, 128], strides = [1, 1]} : vector<3x128xf32> to vector<1x128xf32>
    %6 = vector.extract_strided_slice %3 {offsets = [2, 0], sizes = [1, 128], strides = [1, 1]} : vector<3x128xf32> to vector<1x128xf32>
    %c0_5 = arith.constant 0 : index
    %c0_6 = arith.constant 0 : index
    %7 = vector.load %arg5[%c0_5, %c0_6] : memref<256x64xbf16, #tpu.memory_space<vmem>>, vector<256x64xbf16>
    %c0_7 = arith.constant 0 : index
    %c0_8 = arith.constant 0 : index
    %8 = vector.load %arg7[%c0_7, %c0_8] : memref<256x256xbf16, #tpu.memory_space<vmem>>, vector<256x256xbf16>
    %c0_9 = arith.constant 0 : index
    %c0_10 = arith.constant 0 : index
    %9 = vector.load %arg9[%c0_9, %c0_10] : memref<32x256xbf16, #tpu.memory_space<vmem>>, vector<32x256xbf16>
    %c0_11 = arith.constant 0 : index
    %c0_12 = arith.constant 0 : index
    %10 = vector.load %arg6[%c0_11, %c0_12] : memref<256x1xf32, #tpu.memory_space<vmem>>, vector<256x1xf32>
    %c0_13 = arith.constant 0 : index
    %c0_14 = arith.constant 0 : index
    %11 = vector.load %arg8[%c0_13, %c0_14] : memref<256x1xf32, #tpu.memory_space<vmem>>, vector<256x1xf32>
    %c0_15 = arith.constant 0 : index
    %c0_16 = arith.constant 0 : index
    %12 = vector.load %arg10[%c0_15, %c0_16] : memref<32x1xf32, #tpu.memory_space<vmem>>, vector<32x1xf32>
    %13 = vector.extract_strided_slice %1 {offsets = [0, 0], sizes = [8, 3], strides = [1, 1]} : vector<32x3xf32> to vector<8x3xf32>
    %14 = vector.extract_strided_slice %13 {offsets = [0, 0], sizes = [8, 1], strides = [1, 1]} : vector<8x3xf32> to vector<8x1xf32>
    %15 = vector.extract_strided_slice %13 {offsets = [0, 1], sizes = [8, 1], strides = [1, 1]} : vector<8x3xf32> to vector<8x1xf32>
    %16 = vector.extract_strided_slice %13 {offsets = [0, 2], sizes = [8, 1], strides = [1, 1]} : vector<8x3xf32> to vector<8x1xf32>
    %17 = vector.broadcast %14 : vector<8x1xf32> to vector<8x128xf32>
    %18 = vector.broadcast %4 : vector<1x128xf32> to vector<8x128xf32>
    %19 = arith.subf %17, %18 : vector<8x128xf32>
    %20 = vector.broadcast %15 : vector<8x1xf32> to vector<8x128xf32>
    %21 = vector.broadcast %5 : vector<1x128xf32> to vector<8x128xf32>
    %22 = arith.subf %20, %21 : vector<8x128xf32>
    %23 = vector.broadcast %16 : vector<8x1xf32> to vector<8x128xf32>
    %24 = vector.broadcast %6 : vector<1x128xf32> to vector<8x128xf32>
    %25 = arith.subf %23, %24 : vector<8x128xf32>
    %26 = arith.mulf %19, %19 : vector<8x128xf32>
    %27 = arith.mulf %22, %22 : vector<8x128xf32>
    %28 = arith.addf %26, %27 : vector<8x128xf32>
    %29 = arith.mulf %25, %25 : vector<8x128xf32>
    %30 = arith.addf %28, %29 : vector<8x128xf32>
    %31 = math.sqrt %30 : vector<8x128xf32>
    %cst = arith.constant 9.99999997E-7 : f32
    %32 = vector.broadcast %cst : f32 to vector<8x128xf32>
    %33 = arith.addf %31, %32 : vector<8x128xf32>
    %cst_17 = arith.constant 9.99999996E-13 : f32
    %34 = vector.broadcast %cst_17 : f32 to vector<8x128xf32>
    %35 = arith.mulf %33, %34 : vector<8x128xf32>
    %36 = arith.maximumf %31, %35 : vector<8x128xf32>
    %cst_18 = arith.constant 1.000000e+00 : f32
    %37 = vector.broadcast %cst_18 : f32 to vector<8x128xf32>
    %38 = arith.divf %37, %36 : vector<8x128xf32>
    %39 = arith.mulf %19, %38 : vector<8x128xf32>
    %40 = arith.mulf %22, %38 : vector<8x128xf32>
    %41 = arith.mulf %25, %38 : vector<8x128xf32>
    %cst_19 = arith.constant 0.488602519 : f32
    %42 = vector.broadcast %cst_19 : f32 to vector<8x128xf32>
    %43 = arith.mulf %42, %39 : vector<8x128xf32>
    %cst_20 = arith.constant 0.488602519 : f32
    %44 = vector.broadcast %cst_20 : f32 to vector<8x128xf32>
    %45 = arith.mulf %44, %40 : vector<8x128xf32>
    %cst_21 = arith.constant 0.488602519 : f32
    %46 = vector.broadcast %cst_21 : f32 to vector<8x128xf32>
    %47 = arith.mulf %46, %41 : vector<8x128xf32>
    %cst_22 = arith.constant 1.09254849 : f32
    %48 = vector.broadcast %cst_22 : f32 to vector<8x128xf32>
    %49 = arith.mulf %48, %39 : vector<8x128xf32>
    %50 = arith.mulf %49, %41 : vector<8x128xf32>
    %cst_23 = arith.constant 1.09254849 : f32
    %51 = vector.broadcast %cst_23 : f32 to vector<8x128xf32>
    %52 = arith.mulf %51, %39 : vector<8x128xf32>
    %53 = arith.mulf %52, %40 : vector<8x128xf32>
    %54 = arith.mulf %40, %40 : vector<8x128xf32>
    %55 = arith.mulf %39, %39 : vector<8x128xf32>
    %56 = arith.mulf %41, %41 : vector<8x128xf32>
    %57 = arith.addf %55, %56 : vector<8x128xf32>
    %cst_24 = arith.constant 5.000000e-01 : f32
    %58 = vector.broadcast %cst_24 : f32 to vector<8x128xf32>
    %59 = arith.mulf %58, %57 : vector<8x128xf32>
    %60 = arith.subf %54, %59 : vector<8x128xf32>
    %cst_25 = arith.constant 0.63078314 : f32
    %61 = vector.broadcast %cst_25 : f32 to vector<8x128xf32>
    %62 = arith.mulf %61, %60 : vector<8x128xf32>
    %cst_26 = arith.constant 1.09254849 : f32
    %63 = vector.broadcast %cst_26 : f32 to vector<8x128xf32>
    %64 = arith.mulf %63, %40 : vector<8x128xf32>
    %65 = arith.mulf %64, %41 : vector<8x128xf32>
    %66 = arith.mulf %41, %41 : vector<8x128xf32>
    %67 = arith.mulf %39, %39 : vector<8x128xf32>
    %68 = arith.subf %66, %67 : vector<8x128xf32>
    %cst_27 = arith.constant 0.546274245 : f32
    %69 = vector.broadcast %cst_27 : f32 to vector<8x128xf32>
    %70 = arith.mulf %69, %68 : vector<8x128xf32>
    %c0_28 = arith.constant 0 : index
    %c0_29 = arith.constant 0 : index
    %71 = vector.load %arg12[%c0_28, %c0_29] : memref<64x128xf32, #tpu.memory_space<vmem>>, vector<8x128xf32>
    tpu.vector_store %arg12[%c0_28, %c0_29], %43 {strides = array<i32>} : memref<64x128xf32, #tpu.memory_space<vmem>>, vector<8x128xf32>,
    %c8 = arith.constant 8 : index
    %c0_30 = arith.constant 0 : index
    %72 = vector.load %arg12[%c8, %c0_30] : memref<64x128xf32, #tpu.memory_space<vmem>>, vector<8x128xf32>
    tpu.vector_store %arg12[%c8, %c0_30], %45 {strides = array<i32>} : memref<64x128xf32, #tpu.memory_space<vmem>>, vector<8x128xf32>,
    %c16 = arith.constant 16 : index
    %c0_31 = arith.constant 0 : index
    %73 = vector.load %arg12[%c16, %c0_31] : memref<64x128xf32, #tpu.memory_space<vmem>>, vector<8x128xf32>
    tpu.vector_store %arg12[%c16, %c0_31], %47 {strides = array<i32>} : memref<64x128xf32, #tpu.memory_space<vmem>>, vector<8x128xf32>,
    %c24 = arith.constant 24 : index
    %c0_32 = arith.constant 0 : index
    %74 = vector.load %arg12[%c24, %c0_32] : memref<64x128xf32, #tpu.memory_space<vmem>>, vector<8x128xf32>
    tpu.vector_store %arg12[%c24, %c0_32], %50 {strides = array<i32>} : memref<64x128xf32, #tpu.memory_space<vmem>>, vector<8x128xf32>,
    %c32 = arith.constant 32 : index
    %c0_33 = arith.constant 0 : index
    %75 = vector.load %arg12[%c32, %c0_33] : memref<64x128xf32, #tpu.memory_space<vmem>>, vector<8x128xf32>
    tpu.vector_store %arg12[%c32, %c0_33], %53 {strides = array<i32>} : memref<64x128xf32, #tpu.memory_space<vmem>>, vector<8x128xf32>,
    %c40 = arith.constant 40 : index
    %c0_34 = arith.constant 0 : index
    %76 = vector.load %arg12[%c40, %c0_34] : memref<64x128xf32, #tpu.memory_space<vmem>>, vector<8x128xf32>
    tpu.vector_store %arg12[%c40, %c0_34], %62 {strides = array<i32>} : memref<64x128xf32, #tpu.memory_space<vmem>>, vector<8x128xf32>,
    %c48 = arith.constant 48 : index
    %c0_35 = arith.constant 0 : index
    %77 = vector.load %arg12[%c48, %c0_35] : memref<64x128xf32, #tpu.memory_space<vmem>>, vector<8x128xf32>
    tpu.vector_store %arg12[%c48, %c0_35], %65 {strides = array<i32>} : memref<64x128xf32, #tpu.memory_space<vmem>>, vector<8x128xf32>,
    %c56 = arith.constant 56 : index
    %c0_36 = arith.constant 0 : index
    %78 = vector.load %arg12[%c56, %c0_36] : memref<64x128xf32, #tpu.memory_space<vmem>>, vector<8x128xf32>
    tpu.vector_store %arg12[%c56, %c0_36], %70 {strides = array<i32>} : memref<64x128xf32, #tpu.memory_space<vmem>>, vector<8x128xf32>,
    %c0_37 = arith.constant 0 : index
    %c0_38 = arith.constant 0 : index
    %79 = vector.load %arg12[%c0_37, %c0_38] : memref<64x128xf32, #tpu.memory_space<vmem>>, vector<64x128xf32>
    %80 = arith.truncf %79 : vector<64x128xf32> to vector<64x128xbf16>
    %cst_39 = arith.constant dense<0.000000e+00> : vector<256x128xf32>
    %81 = tpu.matmul %7, %80, %cst_39 {dimension_numbers = #tpu.dot_dimension_numbers<[1], [0], [0], [1], [0, 0, 1, 1], [], []>} : vector<256x64xbf16>, vector<64x128xbf16>, vector<256x128xf32> -> vector<256x128xf32>
    %82 = vector.broadcast %10 : vector<256x1xf32> to vector<256x128xf32>
    %83 = arith.addf %81, %82 : vector<256x128xf32>
    %84 = arith.truncf %83 : vector<256x128xf32> to vector<256x128xbf16>
    %cst_40 = arith.constant 5.000000e-01 : bf16
    %85 = vector.broadcast %cst_40 : bf16 to vector<256x128xbf16>
    %86 = arith.mulf %85, %84 : vector<256x128xbf16>
    %87 = math.tanh %86 : vector<256x128xbf16>
    %cst_41 = arith.constant 5.000000e-01 : bf16
    %88 = vector.broadcast %cst_41 : bf16 to vector<256x128xbf16>
    %89 = arith.mulf %88, %87 : vector<256x128xbf16>
    %cst_42 = arith.constant 5.000000e-01 : bf16
    %90 = vector.broadcast %cst_42 : bf16 to vector<256x128xbf16>
    %91 = arith.addf %89, %90 : vector<256x128xbf16>
    %92 = arith.mulf %84, %91 : vector<256x128xbf16>
    %cst_43 = arith.constant dense<0.000000e+00> : vector<256x128xf32>
    %93 = tpu.matmul %8, %92, %cst_43 {dimension_numbers = #tpu.dot_dimension_numbers<[1], [0], [0], [1], [0, 0, 1, 1], [], []>} : vector<256x256xbf16>, vector<256x128xbf16>, vector<256x128xf32> -> vector<256x128xf32>
    %94 = vector.broadcast %11 : vector<256x1xf32> to vector<256x128xf32>
    %95 = arith.addf %93, %94 : vector<256x128xf32>
    %96 = arith.truncf %95 : vector<256x128xf32> to vector<256x128xbf16>
    %cst_44 = arith.constant 5.000000e-01 : bf16
    %97 = vector.broadcast %cst_44 : bf16 to vector<256x128xbf16>
    %98 = arith.mulf %97, %96 : vector<256x128xbf16>
    %99 = math.tanh %98 : vector<256x128xbf16>
    %cst_45 = arith.constant 5.000000e-01 : bf16
    %100 = vector.broadcast %cst_45 : bf16 to vector<256x128xbf16>
    %101 = arith.mulf %100, %99 : vector<256x128xbf16>
    %cst_46 = arith.constant 5.000000e-01 : bf16
    %102 = vector.broadcast %cst_46 : bf16 to vector<256x128xbf16>
    %103 = arith.addf %101, %102 : vector<256x128xbf16>
    %104 = arith.mulf %96, %103 : vector<256x128xbf16>
    %cst_47 = arith.constant dense<0.000000e+00> : vector<32x128xf32>
    %105 = tpu.matmul %9, %104, %cst_47 {dimension_numbers = #tpu.dot_dimension_numbers<[1], [0], [0], [1], [0, 0, 1, 1], [], []>} : vector<32x256xbf16>, vector<256x128xbf16>, vector<32x128xf32> -> vector<32x128xf32>
    %106 = vector.broadcast %12 : vector<32x1xf32> to vector<32x128xf32>
    %107 = arith.addf %105, %106 : vector<32x128xf32>
    %108 = vector.extract_strided_slice %107 {offsets = [0, 0], sizes = [8, 128], strides = [1, 1]} : vector<32x128xf32> to vector<8x128xf32>
    %c0_48 = arith.constant 0 : index
    %c0_49 = arith.constant 0 : index
    %c0_50 = arith.constant 0 : index
    %c0_51 = arith.constant 0 : index
    %109 = vector.load %arg11[%c0_48, %c0_49, %c0_50, %c0_51] : memref<1x4x32x128xf32, #tpu.memory_space<vmem>>, vector<1x1x8x128xf32>
    %110 = vector.shape_cast %109 : vector<1x1x8x128xf32> to vector<8x128xf32>
    %111 = vector.shape_cast %108 : vector<8x128xf32> to vector<1x1x8x128xf32>
    tpu.vector_store %arg11[%c0_48, %c0_49, %c0_50, %c0_51], %111 {strides = array<i32>} : memref<1x4x32x128xf32, #tpu.memory_space<vmem>>, vector<1x1x8x128xf32>,
    %112 = vector.extract_strided_slice %107 {offsets = [8, 0], sizes = [8, 128], strides = [1, 1]} : vector<32x128xf32> to vector<8x128xf32>
    %c0_52 = arith.constant 0 : index
    %c1 = arith.constant 1 : index
    %c0_53 = arith.constant 0 : index
    %c0_54 = arith.constant 0 : index
    %113 = vector.load %arg11[%c0_52, %c1, %c0_53, %c0_54] : memref<1x4x32x128xf32, #tpu.memory_space<vmem>>, vector<1x1x8x128xf32>
    %114 = vector.shape_cast %113 : vector<1x1x8x128xf32> to vector<8x128xf32>
    %115 = vector.shape_cast %112 : vector<8x128xf32> to vector<1x1x8x128xf32>
    tpu.vector_store %arg11[%c0_52, %c1, %c0_53, %c0_54], %115 {strides = array<i32>} : memref<1x4x32x128xf32, #tpu.memory_space<vmem>>, vector<1x1x8x128xf32>,
    %116 = vector.extract_strided_slice %107 {offsets = [16, 0], sizes = [8, 128], strides = [1, 1]} : vector<32x128xf32> to vector<8x128xf32>
    %c0_55 = arith.constant 0 : index
    %c2 = arith.constant 2 : index
    %c0_56 = arith.constant 0 : index
    %c0_57 = arith.constant 0 : index
    %117 = vector.load %arg11[%c0_55, %c2, %c0_56, %c0_57] : memref<1x4x32x128xf32, #tpu.memory_space<vmem>>, vector<1x1x8x128xf32>
    %118 = vector.shape_cast %117 : vector<1x1x8x128xf32> to vector<8x128xf32>
    %119 = vector.shape_cast %116 : vector<8x128xf32> to vector<1x1x8x128xf32>
    tpu.vector_store %arg11[%c0_55, %c2, %c0_56, %c0_57], %119 {strides = array<i32>} : memref<1x4x32x128xf32, #tpu.memory_space<vmem>>, vector<1x1x8x128xf32>,
    %120 = vector.extract_strided_slice %107 {offsets = [24, 0], sizes = [8, 128], strides = [1, 1]} : vector<32x128xf32> to vector<8x128xf32>
    %c0_58 = arith.constant 0 : index
    %c3 = arith.constant 3 : index
    %c0_59 = arith.constant 0 : index
    %c0_60 = arith.constant 0 : index
    %121 = vector.load %arg11[%c0_58, %c3, %c0_59, %c0_60] : memref<1x4x32x128xf32, #tpu.memory_space<vmem>>, vector<1x1x8x128xf32>
    %122 = vector.shape_cast %121 : vector<1x1x8x128xf32> to vector<8x128xf32>
    %123 = vector.shape_cast %120 : vector<8x128xf32> to vector<1x1x8x128xf32>
    tpu.vector_store %arg11[%c0_58, %c3, %c0_59, %c0_60], %123 {strides = array<i32>} : memref<1x4x32x128xf32, #tpu.memory_space<vmem>>, vector<1x1x8x128xf32>,
    %124 = vector.extract_strided_slice %1 {offsets = [8, 0], sizes = [8, 3], strides = [1, 1]} : vector<32x3xf32> to vector<8x3xf32>
    %125 = vector.extract_strided_slice %124 {offsets = [0, 0], sizes = [8, 1], strides = [1, 1]} : vector<8x3xf32> to vector<8x1xf32>
    %126 = vector.extract_strided_slice %124 {offsets = [0, 1], sizes = [8, 1], strides = [1, 1]} : vector<8x3xf32> to vector<8x1xf32>
    %127 = vector.extract_strided_slice %124 {offsets = [0, 2], sizes = [8, 1], strides = [1, 1]} : vector<8x3xf32> to vector<8x1xf32>
    %128 = vector.broadcast %125 : vector<8x1xf32> to vector<8x128xf32>
    %129 = vector.broadcast %4 : vector<1x128xf32> to vector<8x128xf32>
    %130 = arith.subf %128, %129 : vector<8x128xf32>
    %131 = vector.broadcast %126 : vector<8x1xf32> to vector<8x128xf32>
    %132 = vector.broadcast %5 : vector<1x128xf32> to vector<8x128xf32>
    %133 = arith.subf %131, %132 : vector<8x128xf32>
    %134 = vector.broadcast %127 : vector<8x1xf32> to vector<8x128xf32>
    %135 = vector.broadcast %6 : vector<1x128xf32> to vector<8x128xf32>
    %136 = arith.subf %134, %135 : vector<8x128xf32>
    %137 = arith.mulf %130, %130 : vector<8x128xf32>
    %138 = arith.mulf %133, %133 : vector<8x128xf32>
    %139 = arith.addf %137, %138 : vector<8x128xf32>
    %140 = arith.mulf %136, %136 : vector<8x128xf32>
    %141 = arith.addf %139, %140 : vector<8x128xf32>
    %142 = math.sqrt %141 : vector<8x128xf32>
    %cst_61 = arith.constant 9.99999997E-7 : f32
    %143 = vector.broadcast %cst_61 : f32 to vector<8x128xf32>
    %144 = arith.addf %142, %143 : vector<8x128xf32>
    %cst_62 = arith.constant 9.99999996E-13 : f32
    %145 = vector.broadcast %cst_62 : f32 to vector<8x128xf32>
    %146 = arith.mulf %144, %145 : vector<8x128xf32>
    %147 = arith.maximumf %142, %146 : vector<8x128xf32>
    %cst_63 = arith.constant 1.000000e+00 : f32
    %148 = vector.broadcast %cst_63 : f32 to vector<8x128xf32>
    %149 = arith.divf %148, %147 : vector<8x128xf32>
    %150 = arith.mulf %130, %149 : vector<8x128xf32>
    %151 = arith.mulf %133, %149 : vector<8x128xf32>
    %152 = arith.mulf %136, %149 : vector<8x128xf32>
    %cst_64 = arith.constant 0.488602519 : f32
    %153 = vector.broadcast %cst_64 : f32 to vector<8x128xf32>
    %154 = arith.mulf %153, %150 : vector<8x128xf32>
    %cst_65 = arith.constant 0.488602519 : f32
    %155 = vector.broadcast %cst_65 : f32 to vector<8x128xf32>
    %156 = arith.mulf %155, %151 : vector<8x128xf32>
    %cst_66 = arith.constant 0.488602519 : f32
    %157 = vector.broadcast %cst_66 : f32 to vector<8x128xf32>
    %158 = arith.mulf %157, %152 : vector<8x128xf32>
    %cst_67 = arith.constant 1.09254849 : f32
    %159 = vector.broadcast %cst_67 : f32 to vector<8x128xf32>
    %160 = arith.mulf %159, %150 : vector<8x128xf32>
    %161 = arith.mulf %160, %152 : vector<8x128xf32>
    %cst_68 = arith.constant 1.09254849 : f32
    %162 = vector.broadcast %cst_68 : f32 to vector<8x128xf32>
    %163 = arith.mulf %162, %150 : vector<8x128xf32>
    %164 = arith.mulf %163, %151 : vector<8x128xf32>
    %165 = arith.mulf %151, %151 : vector<8x128xf32>
    %166 = arith.mulf %150, %150 : vector<8x128xf32>
    %167 = arith.mulf %152, %152 : vector<8x128xf32>
    %168 = arith.addf %166, %167 : vector<8x128xf32>
    %cst_69 = arith.constant 5.000000e-01 : f32
    %169 = vector.broadcast %cst_69 : f32 to vector<8x128xf32>
    %170 = arith.mulf %169, %168 : vector<8x128xf32>
    %171 = arith.subf %165, %170 : vector<8x128xf32>
    %cst_70 = arith.constant 0.63078314 : f32
    %172 = vector.broadcast %cst_70 : f32 to vector<8x128xf32>
    %173 = arith.mulf %172, %171 : vector<8x128xf32>
    %cst_71 = arith.constant 1.09254849 : f32
    %174 = vector.broadcast %cst_71 : f32 to vector<8x128xf32>
    %175 = arith.mulf %174, %151 : vector<8x128xf32>
    %176 = arith.mulf %175, %152 : vector<8x128xf32>
    %177 = arith.mulf %152, %152 : vector<8x128xf32>
    %178 = arith.mulf %150, %150 : vector<8x128xf32>
    %179 = arith.subf %177, %178 : vector<8x128xf32>
    %cst_72 = arith.constant 0.546274245 : f32
    %180 = vector.broadcast %cst_72 : f32 to vector<8x128xf32>
    %181 = arith.mulf %180, %179 : vector<8x128xf32>
    %c0_73 = arith.constant 0 : index
    %c0_74 = arith.constant 0 : index
    %182 = vector.load %arg12[%c0_73, %c0_74] : memref<64x128xf32, #tpu.memory_space<vmem>>, vector<8x128xf32>
    tpu.vector_store %arg12[%c0_73, %c0_74], %154 {strides = array<i32>} : memref<64x128xf32, #tpu.memory_space<vmem>>, vector<8x128xf32>,
    %c8_75 = arith.constant 8 : index
    %c0_76 = arith.constant 0 : index
    %183 = vector.load %arg12[%c8_75, %c0_76] : memref<64x128xf32, #tpu.memory_space<vmem>>, vector<8x128xf32>
    tpu.vector_store %arg12[%c8_75, %c0_76], %156 {strides = array<i32>} : memref<64x128xf32, #tpu.memory_space<vmem>>, vector<8x128xf32>,
    %c16_77 = arith.constant 16 : index
    %c0_78 = arith.constant 0 : index
    %184 = vector.load %arg12[%c16_77, %c0_78] : memref<64x128xf32, #tpu.memory_space<vmem>>, vector<8x128xf32>
    tpu.vector_store %arg12[%c16_77, %c0_78], %158 {strides = array<i32>} : memref<64x128xf32, #tpu.memory_space<vmem>>, vector<8x128xf32>,
    %c24_79 = arith.constant 24 : index
    %c0_80 = arith.constant 0 : index
    %185 = vector.load %arg12[%c24_79, %c0_80] : memref<64x128xf32, #tpu.memory_space<vmem>>, vector<8x128xf32>
    tpu.vector_store %arg12[%c24_79, %c0_80], %161 {strides = array<i32>} : memref<64x128xf32, #tpu.memory_space<vmem>>, vector<8x128xf32>,
    %c32_81 = arith.constant 32 : index
    %c0_82 = arith.constant 0 : index
    %186 = vector.load %arg12[%c32_81, %c0_82] : memref<64x128xf32, #tpu.memory_space<vmem>>, vector<8x128xf32>
    tpu.vector_store %arg12[%c32_81, %c0_82], %164 {strides = array<i32>} : memref<64x128xf32, #tpu.memory_space<vmem>>, vector<8x128xf32>,
    %c40_83 = arith.constant 40 : index
    %c0_84 = arith.constant 0 : index
    %187 = vector.load %arg12[%c40_83, %c0_84] : memref<64x128xf32, #tpu.memory_space<vmem>>, vector<8x128xf32>
    tpu.vector_store %arg12[%c40_83, %c0_84], %173 {strides = array<i32>} : memref<64x128xf32, #tpu.memory_space<vmem>>, vector<8x128xf32>,
    %c48_85 = arith.constant 48 : index
    %c0_86 = arith.constant 0 : index
    %188 = vector.load %arg12[%c48_85, %c0_86] : memref<64x128xf32, #tpu.memory_space<vmem>>, vector<8x128xf32>
    tpu.vector_store %arg12[%c48_85, %c0_86], %176 {strides = array<i32>} : memref<64x128xf32, #tpu.memory_space<vmem>>, vector<8x128xf32>,
    %c56_87 = arith.constant 56 : index
    %c0_88 = arith.constant 0 : index
    %189 = vector.load %arg12[%c56_87, %c0_88] : memref<64x128xf32, #tpu.memory_space<vmem>>, vector<8x128xf32>
    tpu.vector_store %arg12[%c56_87, %c0_88], %181 {strides = array<i32>} : memref<64x128xf32, #tpu.memory_space<vmem>>, vector<8x128xf32>,
    %c0_89 = arith.constant 0 : index
    %c0_90 = arith.constant 0 : index
    %190 = vector.load %arg12[%c0_89, %c0_90] : memref<64x128xf32, #tpu.memory_space<vmem>>, vector<64x128xf32>
    %191 = arith.truncf %190 : vector<64x128xf32> to vector<64x128xbf16>
    %cst_91 = arith.constant dense<0.000000e+00> : vector<256x128xf32>
    %192 = tpu.matmul %7, %191, %cst_91 {dimension_numbers = #tpu.dot_dimension_numbers<[1], [0], [0], [1], [0, 0, 1, 1], [], []>} : vector<256x64xbf16>, vector<64x128xbf16>, vector<256x128xf32> -> vector<256x128xf32>
    %193 = vector.broadcast %10 : vector<256x1xf32> to vector<256x128xf32>
    %194 = arith.addf %192, %193 : vector<256x128xf32>
    %195 = arith.truncf %194 : vector<256x128xf32> to vector<256x128xbf16>
    %cst_92 = arith.constant 5.000000e-01 : bf16
    %196 = vector.broadcast %cst_92 : bf16 to vector<256x128xbf16>
    %197 = arith.mulf %196, %195 : vector<256x128xbf16>
    %198 = math.tanh %197 : vector<256x128xbf16>
    %cst_93 = arith.constant 5.000000e-01 : bf16
    %199 = vector.broadcast %cst_93 : bf16 to vector<256x128xbf16>
    %200 = arith.mulf %199, %198 : vector<256x128xbf16>
    %cst_94 = arith.constant 5.000000e-01 : bf16
    %201 = vector.broadcast %cst_94 : bf16 to vector<256x128xbf16>
    %202 = arith.addf %200, %201 : vector<256x128xbf16>
    %203 = arith.mulf %195, %202 : vector<256x128xbf16>
    %cst_95 = arith.constant dense<0.000000e+00> : vector<256x128xf32>
    %204 = tpu.matmul %8, %203, %cst_95 {dimension_numbers = #tpu.dot_dimension_numbers<[1], [0], [0], [1], [0, 0, 1, 1], [], []>} : vector<256x256xbf16>, vector<256x128xbf16>, vector<256x128xf32> -> vector<256x128xf32>
    %205 = vector.broadcast %11 : vector<256x1xf32> to vector<256x128xf32>
    %206 = arith.addf %204, %205 : vector<256x128xf32>
    %207 = arith.truncf %206 : vector<256x128xf32> to vector<256x128xbf16>
    %cst_96 = arith.constant 5.000000e-01 : bf16
    %208 = vector.broadcast %cst_96 : bf16 to vector<256x128xbf16>
    %209 = arith.mulf %208, %207 : vector<256x128xbf16>
    %210 = math.tanh %209 : vector<256x128xbf16>
    %cst_97 = arith.constant 5.000000e-01 : bf16
    %211 = vector.broadcast %cst_97 : bf16 to vector<256x128xbf16>
    %212 = arith.mulf %211, %210 : vector<256x128xbf16>
    %cst_98 = arith.constant 5.000000e-01 : bf16
    %213 = vector.broadcast %cst_98 : bf16 to vector<256x128xbf16>
    %214 = arith.addf %212, %213 : vector<256x128xbf16>
    %215 = arith.mulf %207, %214 : vector<256x128xbf16>
    %cst_99 = arith.constant dense<0.000000e+00> : vector<32x128xf32>
    %216 = tpu.matmul %9, %215, %cst_99 {dimension_numbers = #tpu.dot_dimension_numbers<[1], [0], [0], [1], [0, 0, 1, 1], [], []>} : vector<32x256xbf16>, vector<256x128xbf16>, vector<32x128xf32> -> vector<32x128xf32>
    %217 = vector.broadcast %12 : vector<32x1xf32> to vector<32x128xf32>
    %218 = arith.addf %216, %217 : vector<32x128xf32>
    %219 = vector.extract_strided_slice %218 {offsets = [0, 0], sizes = [8, 128], strides = [1, 1]} : vector<32x128xf32> to vector<8x128xf32>
    %c0_100 = arith.constant 0 : index
    %c0_101 = arith.constant 0 : index
    %c8_102 = arith.constant 8 : index
    %c0_103 = arith.constant 0 : index
    %220 = vector.load %arg11[%c0_100, %c0_101, %c8_102, %c0_103] : memref<1x4x32x128xf32, #tpu.memory_space<vmem>>, vector<1x1x8x128xf32>
    %221 = vector.shape_cast %220 : vector<1x1x8x128xf32> to vector<8x128xf32>
    %222 = vector.shape_cast %219 : vector<8x128xf32> to vector<1x1x8x128xf32>
    tpu.vector_store %arg11[%c0_100, %c0_101, %c8_102, %c0_103], %222 {strides = array<i32>} : memref<1x4x32x128xf32, #tpu.memory_space<vmem>>, vector<1x1x8x128xf32>,
    %223 = vector.extract_strided_slice %218 {offsets = [8, 0], sizes = [8, 128], strides = [1, 1]} : vector<32x128xf32> to vector<8x128xf32>
    %c0_104 = arith.constant 0 : index
    %c1_105 = arith.constant 1 : index
    %c8_106 = arith.constant 8 : index
    %c0_107 = arith.constant 0 : index
    %224 = vector.load %arg11[%c0_104, %c1_105, %c8_106, %c0_107] : memref<1x4x32x128xf32, #tpu.memory_space<vmem>>, vector<1x1x8x128xf32>
    %225 = vector.shape_cast %224 : vector<1x1x8x128xf32> to vector<8x128xf32>
    %226 = vector.shape_cast %223 : vector<8x128xf32> to vector<1x1x8x128xf32>
    tpu.vector_store %arg11[%c0_104, %c1_105, %c8_106, %c0_107], %226 {strides = array<i32>} : memref<1x4x32x128xf32, #tpu.memory_space<vmem>>, vector<1x1x8x128xf32>,
    %227 = vector.extract_strided_slice %218 {offsets = [16, 0], sizes = [8, 128], strides = [1, 1]} : vector<32x128xf32> to vector<8x128xf32>
    %c0_108 = arith.constant 0 : index
    %c2_109 = arith.constant 2 : index
    %c8_110 = arith.constant 8 : index
    %c0_111 = arith.constant 0 : index
    %228 = vector.load %arg11[%c0_108, %c2_109, %c8_110, %c0_111] : memref<1x4x32x128xf32, #tpu.memory_space<vmem>>, vector<1x1x8x128xf32>
    %229 = vector.shape_cast %228 : vector<1x1x8x128xf32> to vector<8x128xf32>
    %230 = vector.shape_cast %227 : vector<8x128xf32> to vector<1x1x8x128xf32>
    tpu.vector_store %arg11[%c0_108, %c2_109, %c8_110, %c0_111], %230 {strides = array<i32>} : memref<1x4x32x128xf32, #tpu.memory_space<vmem>>, vector<1x1x8x128xf32>,
    %231 = vector.extract_strided_slice %218 {offsets = [24, 0], sizes = [8, 128], strides = [1, 1]} : vector<32x128xf32> to vector<8x128xf32>
    %c0_112 = arith.constant 0 : index
    %c3_113 = arith.constant 3 : index
    %c8_114 = arith.constant 8 : index
    %c0_115 = arith.constant 0 : index
    %232 = vector.load %arg11[%c0_112, %c3_113, %c8_114, %c0_115] : memref<1x4x32x128xf32, #tpu.memory_space<vmem>>, vector<1x1x8x128xf32>
    %233 = vector.shape_cast %232 : vector<1x1x8x128xf32> to vector<8x128xf32>
    %234 = vector.shape_cast %231 : vector<8x128xf32> to vector<1x1x8x128xf32>
    tpu.vector_store %arg11[%c0_112, %c3_113, %c8_114, %c0_115], %234 {strides = array<i32>} : memref<1x4x32x128xf32, #tpu.memory_space<vmem>>, vector<1x1x8x128xf32>,
    %235 = vector.extract_strided_slice %1 {offsets = [16, 0], sizes = [8, 3], strides = [1, 1]} : vector<32x3xf32> to vector<8x3xf32>
    %236 = vector.extract_strided_slice %235 {offsets = [0, 0], sizes = [8, 1], strides = [1, 1]} : vector<8x3xf32> to vector<8x1xf32>
    %237 = vector.extract_strided_slice %235 {offsets = [0, 1], sizes = [8, 1], strides = [1, 1]} : vector<8x3xf32> to vector<8x1xf32>
    %238 = vector.extract_strided_slice %235 {offsets = [0, 2], sizes = [8, 1], strides = [1, 1]} : vector<8x3xf32> to vector<8x1xf32>
    %239 = vector.broadcast %236 : vector<8x1xf32> to vector<8x128xf32>
    %240 = vector.broadcast %4 : vector<1x128xf32> to vector<8x128xf32>
    %241 = arith.subf %239, %240 : vector<8x128xf32>
    %242 = vector.broadcast %237 : vector<8x1xf32> to vector<8x128xf32>
    %243 = vector.broadcast %5 : vector<1x128xf32> to vector<8x128xf32>
    %244 = arith.subf %242, %243 : vector<8x128xf32>
    %245 = vector.broadcast %238 : vector<8x1xf32> to vector<8x128xf32>
    %246 = vector.broadcast %6 : vector<1x128xf32> to vector<8x128xf32>
    %247 = arith.subf %245, %246 : vector<8x128xf32>
    %248 = arith.mulf %241, %241 : vector<8x128xf32>
    %249 = arith.mulf %244, %244 : vector<8x128xf32>
    %250 = arith.addf %248, %249 : vector<8x128xf32>
    %251 = arith.mulf %247, %247 : vector<8x128xf32>
    %252 = arith.addf %250, %251 : vector<8x128xf32>
    %253 = math.sqrt %252 : vector<8x128xf32>
    %cst_116 = arith.constant 9.99999997E-7 : f32
    %254 = vector.broadcast %cst_116 : f32 to vector<8x128xf32>
    %255 = arith.addf %253, %254 : vector<8x128xf32>
    %cst_117 = arith.constant 9.99999996E-13 : f32
    %256 = vector.broadcast %cst_117 : f32 to vector<8x128xf32>
    %257 = arith.mulf %255, %256 : vector<8x128xf32>
    %258 = arith.maximumf %253, %257 : vector<8x128xf32>
    %cst_118 = arith.constant 1.000000e+00 : f32
    %259 = vector.broadcast %cst_118 : f32 to vector<8x128xf32>
    %260 = arith.divf %259, %258 : vector<8x128xf32>
    %261 = arith.mulf %241, %260 : vector<8x128xf32>
    %262 = arith.mulf %244, %260 : vector<8x128xf32>
    %263 = arith.mulf %247, %260 : vector<8x128xf32>
    %cst_119 = arith.constant 0.488602519 : f32
    %264 = vector.broadcast %cst_119 : f32 to vector<8x128xf32>
    %265 = arith.mulf %264, %261 : vector<8x128xf32>
    %cst_120 = arith.constant 0.488602519 : f32
    %266 = vector.broadcast %cst_120 : f32 to vector<8x128xf32>
    %267 = arith.mulf %266, %262 : vector<8x128xf32>
    %cst_121 = arith.constant 0.488602519 : f32
    %268 = vector.broadcast %cst_121 : f32 to vector<8x128xf32>
    %269 = arith.mulf %268, %263 : vector<8x128xf32>
    %cst_122 = arith.constant 1.09254849 : f32
    %270 = vector.broadcast %cst_122 : f32 to vector<8x128xf32>
    %271 = arith.mulf %270, %261 : vector<8x128xf32>
    %272 = arith.mulf %271, %263 : vector<8x128xf32>
    %cst_123 = arith.constant 1.09254849 : f32
    %273 = vector.broadcast %cst_123 : f32 to vector<8x128xf32>
    %274 = arith.mulf %273, %261 : vector<8x128xf32>
    %275 = arith.mulf %274, %262 : vector<8x128xf32>
    %276 = arith.mulf %262, %262 : vector<8x128xf32>
    %277 = arith.mulf %261, %261 : vector<8x128xf32>
    %278 = arith.mulf %263, %263 : vector<8x128xf32>
    %279 = arith.addf %277, %278 : vector<8x128xf32>
    %cst_124 = arith.constant 5.000000e-01 : f32
    %280 = vector.broadcast %cst_124 : f32 to vector<8x128xf32>
    %281 = arith.mulf %280, %279 : vector<8x128xf32>
    %282 = arith.subf %276, %281 : vector<8x128xf32>
    %cst_125 = arith.constant 0.63078314 : f32
    %283 = vector.broadcast %cst_125 : f32 to vector<8x128xf32>
    %284 = arith.mulf %283, %282 : vector<8x128xf32>
    %cst_126 = arith.constant 1.09254849 : f32
    %285 = vector.broadcast %cst_126 : f32 to vector<8x128xf32>
    %286 = arith.mulf %285, %262 : vector<8x128xf32>
    %287 = arith.mulf %286, %263 : vector<8x128xf32>
    %288 = arith.mulf %263, %263 : vector<8x128xf32>
    %289 = arith.mulf %261, %261 : vector<8x128xf32>
    %290 = arith.subf %288, %289 : vector<8x128xf32>
    %cst_127 = arith.constant 0.546274245 : f32
    %291 = vector.broadcast %cst_127 : f32 to vector<8x128xf32>
    %292 = arith.mulf %291, %290 : vector<8x128xf32>
    %c0_128 = arith.constant 0 : index
    %c0_129 = arith.constant 0 : index
    %293 = vector.load %arg12[%c0_128, %c0_129] : memref<64x128xf32, #tpu.memory_space<vmem>>, vector<8x128xf32>
    tpu.vector_store %arg12[%c0_128, %c0_129], %265 {strides = array<i32>} : memref<64x128xf32, #tpu.memory_space<vmem>>, vector<8x128xf32>,
    %c8_130 = arith.constant 8 : index
    %c0_131 = arith.constant 0 : index
    %294 = vector.load %arg12[%c8_130, %c0_131] : memref<64x128xf32, #tpu.memory_space<vmem>>, vector<8x128xf32>
    tpu.vector_store %arg12[%c8_130, %c0_131], %267 {strides = array<i32>} : memref<64x128xf32, #tpu.memory_space<vmem>>, vector<8x128xf32>,
    %c16_132 = arith.constant 16 : index
    %c0_133 = arith.constant 0 : index
    %295 = vector.load %arg12[%c16_132, %c0_133] : memref<64x128xf32, #tpu.memory_space<vmem>>, vector<8x128xf32>
    tpu.vector_store %arg12[%c16_132, %c0_133], %269 {strides = array<i32>} : memref<64x128xf32, #tpu.memory_space<vmem>>, vector<8x128xf32>,
    %c24_134 = arith.constant 24 : index
    %c0_135 = arith.constant 0 : index
    %296 = vector.load %arg12[%c24_134, %c0_135] : memref<64x128xf32, #tpu.memory_space<vmem>>, vector<8x128xf32>
    tpu.vector_store %arg12[%c24_134, %c0_135], %272 {strides = array<i32>} : memref<64x128xf32, #tpu.memory_space<vmem>>, vector<8x128xf32>,
    %c32_136 = arith.constant 32 : index
    %c0_137 = arith.constant 0 : index
    %297 = vector.load %arg12[%c32_136, %c0_137] : memref<64x128xf32, #tpu.memory_space<vmem>>, vector<8x128xf32>
    tpu.vector_store %arg12[%c32_136, %c0_137], %275 {strides = array<i32>} : memref<64x128xf32, #tpu.memory_space<vmem>>, vector<8x128xf32>,
    %c40_138 = arith.constant 40 : index
    %c0_139 = arith.constant 0 : index
    %298 = vector.load %arg12[%c40_138, %c0_139] : memref<64x128xf32, #tpu.memory_space<vmem>>, vector<8x128xf32>
    tpu.vector_store %arg12[%c40_138, %c0_139], %284 {strides = array<i32>} : memref<64x128xf32, #tpu.memory_space<vmem>>, vector<8x128xf32>,
    %c48_140 = arith.constant 48 : index
    %c0_141 = arith.constant 0 : index
    %299 = vector.load %arg12[%c48_140, %c0_141] : memref<64x128xf32, #tpu.memory_space<vmem>>, vector<8x128xf32>
    tpu.vector_store %arg12[%c48_140, %c0_141], %287 {strides = array<i32>} : memref<64x128xf32, #tpu.memory_space<vmem>>, vector<8x128xf32>,
    %c56_142 = arith.constant 56 : index
    %c0_143 = arith.constant 0 : index
    %300 = vector.load %arg12[%c56_142, %c0_143] : memref<64x128xf32, #tpu.memory_space<vmem>>, vector<8x128xf32>
    tpu.vector_store %arg12[%c56_142, %c0_143], %292 {strides = array<i32>} : memref<64x128xf32, #tpu.memory_space<vmem>>, vector<8x128xf32>,
    %c0_144 = arith.constant 0 : index
    %c0_145 = arith.constant 0 : index
    %301 = vector.load %arg12[%c0_144, %c0_145] : memref<64x128xf32, #tpu.memory_space<vmem>>, vector<64x128xf32>
    %302 = arith.truncf %301 : vector<64x128xf32> to vector<64x128xbf16>
    %cst_146 = arith.constant dense<0.000000e+00> : vector<256x128xf32>
    %303 = tpu.matmul %7, %302, %cst_146 {dimension_numbers = #tpu.dot_dimension_numbers<[1], [0], [0], [1], [0, 0, 1, 1], [], []>} : vector<256x64xbf16>, vector<64x128xbf16>, vector<256x128xf32> -> vector<256x128xf32>
    %304 = vector.broadcast %10 : vector<256x1xf32> to vector<256x128xf32>
    %305 = arith.addf %303, %304 : vector<256x128xf32>
    %306 = arith.truncf %305 : vector<256x128xf32> to vector<256x128xbf16>
    %cst_147 = arith.constant 5.000000e-01 : bf16
    %307 = vector.broadcast %cst_147 : bf16 to vector<256x128xbf16>
    %308 = arith.mulf %307, %306 : vector<256x128xbf16>
    %309 = math.tanh %308 : vector<256x128xbf16>
    %cst_148 = arith.constant 5.000000e-01 : bf16
    %310 = vector.broadcast %cst_148 : bf16 to vector<256x128xbf16>
    %311 = arith.mulf %310, %309 : vector<256x128xbf16>
    %cst_149 = arith.constant 5.000000e-01 : bf16
    %312 = vector.broadcast %cst_149 : bf16 to vector<256x128xbf16>
    %313 = arith.addf %311, %312 : vector<256x128xbf16>
    %314 = arith.mulf %306, %313 : vector<256x128xbf16>
    %cst_150 = arith.constant dense<0.000000e+00> : vector<256x128xf32>
    %315 = tpu.matmul %8, %314, %cst_150 {dimension_numbers = #tpu.dot_dimension_numbers<[1], [0], [0], [1], [0, 0, 1, 1], [], []>} : vector<256x256xbf16>, vector<256x128xbf16>, vector<256x128xf32> -> vector<256x128xf32>
    %316 = vector.broadcast %11 : vector<256x1xf32> to vector<256x128xf32>
    %317 = arith.addf %315, %316 : vector<256x128xf32>
    %318 = arith.truncf %317 : vector<256x128xf32> to vector<256x128xbf16>
    %cst_151 = arith.constant 5.000000e-01 : bf16
    %319 = vector.broadcast %cst_151 : bf16 to vector<256x128xbf16>
    %320 = arith.mulf %319, %318 : vector<256x128xbf16>
    %321 = math.tanh %320 : vector<256x128xbf16>
    %cst_152 = arith.constant 5.000000e-01 : bf16
    %322 = vector.broadcast %cst_152 : bf16 to vector<256x128xbf16>
    %323 = arith.mulf %322, %321 : vector<256x128xbf16>
    %cst_153 = arith.constant 5.000000e-01 : bf16
    %324 = vector.broadcast %cst_153 : bf16 to vector<256x128xbf16>
    %325 = arith.addf %323, %324 : vector<256x128xbf16>
    %326 = arith.mulf %318, %325 : vector<256x128xbf16>
    %cst_154 = arith.constant dense<0.000000e+00> : vector<32x128xf32>
    %327 = tpu.matmul %9, %326, %cst_154 {dimension_numbers = #tpu.dot_dimension_numbers<[1], [0], [0], [1], [0, 0, 1, 1], [], []>} : vector<32x256xbf16>, vector<256x128xbf16>, vector<32x128xf32> -> vector<32x128xf32>
    %328 = vector.broadcast %12 : vector<32x1xf32> to vector<32x128xf32>
    %329 = arith.addf %327, %328 : vector<32x128xf32>
    %330 = vector.extract_strided_slice %329 {offsets = [0, 0], sizes = [8, 128], strides = [1, 1]} : vector<32x128xf32> to vector<8x128xf32>
    %c0_155 = arith.constant 0 : index
    %c0_156 = arith.constant 0 : index
    %c16_157 = arith.constant 16 : index
    %c0_158 = arith.constant 0 : index
    %331 = vector.load %arg11[%c0_155, %c0_156, %c16_157, %c0_158] : memref<1x4x32x128xf32, #tpu.memory_space<vmem>>, vector<1x1x8x128xf32>
    %332 = vector.shape_cast %331 : vector<1x1x8x128xf32> to vector<8x128xf32>
    %333 = vector.shape_cast %330 : vector<8x128xf32> to vector<1x1x8x128xf32>
    tpu.vector_store %arg11[%c0_155, %c0_156, %c16_157, %c0_158], %333 {strides = array<i32>} : memref<1x4x32x128xf32, #tpu.memory_space<vmem>>, vector<1x1x8x128xf32>,
    %334 = vector.extract_strided_slice %329 {offsets = [8, 0], sizes = [8, 128], strides = [1, 1]} : vector<32x128xf32> to vector<8x128xf32>
    %c0_159 = arith.constant 0 : index
    %c1_160 = arith.constant 1 : index
    %c16_161 = arith.constant 16 : index
    %c0_162 = arith.constant 0 : index
    %335 = vector.load %arg11[%c0_159, %c1_160, %c16_161, %c0_162] : memref<1x4x32x128xf32, #tpu.memory_space<vmem>>, vector<1x1x8x128xf32>
    %336 = vector.shape_cast %335 : vector<1x1x8x128xf32> to vector<8x128xf32>
    %337 = vector.shape_cast %334 : vector<8x128xf32> to vector<1x1x8x128xf32>
    tpu.vector_store %arg11[%c0_159, %c1_160, %c16_161, %c0_162], %337 {strides = array<i32>} : memref<1x4x32x128xf32, #tpu.memory_space<vmem>>, vector<1x1x8x128xf32>,
    %338 = vector.extract_strided_slice %329 {offsets = [16, 0], sizes = [8, 128], strides = [1, 1]} : vector<32x128xf32> to vector<8x128xf32>
    %c0_163 = arith.constant 0 : index
    %c2_164 = arith.constant 2 : index
    %c16_165 = arith.constant 16 : index
    %c0_166 = arith.constant 0 : index
    %339 = vector.load %arg11[%c0_163, %c2_164, %c16_165, %c0_166] : memref<1x4x32x128xf32, #tpu.memory_space<vmem>>, vector<1x1x8x128xf32>
    %340 = vector.shape_cast %339 : vector<1x1x8x128xf32> to vector<8x128xf32>
    %341 = vector.shape_cast %338 : vector<8x128xf32> to vector<1x1x8x128xf32>
    tpu.vector_store %arg11[%c0_163, %c2_164, %c16_165, %c0_166], %341 {strides = array<i32>} : memref<1x4x32x128xf32, #tpu.memory_space<vmem>>, vector<1x1x8x128xf32>,
    %342 = vector.extract_strided_slice %329 {offsets = [24, 0], sizes = [8, 128], strides = [1, 1]} : vector<32x128xf32> to vector<8x128xf32>
    %c0_167 = arith.constant 0 : index
    %c3_168 = arith.constant 3 : index
    %c16_169 = arith.constant 16 : index
    %c0_170 = arith.constant 0 : index
    %343 = vector.load %arg11[%c0_167, %c3_168, %c16_169, %c0_170] : memref<1x4x32x128xf32, #tpu.memory_space<vmem>>, vector<1x1x8x128xf32>
    %344 = vector.shape_cast %343 : vector<1x1x8x128xf32> to vector<8x128xf32>
    %345 = vector.shape_cast %342 : vector<8x128xf32> to vector<1x1x8x128xf32>
    tpu.vector_store %arg11[%c0_167, %c3_168, %c16_169, %c0_170], %345 {strides = array<i32>} : memref<1x4x32x128xf32, #tpu.memory_space<vmem>>, vector<1x1x8x128xf32>,
    %346 = vector.extract_strided_slice %1 {offsets = [24, 0], sizes = [8, 3], strides = [1, 1]} : vector<32x3xf32> to vector<8x3xf32>
    %347 = vector.extract_strided_slice %346 {offsets = [0, 0], sizes = [8, 1], strides = [1, 1]} : vector<8x3xf32> to vector<8x1xf32>
    %348 = vector.extract_strided_slice %346 {offsets = [0, 1], sizes = [8, 1], strides = [1, 1]} : vector<8x3xf32> to vector<8x1xf32>
    %349 = vector.extract_strided_slice %346 {offsets = [0, 2], sizes = [8, 1], strides = [1, 1]} : vector<8x3xf32> to vector<8x1xf32>
    %350 = vector.broadcast %347 : vector<8x1xf32> to vector<8x128xf32>
    %351 = vector.broadcast %4 : vector<1x128xf32> to vector<8x128xf32>
    %352 = arith.subf %350, %351 : vector<8x128xf32>
    %353 = vector.broadcast %348 : vector<8x1xf32> to vector<8x128xf32>
    %354 = vector.broadcast %5 : vector<1x128xf32> to vector<8x128xf32>
    %355 = arith.subf %353, %354 : vector<8x128xf32>
    %356 = vector.broadcast %349 : vector<8x1xf32> to vector<8x128xf32>
    %357 = vector.broadcast %6 : vector<1x128xf32> to vector<8x128xf32>
    %358 = arith.subf %356, %357 : vector<8x128xf32>
    %359 = arith.mulf %352, %352 : vector<8x128xf32>
    %360 = arith.mulf %355, %355 : vector<8x128xf32>
    %361 = arith.addf %359, %360 : vector<8x128xf32>
    %362 = arith.mulf %358, %358 : vector<8x128xf32>
    %363 = arith.addf %361, %362 : vector<8x128xf32>
    %364 = math.sqrt %363 : vector<8x128xf32>
    %cst_171 = arith.constant 9.99999997E-7 : f32
    %365 = vector.broadcast %cst_171 : f32 to vector<8x128xf32>
    %366 = arith.addf %364, %365 : vector<8x128xf32>
    %cst_172 = arith.constant 9.99999996E-13 : f32
    %367 = vector.broadcast %cst_172 : f32 to vector<8x128xf32>
    %368 = arith.mulf %366, %367 : vector<8x128xf32>
    %369 = arith.maximumf %364, %368 : vector<8x128xf32>
    %cst_173 = arith.constant 1.000000e+00 : f32
    %370 = vector.broadcast %cst_173 : f32 to vector<8x128xf32>
    %371 = arith.divf %370, %369 : vector<8x128xf32>
    %372 = arith.mulf %352, %371 : vector<8x128xf32>
    %373 = arith.mulf %355, %371 : vector<8x128xf32>
    %374 = arith.mulf %358, %371 : vector<8x128xf32>
    %cst_174 = arith.constant 0.488602519 : f32
    %375 = vector.broadcast %cst_174 : f32 to vector<8x128xf32>
    %376 = arith.mulf %375, %372 : vector<8x128xf32>
    %cst_175 = arith.constant 0.488602519 : f32
    %377 = vector.broadcast %cst_175 : f32 to vector<8x128xf32>
    %378 = arith.mulf %377, %373 : vector<8x128xf32>
    %cst_176 = arith.constant 0.488602519 : f32
    %379 = vector.broadcast %cst_176 : f32 to vector<8x128xf32>
    %380 = arith.mulf %379, %374 : vector<8x128xf32>
    %cst_177 = arith.constant 1.09254849 : f32
    %381 = vector.broadcast %cst_177 : f32 to vector<8x128xf32>
    %382 = arith.mulf %381, %372 : vector<8x128xf32>
    %383 = arith.mulf %382, %374 : vector<8x128xf32>
    %cst_178 = arith.constant 1.09254849 : f32
    %384 = vector.broadcast %cst_178 : f32 to vector<8x128xf32>
    %385 = arith.mulf %384, %372 : vector<8x128xf32>
    %386 = arith.mulf %385, %373 : vector<8x128xf32>
    %387 = arith.mulf %373, %373 : vector<8x128xf32>
    %388 = arith.mulf %372, %372 : vector<8x128xf32>
    %389 = arith.mulf %374, %374 : vector<8x128xf32>
    %390 = arith.addf %388, %389 : vector<8x128xf32>
    %cst_179 = arith.constant 5.000000e-01 : f32
    %391 = vector.broadcast %cst_179 : f32 to vector<8x128xf32>
    %392 = arith.mulf %391, %390 : vector<8x128xf32>
    %393 = arith.subf %387, %392 : vector<8x128xf32>
    %cst_180 = arith.constant 0.63078314 : f32
    %394 = vector.broadcast %cst_180 : f32 to vector<8x128xf32>
    %395 = arith.mulf %394, %393 : vector<8x128xf32>
    %cst_181 = arith.constant 1.09254849 : f32
    %396 = vector.broadcast %cst_181 : f32 to vector<8x128xf32>
    %397 = arith.mulf %396, %373 : vector<8x128xf32>
    %398 = arith.mulf %397, %374 : vector<8x128xf32>
    %399 = arith.mulf %374, %374 : vector<8x128xf32>
    %400 = arith.mulf %372, %372 : vector<8x128xf32>
    %401 = arith.subf %399, %400 : vector<8x128xf32>
    %cst_182 = arith.constant 0.546274245 : f32
    %402 = vector.broadcast %cst_182 : f32 to vector<8x128xf32>
    %403 = arith.mulf %402, %401 : vector<8x128xf32>
    %c0_183 = arith.constant 0 : index
    %c0_184 = arith.constant 0 : index
    %404 = vector.load %arg12[%c0_183, %c0_184] : memref<64x128xf32, #tpu.memory_space<vmem>>, vector<8x128xf32>
    tpu.vector_store %arg12[%c0_183, %c0_184], %376 {strides = array<i32>} : memref<64x128xf32, #tpu.memory_space<vmem>>, vector<8x128xf32>,
    %c8_185 = arith.constant 8 : index
    %c0_186 = arith.constant 0 : index
    %405 = vector.load %arg12[%c8_185, %c0_186] : memref<64x128xf32, #tpu.memory_space<vmem>>, vector<8x128xf32>
    tpu.vector_store %arg12[%c8_185, %c0_186], %378 {strides = array<i32>} : memref<64x128xf32, #tpu.memory_space<vmem>>, vector<8x128xf32>,
    %c16_187 = arith.constant 16 : index
    %c0_188 = arith.constant 0 : index
    %406 = vector.load %arg12[%c16_187, %c0_188] : memref<64x128xf32, #tpu.memory_space<vmem>>, vector<8x128xf32>
    tpu.vector_store %arg12[%c16_187, %c0_188], %380 {strides = array<i32>} : memref<64x128xf32, #tpu.memory_space<vmem>>, vector<8x128xf32>,
    %c24_189 = arith.constant 24 : index
    %c0_190 = arith.constant 0 : index
    %407 = vector.load %arg12[%c24_189, %c0_190] : memref<64x128xf32, #tpu.memory_space<vmem>>, vector<8x128xf32>
    tpu.vector_store %arg12[%c24_189, %c0_190], %383 {strides = array<i32>} : memref<64x128xf32, #tpu.memory_space<vmem>>, vector<8x128xf32>,
    %c32_191 = arith.constant 32 : index
    %c0_192 = arith.constant 0 : index
    %408 = vector.load %arg12[%c32_191, %c0_192] : memref<64x128xf32, #tpu.memory_space<vmem>>, vector<8x128xf32>
    tpu.vector_store %arg12[%c32_191, %c0_192], %386 {strides = array<i32>} : memref<64x128xf32, #tpu.memory_space<vmem>>, vector<8x128xf32>,
    %c40_193 = arith.constant 40 : index
    %c0_194 = arith.constant 0 : index
    %409 = vector.load %arg12[%c40_193, %c0_194] : memref<64x128xf32, #tpu.memory_space<vmem>>, vector<8x128xf32>
    tpu.vector_store %arg12[%c40_193, %c0_194], %395 {strides = array<i32>} : memref<64x128xf32, #tpu.memory_space<vmem>>, vector<8x128xf32>,
    %c48_195 = arith.constant 48 : index
    %c0_196 = arith.constant 0 : index
    %410 = vector.load %arg12[%c48_195, %c0_196] : memref<64x128xf32, #tpu.memory_space<vmem>>, vector<8x128xf32>
    tpu.vector_store %arg12[%c48_195, %c0_196], %398 {strides = array<i32>} : memref<64x128xf32, #tpu.memory_space<vmem>>, vector<8x128xf32>,
    %c56_197 = arith.constant 56 : index
    %c0_198 = arith.constant 0 : index
    %411 = vector.load %arg12[%c56_197, %c0_198] : memref<64x128xf32, #tpu.memory_space<vmem>>, vector<8x128xf32>
    tpu.vector_store %arg12[%c56_197, %c0_198], %403 {strides = array<i32>} : memref<64x128xf32, #tpu.memory_space<vmem>>, vector<8x128xf32>,
    %c0_199 = arith.constant 0 : index
    %c0_200 = arith.constant 0 : index
    %412 = vector.load %arg12[%c0_199, %c0_200] : memref<64x128xf32, #tpu.memory_space<vmem>>, vector<64x128xf32>
    %413 = arith.truncf %412 : vector<64x128xf32> to vector<64x128xbf16>
    %cst_201 = arith.constant dense<0.000000e+00> : vector<256x128xf32>
    %414 = tpu.matmul %7, %413, %cst_201 {dimension_numbers = #tpu.dot_dimension_numbers<[1], [0], [0], [1], [0, 0, 1, 1], [], []>} : vector<256x64xbf16>, vector<64x128xbf16>, vector<256x128xf32> -> vector<256x128xf32>
    %415 = vector.broadcast %10 : vector<256x1xf32> to vector<256x128xf32>
    %416 = arith.addf %414, %415 : vector<256x128xf32>
    %417 = arith.truncf %416 : vector<256x128xf32> to vector<256x128xbf16>
    %cst_202 = arith.constant 5.000000e-01 : bf16
    %418 = vector.broadcast %cst_202 : bf16 to vector<256x128xbf16>
    %419 = arith.mulf %418, %417 : vector<256x128xbf16>
    %420 = math.tanh %419 : vector<256x128xbf16>
    %cst_203 = arith.constant 5.000000e-01 : bf16
    %421 = vector.broadcast %cst_203 : bf16 to vector<256x128xbf16>
    %422 = arith.mulf %421, %420 : vector<256x128xbf16>
    %cst_204 = arith.constant 5.000000e-01 : bf16
    %423 = vector.broadcast %cst_204 : bf16 to vector<256x128xbf16>
    %424 = arith.addf %422, %423 : vector<256x128xbf16>
    %425 = arith.mulf %417, %424 : vector<256x128xbf16>
    %cst_205 = arith.constant dense<0.000000e+00> : vector<256x128xf32>
    %426 = tpu.matmul %8, %425, %cst_205 {dimension_numbers = #tpu.dot_dimension_numbers<[1], [0], [0], [1], [0, 0, 1, 1], [], []>} : vector<256x256xbf16>, vector<256x128xbf16>, vector<256x128xf32> -> vector<256x128xf32>
    %427 = vector.broadcast %11 : vector<256x1xf32> to vector<256x128xf32>
    %428 = arith.addf %426, %427 : vector<256x128xf32>
    %429 = arith.truncf %428 : vector<256x128xf32> to vector<256x128xbf16>
    %cst_206 = arith.constant 5.000000e-01 : bf16
    %430 = vector.broadcast %cst_206 : bf16 to vector<256x128xbf16>
    %431 = arith.mulf %430, %429 : vector<256x128xbf16>
    %432 = math.tanh %431 : vector<256x128xbf16>
    %cst_207 = arith.constant 5.000000e-01 : bf16
    %433 = vector.broadcast %cst_207 : bf16 to vector<256x128xbf16>
    %434 = arith.mulf %433, %432 : vector<256x128xbf16>
    %cst_208 = arith.constant 5.000000e-01 : bf16
    %435 = vector.broadcast %cst_208 : bf16 to vector<256x128xbf16>
    %436 = arith.addf %434, %435 : vector<256x128xbf16>
    %437 = arith.mulf %429, %436 : vector<256x128xbf16>
    %cst_209 = arith.constant dense<0.000000e+00> : vector<32x128xf32>
    %438 = tpu.matmul %9, %437, %cst_209 {dimension_numbers = #tpu.dot_dimension_numbers<[1], [0], [0], [1], [0, 0, 1, 1], [], []>} : vector<32x256xbf16>, vector<256x128xbf16>, vector<32x128xf32> -> vector<32x128xf32>
    %439 = vector.broadcast %12 : vector<32x1xf32> to vector<32x128xf32>
    %440 = arith.addf %438, %439 : vector<32x128xf32>
    %441 = vector.extract_strided_slice %440 {offsets = [0, 0], sizes = [8, 128], strides = [1, 1]} : vector<32x128xf32> to vector<8x128xf32>
    %c0_210 = arith.constant 0 : index
    %c0_211 = arith.constant 0 : index
    %c24_212 = arith.constant 24 : index
    %c0_213 = arith.constant 0 : index
    %442 = vector.load %arg11[%c0_210, %c0_211, %c24_212, %c0_213] : memref<1x4x32x128xf32, #tpu.memory_space<vmem>>, vector<1x1x8x128xf32>
    %443 = vector.shape_cast %442 : vector<1x1x8x128xf32> to vector<8x128xf32>
    %444 = vector.shape_cast %441 : vector<8x128xf32> to vector<1x1x8x128xf32>
    tpu.vector_store %arg11[%c0_210, %c0_211, %c24_212, %c0_213], %444 {strides = array<i32>} : memref<1x4x32x128xf32, #tpu.memory_space<vmem>>, vector<1x1x8x128xf32>,
    %445 = vector.extract_strided_slice %440 {offsets = [8, 0], sizes = [8, 128], strides = [1, 1]} : vector<32x128xf32> to vector<8x128xf32>
    %c0_214 = arith.constant 0 : index
    %c1_215 = arith.constant 1 : index
    %c24_216 = arith.constant 24 : index
    %c0_217 = arith.constant 0 : index
    %446 = vector.load %arg11[%c0_214, %c1_215, %c24_216, %c0_217] : memref<1x4x32x128xf32, #tpu.memory_space<vmem>>, vector<1x1x8x128xf32>
    %447 = vector.shape_cast %446 : vector<1x1x8x128xf32> to vector<8x128xf32>
    %448 = vector.shape_cast %445 : vector<8x128xf32> to vector<1x1x8x128xf32>
    tpu.vector_store %arg11[%c0_214, %c1_215, %c24_216, %c0_217], %448 {strides = array<i32>} : memref<1x4x32x128xf32, #tpu.memory_space<vmem>>, vector<1x1x8x128xf32>,
    %449 = vector.extract_strided_slice %440 {offsets = [16, 0], sizes = [8, 128], strides = [1, 1]} : vector<32x128xf32> to vector<8x128xf32>
    %c0_218 = arith.constant 0 : index
    %c2_219 = arith.constant 2 : index
    %c24_220 = arith.constant 24 : index
    %c0_221 = arith.constant 0 : index
    %450 = vector.load %arg11[%c0_218, %c2_219, %c24_220, %c0_221] : memref<1x4x32x128xf32, #tpu.memory_space<vmem>>, vector<1x1x8x128xf32>
    %451 = vector.shape_cast %450 : vector<1x1x8x128xf32> to vector<8x128xf32>
    %452 = vector.shape_cast %449 : vector<8x128xf32> to vector<1x1x8x128xf32>
    tpu.vector_store %arg11[%c0_218, %c2_219, %c24_220, %c0_221], %452 {strides = array<i32>} : memref<1x4x32x128xf32, #tpu.memory_space<vmem>>, vector<1x1x8x128xf32>,
    %453 = vector.extract_strided_slice %440 {offsets = [24, 0], sizes = [8, 128], strides = [1, 1]} : vector<32x128xf32> to vector<8x128xf32>
    %c0_222 = arith.constant 0 : index
    %c3_223 = arith.constant 3 : index
    %c24_224 = arith.constant 24 : index
    %c0_225 = arith.constant 0 : index
    %454 = vector.load %arg11[%c0_222, %c3_223, %c24_224, %c0_225] : memref<1x4x32x128xf32, #tpu.memory_space<vmem>>, vector<1x1x8x128xf32>
    %455 = vector.shape_cast %454 : vector<1x1x8x128xf32> to vector<8x128xf32>
    %456 = vector.shape_cast %453 : vector<8x128xf32> to vector<1x1x8x128xf32>
    tpu.vector_store %arg11[%c0_222, %c3_223, %c24_224, %c0_225], %456 {strides = array<i32>} : memref<1x4x32x128xf32, #tpu.memory_space<vmem>>, vector<1x1x8x128xf32>,
    return
  }
  func.func @transform_0(%arg0: i32, %arg1: i32, %arg2: i32) -> (i32, i32, i32) {
    %c0_i32 = arith.constant 0 : i32
    %c0_i32_0 = arith.constant 0 : i32
    return %arg0, %arg1, %c0_i32 : i32, i32, i32
  }
  func.func @transform_1(%arg0: i32, %arg1: i32, %arg2: i32) -> (i32, i32, i32) {
    %c0_i32 = arith.constant 0 : i32
    %c0_i32_0 = arith.constant 0 : i32
    return %arg0, %c0_i32, %arg2 : i32, i32, i32
  }
  func.func @transform_2(%arg0: i32, %arg1: i32, %arg2: i32) -> (i32, i32) {
    %c0_i32 = arith.constant 0 : i32
    %c0_i32_0 = arith.constant 0 : i32
    %c0_i32_1 = arith.constant 0 : i32
    return %c0_i32, %c0_i32_0 : i32, i32
  }
  func.func @transform_3(%arg0: i32, %arg1: i32, %arg2: i32) -> (i32, i32) {
    %c0_i32 = arith.constant 0 : i32
    %c0_i32_0 = arith.constant 0 : i32
    %c0_i32_1 = arith.constant 0 : i32
    return %c0_i32, %c0_i32_0 : i32, i32
  }
  func.func @transform_4(%arg0: i32, %arg1: i32, %arg2: i32) -> (i32, i32) {
    %c0_i32 = arith.constant 0 : i32
    %c0_i32_0 = arith.constant 0 : i32
    %c0_i32_1 = arith.constant 0 : i32
    return %c0_i32, %c0_i32_0 : i32, i32
  }
  func.func @transform_5(%arg0: i32, %arg1: i32, %arg2: i32) -> (i32, i32) {
    %c0_i32 = arith.constant 0 : i32
    %c0_i32_0 = arith.constant 0 : i32
    %c0_i32_1 = arith.constant 0 : i32
    return %c0_i32, %c0_i32_0 : i32, i32
  }
  func.func @transform_6(%arg0: i32, %arg1: i32, %arg2: i32) -> (i32, i32) {
    %c0_i32 = arith.constant 0 : i32
    %c0_i32_0 = arith.constant 0 : i32
    %c0_i32_1 = arith.constant 0 : i32
    return %c0_i32, %c0_i32_0 : i32, i32
  }
  func.func @transform_7(%arg0: i32, %arg1: i32, %arg2: i32) -> (i32, i32) {
    %c0_i32 = arith.constant 0 : i32
    %c0_i32_0 = arith.constant 0 : i32
    %c0_i32_1 = arith.constant 0 : i32
    return %c0_i32, %c0_i32_0 : i32, i32
  }
  func.func @transform_8(%arg0: i32, %arg1: i32, %arg2: i32) -> (i32, i32, i32, i32) {
    %c0_i32 = arith.constant 0 : i32
    %c0_i32_0 = arith.constant 0 : i32
    return %arg0, %c0_i32, %arg1, %arg2 : i32, i32, i32, i32
  }
}

</mosaic_0001>

<bundles_post_ra>
// kernel: tpu_custom_call.1
= control target key start
LH: loop header
LB: loop body
LE: loop exit
PB: predicated region body
PF: predicated region fallthrough
CT: control target
= control target key end

     0   :  { %s7593_s0 = inlined_call_operand.vmem [shape: f32[2,128,3], index: 0, kind: input, shape index: {}]   ;;  %s7594_s1 = inlined_call_operand.vmem [shape: f32[2,3,128], index: 1, kind: input, shape index: {}]   ;;  %s7595_s2 = inlined_call_operand.vmem [shape: bf16[256,64], index: 2, kind: input, shape index: {}]   ;;  %s7596_s3 = inlined_call_operand.vmem [shape: f32[256,1], index: 3, kind: input, shape index: {}]   ;;  %s7597_s4 = inlined_call_operand.vmem [shape: bf16[256,256], index: 4, kind: input, shape index: {}]   ;;  %s7598_s5 = inlined_call_operand.vmem [shape: f32[256,1], index: 5, kind: input, shape index: {}]   ;;  %s7599_s6 = inlined_call_operand.vmem [shape: bf16[32,256], index: 6, kind: input, shape index: {}]   ;;  %s7600_s7 = inlined_call_operand.vmem [shape: f32[32,1], index: 7, kind: input, shape index: {}]   ;;  %s7601_s8 = inlined_call_operand.hbm [shape: f32[2,4,128,128], index: 8, kind: output, shape index: {}]  }
   0x1   :  { %7748 = sst [smem:[#allocation80_spill]] %s7593_s0 }
   0x2   :  { %7749 = sst [smem:[#allocation81_spill]] %s7596_s3 }
   0x3   :  { %13 = vsyncpa [#allocation4], 0 }
   0x4   :  { %15 = vsyncpa [#allocation4 + $0x1], 0  ;;  %s5567_s27 = smov 0   ;;  %s5569_s28 = smov 0  }
   0x5   :  { %s5571_s29 = smov 0   ;;  %s5573_s30 = smov 0  }
   0x6   :  { %s5575_s9 = smov 0   ;;  %s5577_s10 = smov 0  }
   0x7   :  { %s5579_s11 = smov 0   ;;  %s5581_s12 = smov 0  }
   0x8 LB: > { %s3886_s13 = sadd.s32 4294967295, %s5510_s12   ;;  %s3887_s14 = sadd.s32 4294967294, %s5510_s12   ;;  %s5510_s12 = sphi %s5581_s12, %s21_s12   ;;  %s5506_s11 = sphi %s5579_s11, %s7960_s11   ;;  %s5502_s10 = sphi %s5577_s10, %s7959_s10   ;;  %s5498_s9 = sphi %s5575_s9, %s7958_s9   ;;  %s5494_s30 = sphi %s5573_s30, %s7957_s30   ;;  %s5490_s29 = sphi %s5571_s29, %s7956_s29   ;;  %s5486_s28 = sphi %s5569_s28, %s7955_s28   ;;  %s5482_s27 = sphi %s5567_s27, %s7954_s27  }
   0x9   : > { %s36_s15 = sadd.s32 1, %s5502_s10  ;;  %s40_s16 = sadd.s32 1, %s5506_s11 }
   0xa   : > { %p38_p0 = scmp.ge.s32.totalorder %s36_s15, 4  ;;  %p243_p1 = scmp.ne.s32.totalorder %s5490_s29, %s5486_s28 }
   0xb   : > { %p244_p2 = scmp.eq.s32.totalorder %s3886_s13, 7  ;;  %p249_p5 = scmp.ne.s32.totalorder %s5486_s28, %s5482_s27 }
   0xc   : > { %s7962_s15 = smov (%p38_p0, %s36_s15), 0  ;;  %s7964_s16 = smov (!%p38_p0, %s40_s16), %s5506_s11 }
   0xd   : > { %7750 = sst [smem:[#allocation8_spill]] %s7962_s15  ;;  %s227_s17 = ssub.s32 %s5502_s10, %s7962_s15 }
   0xe   : > { %p5618_p3 = por %p244_p2, %p243_p1  ;;  %p42_p4 = scmp.ge.s32.totalorder %s7964_s16, 2 }
   0xf   : > { %p250_p6 = scmp.eq.s32.totalorder %s3887_s14, 7  ;;  %p3890_p7 = scmp.ge.s32.totalorder %s5510_s12, 1 }
  0x10   : > { %s7966_s16 = smov (%p42_p4, %s7964_s16), 0  ;;  %p309_p9 = scmp.lt.s32.totalorder %s5510_s12, 9 }
  0x11   : > { %7752 = sst [smem:[#allocation9_spill]] %s7966_s16  ;;  %p5627_p8 = por %p250_p6, %p249_p5 }
  0x12   : > { %s226_s20 = ssub.s32 %s5506_s11, %s7966_s16  ;;  %s233_s21 = sadd.s32 1, %s5490_s29 }
  0x13   : > { %s228_s22 = sor.u32 %s227_s17, %s226_s20  ;;  %p310_p10 = pnand %p3890_p7, %p309_p9 }
  0x14   : > { %p231_p11 = scmp.eq.s32.totalorder %s228_s22, 0 }
  0x15   : > { %313 = sbr.rel (%p310_p10) target bundleno = 3163 (0xc5b), region = 52 }
  0x16   : > { %s5636_s23 = scalar_select %p231_p11, %s5490_s29, %s233_s21  }
  0x1c   : > { %s5639_s24 = sshll.u32 %s5494_s30, 2  ;;  %p355_p12 = scmp.lt.s32.totalorder %s5498_s9, 1  ;;  %v7604_v0 = vmov 0   ;;  %v7606_v1 = vmov 2   ;;  %v5514_v4 = vmov 1   ;;  %v4948_v35 = vld [vmem:[%s7595_s2] sm:$0xff]   ;;  %v520_v59 = vlaneseq }
  0x1d   : > { %4933 = vset.pattern.permute.xlu0 %v7604_v0  ;;  %p357_p13 = scmp.lt.s32.totalorder %s5639_s24, 15  ;;  %4935 = vset.pattern.permute.xlu1 %v7606_v1  ;;  %s7754_s0 = sld [smem:[#allocation80_spill]]  ;;  %vm840_vm0 = vcmask 523264   ;;  %v495_v38 = vld [vmem:[%s7598_s5 + $0x80] sm:$0xff]  ;;  %v497_v40 = vld [vmem:[%s7598_s5 + $0x90] sm:$0xff]  ;;  %v496_v41 = vld [vmem:[%s7598_s5 + $0x88] sm:$0xff] }
  0x1e   : > { %s5646_s25 = scalar_select %p355_p12, %s5498_s9, 1  ;;  %4678 = vmatprep.mubr.msk.bf16.mxu0 %vm840_vm0, %v4948_v35  ;;  %v479_v39 = vld [vmem:[%s7598_s5] sm:$0xff]  ;;  %v481_v42 = vld [vmem:[%s7598_s5 + $0x10] sm:$0xff]  ;;  %v480_v43 = vld [vmem:[%s7598_s5 + $0x8] sm:$0xff]  ;;  %v521_v62 = vshrl.u32 %v520_v59, 7 }
  0x1f   : > { %s358_s26 = scalar_select %p357_p13, %s5639_s24, 15  ;;  %v499_v44 = vld [vmem:[%s7598_s5 + $0xa0] sm:$0xff]  ;;  %v498_v45 = vld [vmem:[%s7598_s5 + $0x98] sm:$0xff]  ;;  %v500_v48 = vld [vmem:[%s7598_s5 + $0xa8] sm:$0xff] }
  0x20   : > { %s3893_s13 = sshll.u32 %s5646_s25, 4  ;;  %s7755_s3 = sld [smem:[#allocation81_spill]]  ;;  %v483_v46 = vld [vmem:[%s7598_s5 + $0x20] sm:$0xff]  ;;  %v482_v47 = vld [vmem:[%s7598_s5 + $0x18] sm:$0xff]  ;;  %v501_v49 = vld [vmem:[%s7598_s5 + $0xb0] sm:$0xff] }
  0x21   : > { %s360_s14 = sadd.s32 %s3893_s13, %s358_s26  ;;  %v484_v50 = vld [vmem:[%s7598_s5 + $0x28] sm:$0xff]  ;;  %v502_v51 = vld [vmem:[%s7598_s5 + $0xb8] sm:$0xff]  ;;  %v503_v52 = vld [vmem:[%s7598_s5 + $0xc0] sm:$0xff]  ;;  %s3895_s30 = sshll.u32 %s5646_s25, 2 }
  0x22   : > { %s3894_s17 = sshll.u32 %s360_s14, 3  ;;  %v485_v53 = vld [vmem:[%s7598_s5 + $0x30] sm:$0xff]  ;;  %v488_v54 = vld [vmem:[%s7598_s5 + $0x48] sm:$0xff]  ;;  %v486_v55 = vld [vmem:[%s7598_s5 + $0x38] sm:$0xff]  ;;  %s351_s20 = sand.u32 1, %s5486_s28  }
  0x23   : > { %s5653_s21 = scalar_lea.vmem %s7754_s0, %s3894_s17  ;;  %v506_v56 = vld [vmem:[%s7598_s5 + $0xd8] sm:$0xff]  ;;  %v504_v57 = vld [vmem:[%s7598_s5 + $0xc8] sm:$0xff]  ;;  %v487_v60 = vld [vmem:[%s7598_s5 + $0x40] sm:$0xff]  ;;  %s370_s17 = scalar_lea.vmem %s7594_s1, %s3895_s30 }
  0x24   : > { %v374_v2 = vld [vmem:[%s5653_s21] sm:$0xff]  ;;  %v375_v37 = vld [vmem:[%s5653_s21 + $0x8] sm:$0xff]  ;;  %v490_v58 = vld [vmem:[%s7598_s5 + $0x58] sm:$0xff]  ;;  %s3891_s25 = sshll.u32 %s351_s20, 7 }
  0x25   : > { %517 = vperm.xlu0 %4933, %v374_v2   ;;  %535 = vperm.xlu1 %4935, %v374_v2   ;;  %v508_v61 = vld [vmem:[%s7598_s5 + $0xe8] sm:$0xff]  ;;  %v505_v63 = vld [vmem:[%s7598_s5 + $0xd0] sm:$0xff]  ;;  %s6497_s22 = scalar_lea.vmem [#allocation3], %s3891_s25  ;;  %s3740_s25 = scalar_lea.sflag [#allocation4], %s351_s20 }
  0x26   : > { %v463_v3 = vld [vmem:[%s7755_s3 + $0x80] sm:$0xff]  ;;  %v464_v5 = vld [vmem:[%s7755_s3 + $0x88] sm:$0xff]  ;;  %v466_v8 = vld [vmem:[%s7755_s3 + $0x98] sm:$0xff] }
  0x27   : > { %v447_v6 = vld [vmem:[%s7755_s3] sm:$0xff]  ;;  %v448_v7 = vld [vmem:[%s7755_s3 + $0x8] sm:$0xff]  ;;  %v465_v9 = vld [vmem:[%s7755_s3 + $0x90] sm:$0xff] }
  0x28   : > { %v450_v10 = vld [vmem:[%s7755_s3 + $0x18] sm:$0xff]  ;;  %v449_v11 = vld [vmem:[%s7755_s3 + $0x10] sm:$0xff]  ;;  %v468_v12 = vld [vmem:[%s7755_s3 + $0xa8] sm:$0xff] }
  0x29   : > { %4934 = vset.pattern.permute.xlu0 %v5514_v4  ;;  %4936 = vset.pattern.permute.xlu1 %v7604_v0  ;;  %v467_v13 = vld [vmem:[%s7755_s3 + $0xa0] sm:$0xff]  ;;  %v452_v14 = vld [vmem:[%s7755_s3 + $0x28] sm:$0xff]  ;;  %v470_v16 = vld [vmem:[%s7755_s3 + $0xb8] sm:$0xff] }
  0x2a   : > { %526 = vperm.xlu0 %4934, %v374_v2   ;;  %682 = vperm.xlu1 %4936, %v463_v3   ;;  %v451_v15 = vld [vmem:[%s7755_s3 + $0x20] sm:$0xff]  ;;  %v469_v17 = vld [vmem:[%s7755_s3 + $0xb0] sm:$0xff]  ;;  %v454_v18 = vld [vmem:[%s7755_s3 + $0x38] sm:$0xff]  ;;  %v522_v3 = vsub.s32 0, %v521_v62 }
  0x2b   : > { %v453_v19 = vld [vmem:[%s7755_s3 + $0x30] sm:$0xff]  ;;  %v472_v20 = vld [vmem:[%s7755_s3 + $0xc8] sm:$0xff]  ;;  %v471_v21 = vld [vmem:[%s7755_s3 + $0xc0] sm:$0xff] }
  0x2c   : > { %v456_v22 = vld [vmem:[%s7755_s3 + $0x48] sm:$0xff]  ;;  %v455_v23 = vld [vmem:[%s7755_s3 + $0x40] sm:$0xff]  ;;  %v474_v24 = vld [vmem:[%s7755_s3 + $0xd8] sm:$0xff] }
  0x2d   : > { %v473_v25 = vld [vmem:[%s7755_s3 + $0xd0] sm:$0xff]  ;;  %v458_v26 = vld [vmem:[%s7755_s3 + $0x58] sm:$0xff]  ;;  %v476_v28 = vld [vmem:[%s7755_s3 + $0xe8] sm:$0xff] }
  0x2e   : > { %687 = vperm.xlu1 %4936, %v464_v5   ;;  %4937 = vset.pattern.permute.xlu0 %v7604_v0  ;;  %v457_v27 = vld [vmem:[%s7755_s3 + $0x50] sm:$0xff]  ;;  %v475_v29 = vld [vmem:[%s7755_s3 + $0xe0] sm:$0xff]  ;;  %v460_v30 = vld [vmem:[%s7755_s3 + $0x68] sm:$0xff]  ;;  %v540_v5 = vsub.s32 2, %v521_v62 }
  0x2f   : > { %602 = vperm.xlu0 %4937, %v447_v6   ;;  %v459_v31 = vld [vmem:[%s7755_s3 + $0x60] sm:$0xff]  ;;  %v478_v32 = vld [vmem:[%s7755_s3 + $0xf8] sm:$0xff]  ;;  %v477_v33 = vld [vmem:[%s7755_s3 + $0xf0] sm:$0xff] }
  0x30   : > { %v462_v34 = vld [vmem:[%s7755_s3 + $0x78] sm:$0xff]  ;;  %v461_v36 = vld [vmem:[%s7755_s3 + $0x70] sm:$0xff]  ;;  %v492_v2 = vld [vmem:[%s7598_s5 + $0x68] sm:$0xff] }
  0x31   : > { %v378_v6 = vld [vmem:[%s370_s17] sm:$0x7] }
  0x32   : > { %607 = vperm.xlu1 %4936, %v448_v7   ;;  %v531_v7 = vsub.s32 1, %v521_v62  ;;  %v4949_v62 = vld [vmem:[%s7595_s2 + $0x8] sm:$0xff]  }
  0x33   : > { %697 = vperm.xlu0 %4937, %v466_v8   ;;  %v489_v8 = vld [vmem:[%s7598_s5 + $0x50] sm:$0xff] }
  0x36   : > { %692 = vperm.xlu1 %4936, %v465_v9   ;;  %v510_v9 = vld [vmem:[%s7598_s5 + $0xf8] sm:$0xff] }
  0x37   : > { %617 = vperm.xlu0 %4937, %v450_v10   ;;  %v5848_v10 = vrot.slane %v378_v6, %v522_v3  ;;  %v4952_v3 = vld [vmem:[%s7595_s2 + $0x20] sm:$0xff]  }
  0x3a   : > { %612 = vperm.xlu1 %4936, %v449_v11  }
  0x3b   : > { %707 = vperm.xlu0 %4937, %v468_v12   ;;  %v5850_v12 = vrot.slane %v378_v6, %v540_v5  ;;  %v4953_v5 = vld [vmem:[%s7595_s2 + $0x28] sm:$0xff]  }
  0x3e   : > { %702 = vperm.xlu1 %4936, %v467_v13  }
  0x3f   : > { %627 = vperm.xlu0 %4937, %v452_v14   ;;  %v5852_v14 = vrot.slane %v378_v6, %v531_v7  ;;  %v4954_v6 = vld [vmem:[%s7595_s2 + $0x30] sm:$0xff]   ;;  %v4955_v7 = vld [vmem:[%s7595_s2 + $0x38] sm:$0xff]  }
  0x42   : > { %622 = vperm.xlu1 %4936, %v451_v15   ;;  %v507_v15 = vld [vmem:[%s7598_s5 + $0xe0] sm:$0xff] }
  0x43   : > { %717 = vperm.xlu0 %4937, %v470_v16   ;;  %v494_v16 = vld [vmem:[%s7598_s5 + $0x78] sm:$0xff] }
  0x46   : > { %712 = vperm.xlu1 %4936, %v469_v17  }
  0x47   : > { %637 = vperm.xlu0 %4937, %v454_v18  }
  0x4a   : > { %632 = vperm.xlu1 %4936, %v453_v19  }
  0x4b   : > { %727 = vperm.xlu0 %4937, %v472_v20  }
  0x4e   : > { %722 = vperm.xlu1 %4936, %v471_v21   ;;  %v491_v21 = vld [vmem:[%s7598_s5 + $0x60] sm:$0xff] }
  0x4f   : > { %647 = vperm.xlu0 %4937, %v456_v22  }
  0x52   : > { %642 = vperm.xlu1 %4936, %v455_v23  }
  0x53   : > { %737 = vperm.xlu0 %4937, %v474_v24  }
  0x56   : > { %732 = vperm.xlu1 %4936, %v473_v25  }
  0x57   : > { %657 = vperm.xlu0 %4937, %v458_v26   ;;  %v376_v26 = vld [vmem:[%s5653_s21 + $0x10] sm:$0xff] }
  0x5a   : > { %652 = vperm.xlu1 %4936, %v457_v27   ;;  %v509_v27 = vld [vmem:[%s7598_s5 + $0xf0] sm:$0xff] }
  0x5b   : > { %747 = vperm.xlu0 %4937, %v476_v28  }
  0x5e   : > { %742 = vperm.xlu1 %4936, %v475_v29   ;;  %v493_v29 = vld [vmem:[%s7598_s5 + $0x70] sm:$0xff] }
  0x5f   : > { %667 = vperm.xlu0 %4937, %v460_v30  }
  0x62   : > { %662 = vperm.xlu1 %4936, %v459_v31  }
  0x63   : > { %757 = vperm.xlu0 %4937, %v478_v32  }
  0x66   : > { %752 = vperm.xlu1 %4936, %v477_v33  }
  0x67   : > { %677 = vperm.xlu0 %4937, %v462_v34  }
  0x6a   : > { %672 = vperm.xlu1 %4936, %v461_v36  }
  0x6b   : > { %4938 = vset.pattern.permute.xlu0 %v5514_v4 }
  0x6c   : > { %1826 = vperm.xlu0 %4938, %v375_v37  }
  0x6e   : > { %1228 = vperm.xlu1 %4936, %v495_v38  }
  0x70   : > { %4939 = vset.pattern.permute.xlu0 %v7606_v1 }
  0x71   : > { %1831 = vperm.xlu0 %4939, %v375_v37  }
  0x72   : > { %1148 = vperm.xlu1 %4936, %v479_v39  }
  0x75   : > { %4940 = vset.pattern.permute.xlu0 %v7604_v0 }
  0x76   : > { %1238 = vperm.xlu1 %4936, %v497_v40   ;;  %1233 = vperm.xlu0 %4940, %v496_v41  }
  0x7a   : > { %1158 = vperm.xlu1 %4936, %v481_v42   ;;  %1153 = vperm.xlu0 %4940, %v480_v43  }
  0x7e   : > { %1248 = vperm.xlu1 %4936, %v499_v44   ;;  %1243 = vperm.xlu0 %4940, %v498_v45  }
  0x82   : > { %1168 = vperm.xlu1 %4936, %v483_v46   ;;  %1163 = vperm.xlu0 %4940, %v482_v47  }
  0x86   : > { %1821 = vperm.xlu1 %4936, %v375_v37   ;;  %1253 = vperm.xlu0 %4940, %v500_v48  }
  0x8a   : > { %1258 = vperm.xlu1 %4936, %v501_v49   ;;  %1173 = vperm.xlu0 %4940, %v484_v50  }
  0x8e   : > { %1263 = vperm.xlu1 %4936, %v502_v51   ;;  %1268 = vperm.xlu0 %4940, %v503_v52  }
  0x92   : > { %1178 = vperm.xlu1 %4936, %v485_v53   ;;  %1193 = vperm.xlu0 %4940, %v488_v54  }
  0x96   : > { %1183 = vperm.xlu1 %4936, %v486_v55   ;;  %1283 = vperm.xlu0 %4940, %v506_v56  }
  0x9a   : > { %1273 = vperm.xlu1 %4936, %v504_v57   ;;  %1203 = vperm.xlu0 %4940, %v490_v58  }
  0x9e   : > { %1188 = vperm.xlu1 %4936, %v487_v60   ;;  %1293 = vperm.xlu0 %4940, %v508_v61  }
  0xa2   : > { %1278 = vperm.xlu1 %4936, %v505_v63   ;;  %1213 = vperm.xlu0 %4940, %v492_v2   ;;  %v4950_v63 = vld [vmem:[%s7595_s2 + $0x10] sm:$0xff]   ;;  %v4951_v2 = vld [vmem:[%s7595_s2 + $0x18] sm:$0xff]  }
  0xa4   : > { %v518_v11 = vpop.permute.xlu0 %517  ;;  %v536_v13 = vpop.permute.xlu1 %535 }
  0xa5   : > { %v524_v17 = vsub.f32 %v518_v11, %v5848_v10  ;;  %v542_v18 = vsub.f32 %v536_v13, %v5850_v12  ;;  %v4958_v11 = vld [vmem:[%s7595_s2 + $0x50] sm:$0xff]   ;;  %v4959_v13 = vld [vmem:[%s7595_s2 + $0x58] sm:$0xff]  }
  0xa6   : > { %1198 = vperm.xlu1 %4936, %v489_v8   ;;  %1303 = vperm.xlu0 %4940, %v510_v9   ;;  %v4956_v8 = vld [vmem:[%s7595_s2 + $0x40] sm:$0xff]   ;;  %v4957_v9 = vld [vmem:[%s7595_s2 + $0x48] sm:$0xff]  }
  0xa7   : > { %v543_v22 = vmul.f32 %v524_v17, %v524_v17  ;;  %v546_v24 = vmul.f32 %v542_v18, %v542_v18 }
  0xa9   : > { %v527_v19 = vpop.permute.xlu0 %526 }
  0xaa   : > { %v533_v20 = vsub.f32 %v527_v19, %v5852_v14  ;;  %1288 = vperm.xlu1 %4936, %v507_v15   ;;  %1223 = vperm.xlu0 %4940, %v494_v16   ;;  %v4960_v15 = vld [vmem:[%s7595_s2 + $0x60] sm:$0xff]   ;;  %v4961_v16 = vld [vmem:[%s7595_s2 + $0x68] sm:$0xff]   ;;  %v5936_v19 = vpop.permute.xlu1 %682 }
  0xab   : > { %7756 = vst [vmem:[#allocation10_spill] sm:$0xff] %v5936_v19 }
  0xac   : > { %v544_v23 = vmul.f32 %v533_v20, %v533_v20 }
  0xae   : > { %v545_v25 = vadd.f32 %v544_v23, %v543_v22  ;;  %1208 = vperm.xlu1 %4936, %v491_v21   ;;  %4941 = vset.pattern.permute.xlu0 %v5514_v4  ;;  %v5940_v21 = vpop.permute.xlu0 %602 }
  0xaf   : > { %2466 = vperm.xlu0 %4941, %v376_v26   ;;  %7758 = vst [vmem:[#allocation12_spill] sm:$0xff] %v5940_v21 }
  0xb0   : > { %v547_v28 = vadd.f32 %v546_v24, %v545_v25 }
  0xb2   : > { %5018 = vrsqrt.f32 %v547_v28  ;;  %1298 = vperm.xlu1 %4936, %v509_v27   ;;  %vm550_vm1 = vcmp.eq.f32.partialorder %v547_v28, inf  ;;  %v553_v32 = vand.u32 2147483648, %v547_v28  ;;  %vm552_vm2 = vcmp.eq.f32.partialorder %v547_v28, 0.0  ;;  %v5944_v23 = vpop.permute.xlu0 %697 }
  0xb3   : > { %7760 = vst [vmem:[#allocation14_spill] sm:$0xff] %v5944_v23 }
  0xb6   : > { %1218 = vperm.xlu1 %4936, %v493_v29   ;;  %v5948_v25 = vpop.permute.xlu0 %617  ;;  %v4964_v29 = vld [vmem:[%s7597_s4 + $0x4] ss:$8 sps:$4 sm:$0xff]  }
  0xb7   : > { %7762 = vst [vmem:[#allocation16_spill] sm:$0xff] %v5948_v25  ;;  %1498 = vmatprep.mubr.bf16.mxu1 %v4964_v29 }
  0xba   : > { %2461 = vperm.xlu1 %4936, %v376_v26   ;;  %v5952_v27 = vpop.permute.xlu0 %707 }
  0xbb   : > { %7764 = vst [vmem:[#allocation18_spill] sm:$0xff] %v5952_v27 }
  0xbc   : > { %v5019_v30 = vpop.eup %5018 }
  0xbd   : > { %v549_v31 = vmul.f32 %v5019_v30, %v547_v28 }
  0xbe   : > { %4942 = vset.pattern.permute.xlu1 %v7606_v1  ;;  %v5959_v30 = vpop.permute.xlu0 %627 }
  0xbf   : > { %v551_v4 = vsel %vm550_vm1, %v547_v28, %v549_v31  ;;  %2471 = vperm.xlu1 %4942, %v376_v26   ;;  %7766 = vst [vmem:[#allocation20_spill] sm:$0xff] %v5959_v30 }
  0xc0   : > { %v554_v33 = vsel %vm552_vm2, %v553_v32, %v551_v4 }
  0xc1   : > { %v555_v34 = vadd.f32 1e-06, %v554_v33 }
  0xc2   : > { %v5963_v32 = vpop.permute.xlu0 %717 }
  0xc3   : > { %v556_v35 = vmul.f32 1e-12, %v555_v34  ;;  %4943 = vset.pattern.permute.xlu1 %v7604_v0  ;;  %7768 = vst [vmem:[#allocation22_spill] sm:$0xff] %v5963_v32 }
  0xc5   : > { %v557_v36 = vmax.f32 %v554_v33, %v556_v35 }
  0xc6   : > { %v5967_v33 = vpop.permute.xlu0 %637 }
  0xc7   : > { %5020 = vrcp.f32 %v557_v36  ;;  %7770 = vst [vmem:[#allocation24_spill] sm:$0xff] %v5967_v33 }
  0xca   : > { %v5971_v35 = vpop.permute.xlu0 %727 }
  0xcb   : > { %7772 = vst [vmem:[#allocation26_spill] sm:$0xff] %v5971_v35 }
  0xd1   : > { %v5021_v37 = vpop.eup %5020 }
  0xd2   : > { %v562_v38 = vmul.f32 %v5021_v37, %v542_v18  ;;  %v560_v39 = vmul.f32 %v5021_v37, %v524_v17  ;;  %v561_v40 = vmul.f32 %v5021_v37, %v533_v20  ;;  %v4962_v17 = vld [vmem:[%s7595_s2 + $0x70] sm:$0xff]   ;;  %v4963_v18 = vld [vmem:[%s7595_s2 + $0x78] sm:$0xff]   ;;  %v5938_v20 = vpop.permute.xlu1 %687  ;;  %v5975_v37 = vpop.permute.xlu0 %647 }
  0xd3   : > { %7757 = vst [vmem:[#allocation11_spill] sm:$0xff] %v5938_v20  ;;  %7774 = vst [vmem:[#allocation28_spill] sm:$0xff] %v5975_v37 }
  0xd4   : > { %v571_v41 = vmul.f32 %v562_v38, %v562_v38  ;;  %v563_v42 = vmul.f32 0.48860252, %v560_v39  ;;  %v564_v43 = vmul.f32 0.48860252, %v561_v40  ;;  %v566_v44 = vmul.f32 1.0925485, %v560_v39 }
  0xd5   : > { %v570_v45 = vmul.f32 %v560_v39, %v560_v39  ;;  %v565_v47 = vmul.f32 0.48860252, %v562_v38  ;;  %v569_v51 = vmul.f32 %v561_v40, %v561_v40  ;;  %v576_v55 = vmul.f32 1.0925485, %v561_v40 }
  0xd6   : > { %v596_v46 = vpack.c.bf16 %v564_v43, %v563_v42  ;;  %v567_v48 = vmul.f32 %v566_v44, %v562_v38  ;;  %v568_v56 = vmul.f32 %v566_v44, %v561_v40  ;;  %v5942_v22 = vpop.permute.xlu1 %607  ;;  %v5979_v39 = vpop.permute.xlu0 %737 }
  0xd7   : > { %v572_v49 = vadd.f32 %v571_v41, %v570_v45  ;;  %v578_v53 = vsub.f32 %v571_v41, %v570_v45  ;;  %v577_v60 = vmul.f32 %v576_v55, %v562_v38  ;;  %7759 = vst [vmem:[#allocation13_spill] sm:$0xff] %v5942_v22  ;;  %7776 = vst [vmem:[#allocation30_spill] sm:$0xff] %v5979_v39 }
  0xd8   : > { %4670 = vmatprep.subr.bf16.mxu0 %v596_v46  ;;  %v597_v50 = vpack.c.bf16 %v567_v48, %v565_v47 }
  0xd9   : > { %4671 = vmatpush3.bf16.msra.mxu0 %v596_v46  ;;  %v573_v52 = vmul.f32 0.5, %v572_v49  ;;  %v579_v58 = vmul.f32 0.54627424, %v578_v53 }
  0xda   : > { %4672 = vmatprep.subr.bf16.mxu0 %v597_v50  ;;  %v5946_v24 = vpop.permute.xlu1 %692  ;;  %v5983_v42 = vpop.permute.xlu0 %657 }
  0xdb   : > { %v574_v54 = vsub.f32 %v569_v51, %v573_v52  ;;  %v599_v61 = vpack.c.bf16 %v579_v58, %v577_v60  ;;  %7761 = vst [vmem:[#allocation15_spill] sm:$0xff] %v5946_v24  ;;  %7778 = vst [vmem:[#allocation32_spill] sm:$0xff] %v5983_v42 }
  0xdd   : > { %4673 = vmatpush3.bf16.msra.mxu0 %v597_v50  ;;  %v575_v57 = vmul.f32 0.63078314, %v574_v54 }
  0xde   : > { %v5950_v26 = vpop.permute.xlu1 %612  ;;  %v5995_v53 = vpop.permute.xlu0 %747 }
  0xdf   : > { %v598_v59 = vpack.c.bf16 %v575_v57, %v568_v56  ;;  %7763 = vst [vmem:[#allocation17_spill] sm:$0xff] %v5950_v26  ;;  %7780 = vst [vmem:[#allocation34_spill] sm:$0xff] %v5995_v53 }
  0xe1   : > { %4674 = vmatprep.subr.bf16.mxu0 %v598_v59 }
  0xe2   : > { %4675 = vmatpush3.bf16.msra.mxu0 %v598_v59  ;;  %v5954_v28 = vpop.permute.xlu1 %702 }
  0xe3   : > { %4676 = vmatprep.subr.bf16.mxu0 %v599_v61  ;;  %7765 = vst [vmem:[#allocation19_spill] sm:$0xff] %v5954_v28 }
  0xe6   : > { %4677 = vmatpush3.bf16.msra.mxu0 %v599_v61  ;;  %v5961_v31 = vpop.permute.xlu1 %622 }
  0xe7   : > { %7767 = vst [vmem:[#allocation21_spill] sm:$0xff] %v5961_v31 }
  0xe9   : > { %4679 = vmatmul.mubr.msk.bf16.vlgmr.msra.gmra.mrb[0].mxu0 %vm840_vm0, %v4949_v62 }
  0xea   : > { %4682 = vmatprep.mubr.msk.bf16.mxu0 %vm840_vm0, %v4950_v63  ;;  %v5965_v4 = vpop.permute.xlu1 %712  ;;  %v6003_v63 = vpop.permute.xlu0 %667 }
  0xeb   : > { %7769 = vst [vmem:[#allocation23_spill] sm:$0xff] %v5965_v4  ;;  %7782 = vst [vmem:[#allocation36_spill] sm:$0xff] %v6003_v63 }
  0xee   : > { %v5969_v34 = vpop.permute.xlu1 %632 }
  0xef   : > { %7771 = vst [vmem:[#allocation25_spill] sm:$0xff] %v5969_v34 }
  0xf1   : > { %4683 = vmatmul.mubr.msk.bf16.gmra.mrb[4].mxu0 %vm840_vm0, %v4951_v2 }
  0xf2   : > { %4686 = vmatprep.mubr.msk.bf16.mxu0 %vm840_vm0, %v4952_v3  ;;  %v5973_v36 = vpop.permute.xlu1 %722 }
  0xf3   : > { %7773 = vst [vmem:[#allocation27_spill] sm:$0xff] %v5973_v36 }
  0xf6   : > { %v5977_v38 = vpop.permute.xlu1 %642 }
  0xf7   : > { %7775 = vst [vmem:[#allocation29_spill] sm:$0xff] %v5977_v38 }
  0xf9   : > { %4687 = vmatmul.mubr.msk.bf16.gmra.mrb[8].mxu0 %vm840_vm0, %v4953_v5 }
  0xfa   : > { %4690 = vmatprep.mubr.msk.bf16.mxu0 %vm840_vm0, %v4954_v6  ;;  %v5981_v40 = vpop.permute.xlu1 %732 }
  0xfb   : > { %7777 = vst [vmem:[#allocation31_spill] sm:$0xff] %v5981_v40 }
  0xfe   : > { %v5985_v44 = vpop.permute.xlu1 %652 }
  0xff   : > { %7779 = vst [vmem:[#allocation33_spill] sm:$0xff] %v5985_v44 }
 0x101   : > { %4691 = vmatmul.mubr.msk.bf16.gmra.mrb[12].mxu0 %vm840_vm0, %v4955_v7 }
 0x102   : > { %4694 = vmatprep.mubr.msk.bf16.mxu0 %vm840_vm0, %v4956_v8  ;;  %v5997_v54 = vpop.permute.xlu1 %742 }
 0x103   : > { %7781 = vst [vmem:[#allocation35_spill] sm:$0xff] %v5997_v54 }
 0x106   : > { %v6007_v3 = vpop.permute.xlu1 %662 }
 0x107   : > { %7783 = vst [vmem:[#allocation37_spill] sm:$0xff] %v6007_v3 }
 0x109   : > { %4695 = vmatmul.mubr.msk.bf16.gmra.mrb[16].mxu0 %vm840_vm0, %v4957_v9  ;;  %v6011_v9 = vpop.permute.xlu0 %757 }
 0x10a   : > { %4698 = vmatprep.mubr.msk.bf16.mxu0 %vm840_vm0, %v4958_v11  ;;  %7784 = vst [vmem:[#allocation38_spill] sm:$0xff] %v6011_v9 }
 0x111   : > { %4699 = vmatmul.mubr.msk.bf16.gmra.mrb[20].mxu0 %vm840_vm0, %v4959_v13 }
 0x112   : > { %4702 = vmatprep.mubr.msk.bf16.mxu0 %vm840_vm0, %v4960_v15 }
 0x119   : > { %4703 = vmatmul.mubr.msk.bf16.gmra.mrb[24].mxu0 %vm840_vm0, %v4961_v16  ;;  %v6015_v16 = vpop.permute.xlu1 %752 }
 0x11a   : > { %4706 = vmatprep.mubr.msk.bf16.mxu0 %vm840_vm0, %v4962_v17  ;;  %7785 = vst [vmem:[#allocation39_spill] sm:$0xff] %v6015_v16 }
 0x121   : > { %4707 = vmatmul.mubr.msk.bf16.gmra.mrb[28].mxu0 %vm840_vm0, %v4963_v18 }
 0x1bc   : > { %v4680_v41 = vpop.f32.mrb[0].mxu0 }
 0x1bd   : > { %v923_v43 = vpop.f32.mrb[1].mxu0  ;;  %v932_v46 = vadd.f32 %v4680_v41, %v5950_v26 }
 0x1be   : > { %v4681_v45 = vpop.f32.mrb[2].mxu0  ;;  %v924_v49 = vadd.f32 %v923_v43, %v5940_v21 }
 0x1bf   : > { %v935_v47 = vadd.f32 %v4681_v45, %v5948_v25  ;;  %v926_v48 = vpop.f32.mrb[3].mxu0  ;;  %v6023_v45 = vpop.permute.xlu0 %677 }
 0x1c0   : > { %v927_v50 = vadd.f32 %v926_v48, %v5942_v22  ;;  %7786 = vst [vmem:[#allocation40_spill] sm:$0xff] %v6023_v45 }
 0x1c1   : > { %v5991_v51 = vpack.c.bf16 %v935_v47, %v932_v46  ;;  %v6025_v47 = vpop.permute.xlu1 %672 }
 0x1c2   : > { %v5993_v52 = vpack.c.bf16 %v927_v50, %v924_v49  ;;  %7787 = vst [vmem:[#allocation41_spill] sm:$0xff] %v6025_v47 }
 0x1c4   : > { %v4684_v55 = vpop.f32.mrb[4].mxu0 }
 0x1c5   : > { %v939_v56 = vpop.f32.mrb[5].mxu0  ;;  %v948_v58 = vadd.f32 %v4684_v55, %v5969_v34 }
 0x1c6   : > { %v4685_v57 = vpop.f32.mrb[6].mxu0  ;;  %v940_v61 = vadd.f32 %v939_v56, %v5961_v31 }
 0x1c7   : > { %v951_v59 = vadd.f32 %v4685_v57, %v5967_v33  ;;  %v942_v60 = vpop.f32.mrb[7].mxu0 }
 0x1c8   : > { %v943_v62 = vadd.f32 %v942_v60, %v5959_v30 }
 0x1c9   : > { %v6005_v2 = vpack.c.bf16 %v951_v59, %v948_v58 }
 0x1ca   : > { %v6009_v5 = vpack.c.bf16 %v943_v62, %v940_v61  ;;  %v1066_v61 = vmul.bf16 1056980736, %v5993_v52 }
 0x1cc   : > { %v4688_v6 = vpop.f32.mrb[8].mxu0  ;;  %5022 = vtanh.bf16 %v1066_v61 }
 0x1cd   : > { %v955_v7 = vpop.f32.mrb[9].mxu0  ;;  %v964_v11 = vadd.f32 %v4688_v6, %v5985_v44 }
 0x1ce   : > { %v4689_v8 = vpop.f32.mrb[10].mxu0  ;;  %v956_v17 = vadd.f32 %v955_v7, %v5977_v38 }
 0x1cf   : > { %v967_v13 = vadd.f32 %v4689_v8, %v5983_v42  ;;  %v958_v15 = vpop.f32.mrb[11].mxu0 }
 0x1d0   : > { %v959_v18 = vadd.f32 %v958_v15, %v5975_v37 }
 0x1d1   : > { %v6019_v29 = vpack.c.bf16 %v967_v13, %v964_v11  ;;  %v1067_v13 = vmul.bf16 1056980736, %v5991_v51 }
 0x1d2   : > { %v6021_v41 = vpack.c.bf16 %v959_v18, %v956_v17 }
 0x1d3   : > { %5024 = vtanh.bf16 %v1067_v13 }
 0x1d4   : > { %v4692_v43 = vpop.f32.mrb[12].mxu0 }
 0x1d5   : > { %v971_v46 = vpop.f32.mrb[13].mxu0  ;;  %v980_v49 = vadd.f32 %v4692_v43, %v6025_v47 }
 0x1d6   : > { %v4693_v48 = vpop.f32.mrb[14].mxu0  ;;  %v972_v56 = vadd.f32 %v971_v46, %v6007_v3 }
 0x1d7   : > { %v983_v50 = vadd.f32 %v4693_v48, %v6023_v45  ;;  %v974_v55 = vpop.f32.mrb[15].mxu0 }
 0x1d8   : > { %v975_v57 = vadd.f32 %v974_v55, %v6003_v63 }
 0x1d9   : > { %v6031_v58 = vpack.c.bf16 %v983_v50, %v980_v49  ;;  %v1068_v50 = vmul.bf16 1056980736, %v6009_v5 }
 0x1da   : > { %v6033_v59 = vpack.c.bf16 %v975_v57, %v972_v56 }
 0x1dc   : > { %v4696_v60 = vpop.f32.mrb[16].mxu0 }
 0x1dd   : > { %v987_v62 = vpop.f32.mrb[17].mxu0  ;;  %v996_v7 = vadd.f32 %v4696_v60, %v5946_v24 }
 0x1de   : > { %v4697_v6 = vpop.f32.mrb[18].mxu0  ;;  %v988_v15 = vadd.f32 %v987_v62, %v5936_v19  ;;  %v1069_v62 = vmul.bf16 1056980736, %v6005_v2 }
 0x1df   : > { %v999_v8 = vadd.f32 %v4697_v6, %v5944_v23  ;;  %v990_v11 = vpop.f32.mrb[19].mxu0 }
 0x1e0   : > { %v991_v17 = vadd.f32 %v990_v11, %v5938_v20 }
 0x1e1   : > { %v6041_v18 = vpack.c.bf16 %v999_v8, %v996_v7 }
 0x1e2   : > { %v6043_v43 = vpack.c.bf16 %v991_v17, %v988_v15  ;;  %v5023_v15 = vpop.eup %5022 }
 0x1e3   : > { %v1075_v46 = vmul.bf16 1056980736, %v6041_v18 }
 0x1e4   : > { %v4700_v48 = vpop.f32.mrb[20].mxu0  ;;  %v1074_v49 = vmul.bf16 1056980736, %v6043_v43 }
 0x1e5   : > { %5026 = vtanh.bf16 %v1075_v46  ;;  %v1003_v55 = vpop.f32.mrb[21].mxu0  ;;  %v1012_v57 = vadd.f32 %v4700_v48, %v5965_v4  ;;  %v1070_v48 = vmul.bf16 1056980736, %v6021_v41 }
 0x1e6   : > { %v4701_v56 = vpop.f32.mrb[22].mxu0  ;;  %5028 = vtanh.bf16 %v1074_v49  ;;  %v1004_v6 = vadd.f32 %v1003_v55, %v5954_v28 }
 0x1e7   : > { %v1015_v60 = vadd.f32 %v4701_v56, %v5963_v32  ;;  %v1006_v61 = vpop.f32.mrb[23].mxu0  ;;  %5030 = vtanh.bf16 %v1068_v50  ;;  %v5025_v56 = vpop.eup %5024 }
 0x1e8   : > { %v1007_v7 = vadd.f32 %v1006_v61, %v5952_v27  ;;  %5032 = vtanh.bf16 %v1069_v62  ;;  %v1098_v61 = vmul.bf16 1056980736, %v5023_v15 }
 0x1e9   : > { %v6053_v8 = vpack.c.bf16 %v1015_v60, %v1012_v57 }
 0x1ea   : > { %v6055_v11 = vpack.c.bf16 %v1007_v7, %v1004_v6  ;;  %v1071_v7 = vmul.bf16 1056980736, %v6019_v29 }
 0x1eb   : > { %v1077_v13 = vmul.bf16 1056980736, %v6053_v8 }
 0x1ec   : > { %v1076_v17 = vmul.bf16 1056980736, %v6055_v11  ;;  %v4704_v46 = vpop.f32.mrb[24].mxu0 }
 0x1ed   : > { %5034 = vtanh.bf16 %v1077_v13  ;;  %v1019_v49 = vpop.f32.mrb[25].mxu0  ;;  %v1028_v50 = vadd.f32 %v4704_v46, %v5981_v40  ;;  %v1099_v46 = vmul.bf16 1056980736, %v5025_v56 }
 0x1ee   : > { %5036 = vtanh.bf16 %v1076_v17  ;;  %v4705_v55 = vpop.f32.mrb[26].mxu0  ;;  %v1020_v62 = vadd.f32 %v1019_v49, %v5973_v36 }
 0x1ef   : > { %v1031_v57 = vadd.f32 %v4705_v55, %v5979_v39  ;;  %v1022_v60 = vpop.f32.mrb[27].mxu0  ;;  %5038 = vtanh.bf16 %v1070_v48  ;;  %v1114_v39 = vadd.bf16 1056980736, %v1098_v61 }
 0x1f0   : > { %v5027_v6 = vpop.eup %5026  ;;  %v1023_v0 = vadd.f32 %v1022_v60, %v5971_v35  ;;  %5040 = vtanh.bf16 %v1071_v7  ;;  %v1072_v60 = vmul.bf16 1056980736, %v6033_v59 }
 0x1f1   : > { %v5029_v1 = vpop.eup %5028  ;;  %v6065_v13 = vpack.c.bf16 %v1031_v57, %v1028_v50  ;;  %v1107_v17 = vmul.bf16 1056980736, %v5027_v6  ;;  %v1130_v7 = vmul.bf16 %v1114_v39, %v5993_v52 }
 0x1f2   : > { %v6067_v27 = vpack.c.bf16 %v1023_v0, %v1020_v62  ;;  %v1106_v28 = vmul.bf16 1056980736, %v5029_v1  ;;  %v5031_v40 = vpop.eup %5030  ;;  %v1115_v1 = vadd.bf16 1056980736, %v1099_v46 }
 0x1f3   : > { %v1079_v55 = vmul.bf16 1056980736, %v6065_v13  ;;  %v1123_v15 = vadd.bf16 1056980736, %v1107_v17  ;;  %v5033_v56 = vpop.eup %5032  ;;  %v1100_v62 = vmul.bf16 1056980736, %v5031_v40 }
 0x1f4   : > { %v1078_v32 = vmul.bf16 1056980736, %v6067_v27  ;;  %v4708_v49 = vpop.f32.mrb[28].mxu0  ;;  %v1122_v36 = vadd.bf16 1056980736, %v1106_v28  ;;  %v1131_v52 = vmul.bf16 %v1115_v1, %v5991_v51 }
 0x1f5   : > { %5042 = vtanh.bf16 %v1079_v55  ;;  %v1035_v48 = vpop.f32.mrb[29].mxu0  ;;  %v1044_v57 = vadd.f32 %v4708_v49, %v6015_v16  ;;  %v1073_v28 = vmul.bf16 1056980736, %v6031_v58 }
 0x1f6   : > { %5044 = vtanh.bf16 %v1078_v32  ;;  %v4709_v50 = vpop.f32.mrb[30].mxu0  ;;  %v1138_v0 = vmul.bf16 %v1122_v36, %v6043_v43  ;;  %v1036_v55 = vadd.f32 %v1035_v48, %v5997_v54  ;;  %v1139_v36 = vmul.bf16 %v1123_v15, %v6041_v18 }
 0x1f7   : > { %v1047_v61 = vadd.f32 %v4709_v50, %v6011_v9  ;;  %v1038_v6 = vpop.f32.mrb[31].mxu0  ;;  %5046 = vtanh.bf16 %v1072_v60  ;;  %v1116_v9 = vadd.bf16 1056980736, %v1100_v62  ;;  %v1101_v48 = vmul.bf16 1056980736, %v5033_v56 }
 0x1f8   : > { %v5035_v17 = vpop.eup %5034  ;;  %v1039_v32 = vadd.f32 %v1038_v6, %v5995_v53  ;;  %4050 = vmatprep.subr.bf16.mxu1 %v1138_v0  ;;  %5048 = vtanh.bf16 %v1073_v28 }
 0x1f9   : > { %v5037_v43 = vpop.eup %5036  ;;  %v6080_v46 = vpack.c.bf16 %v1047_v61, %v1044_v57  ;;  %4051 = vmatpush3.bf16.msra.mxu1 %v1130_v7  ;;  %v1109_v49 = vmul.bf16 1056980736, %v5035_v17  ;;  %v1132_v57 = vmul.bf16 %v1116_v9, %v6009_v5  ;;  %v1117_v61 = vadd.bf16 1056980736, %v1101_v48 }
 0x1fa   : > { %v1064_v50 = vpack.c.bf16 %v1039_v32, %v1036_v55  ;;  %4052 = vmatprep.subr.bf16.mxu1 %v1139_v36  ;;  %v1108_v39 = vmul.bf16 1056980736, %v5037_v43  ;;  %v5039_v54 = vpop.eup %5038 }
 0x1fb   : > { %v1081_v40 = vmul.bf16 1056980736, %v6080_v46  ;;  %v1125_v18 = vadd.bf16 1056980736, %v1109_v49  ;;  %v5041_v60 = vpop.eup %5040  ;;  %v1102_v7 = vmul.bf16 1056980736, %v5039_v54  ;;  %v1133_v28 = vmul.bf16 %v1117_v61, %v6005_v2 }
 0x1fc   : > { %v1080_v0 = vmul.bf16 1056980736, %v1064_v50  ;;  %v1124_v6 = vadd.bf16 1056980736, %v1108_v39  ;;  %v1103_v32 = vmul.bf16 1056980736, %v5041_v60 }
 0x1fd   : > { %5050 = vtanh.bf16 %v1081_v40  ;;  %4053 = vmatpush3.bf16.msra.mxu1 %v1131_v52  ;;  %v1141_v51 = vmul.bf16 %v1125_v18, %v6053_v8  ;;  %v1118_v55 = vadd.bf16 1056980736, %v1102_v7  ;;  %v4967_v7 = vld [vmem:[%s7597_s4 + $0x14] ss:$8 sps:$4 sm:$0xff]  }
 0x1fe   : > { %5052 = vtanh.bf16 %v1080_v0  ;;  %v1140_v15 = vmul.bf16 %v1124_v6, %v6055_v11  ;;  %v1119_v49 = vadd.bf16 1056980736, %v1103_v32  ;;  %v4985_v32 = vld [vmem:[%s7597_s4 + $0x74] ss:$8 sps:$4 sm:$0xff]  }
 0x1ff   : > { %v1134_v9 = vmul.bf16 %v1118_v55, %v6021_v41  ;;  %v4984_v55 = vld [vmem:[%s7597_s4 + $0x60] ss:$8 sps:$4 sm:$0xff]  }
 0x200   : > { %v5043_v17 = vpop.eup %5042  ;;  %4054 = vmatprep.subr.bf16.mxu1 %v1140_v15  ;;  %v1135_v0 = vmul.bf16 %v1119_v49, %v6019_v29  ;;  %v4966_v29 = vld [vmem:[%s7597_s4] ss:$8 sps:$4 sm:$0xff]  }
 0x201   : > { %v5045_v1 = vpop.eup %5044  ;;  %4055 = vmatpush3.bf16.msra.mxu1 %v1132_v57  ;;  %v1111_v56 = vmul.bf16 1056980736, %v5043_v17  ;;  %v4975_v17 = vld [vmem:[%s7597_s4 + $0x30] ss:$8 sps:$4 sm:$0xff]   ;;  %v4996_v49 = vld [vmem:[%s7597_s4 + $0xa0] ss:$8 sps:$4 sm:$0xff]  }
 0x202   : > { %4056 = vmatprep.subr.bf16.mxu1 %v1141_v51  ;;  %v1110_v62 = vmul.bf16 1056980736, %v5045_v1  ;;  %v5047_v36 = vpop.eup %5046  ;;  %v4976_v51 = vld [vmem:[%s7597_s4 + $0x44] ss:$8 sps:$4 sm:$0xff]   ;;  %v4978_v1 = vld [vmem:[%s7597_s4 + $0x40] ss:$8 sps:$4 sm:$0xff]  }
 0x203   : > { %v1127_v43 = vadd.bf16 1056980736, %v1111_v56  ;;  %v5049_v54 = vpop.eup %5048  ;;  %v1104_v8 = vmul.bf16 1056980736, %v5047_v36  ;;  %v4979_v56 = vld [vmem:[%s7597_s4 + $0x54] ss:$8 sps:$4 sm:$0xff]  }
 0x204   : > { %v1126_v11 = vadd.bf16 1056980736, %v1110_v62  ;;  %v1105_v18 = vmul.bf16 1056980736, %v5049_v54  ;;  %v4981_v62 = vld [vmem:[%s7597_s4 + $0x50] ss:$8 sps:$4 sm:$0xff]  }
 0x205   : > { %4057 = vmatpush3.bf16.msra.mxu1 %v1133_v28  ;;  %v1143_v40 = vmul.bf16 %v1127_v43, %v6065_v13  ;;  %v1120_v6 = vadd.bf16 1056980736, %v1104_v8  ;;  %v4982_v28 = vld [vmem:[%s7597_s4 + $0x64] ss:$8 sps:$4 sm:$0xff]   ;;  %v4987_v36 = vld [vmem:[%s7597_s4 + $0x70] ss:$8 sps:$4 sm:$0xff]  }
 0x206   : > { %v1142_v5 = vmul.bf16 %v1126_v11, %v6067_v27  ;;  %v1121_v57 = vadd.bf16 1056980736, %v1105_v18  ;;  %v4988_v11 = vld [vmem:[%s7597_s4 + $0x84] ss:$8 sps:$4 sm:$0xff]   ;;  %v4990_v43 = vld [vmem:[%s7597_s4 + $0x80] ss:$8 sps:$4 sm:$0xff]  }
 0x207   : > { %v1136_v41 = vmul.bf16 %v1120_v6, %v6033_v59  ;;  %v4969_v59 = vld [vmem:[%s7597_s4 + $0x10] ss:$8 sps:$4 sm:$0xff]   ;;  %v4997_v8 = vld [vmem:[%s7597_s4 + $0xb4] ss:$8 sps:$4 sm:$0xff]   ;;  %v5008_v6 = vld [vmem:[%s7597_s4 + $0xe0] ss:$8 sps:$4 sm:$0xff]  }
 0x208   : > { %v5051_v39 = vpop.eup %5050  ;;  %4058 = vmatprep.subr.bf16.mxu1 %v1142_v5  ;;  %v1137_v13 = vmul.bf16 %v1121_v57, %v6031_v58  ;;  %v4972_v58 = vld [vmem:[%s7597_s4 + $0x20] ss:$8 sps:$4 sm:$0xff]   ;;  %v4991_v5 = vld [vmem:[%s7597_s4 + $0x94] ss:$8 sps:$4 sm:$0xff]   ;;  %v4993_v54 = vld [vmem:[%s7597_s4 + $0x90] ss:$8 sps:$4 sm:$0xff]   ;;  %v6194_v57 = vpop.permute.xlu0 %1826 }
 0x209   : > { %v5053_v52 = vpop.eup %5052  ;;  %4059 = vmatpush3.bf16.msra.mxu1 %v1134_v9  ;;  %v1113_v2 = vmul.bf16 1056980736, %v5051_v39  ;;  %v4994_v9 = vld [vmem:[%s7597_s4 + $0xa4] ss:$8 sps:$4 sm:$0xff]   ;;  %v4999_v39 = vld [vmem:[%s7597_s4 + $0xb0] ss:$8 sps:$4 sm:$0xff]  }
 0x20a   : > { %4060 = vmatprep.subr.bf16.mxu1 %v1143_v40  ;;  %v1112_v48 = vmul.bf16 1056980736, %v5053_v52  ;;  %v5000_v40 = vld [vmem:[%s7597_s4 + $0xc4] ss:$8 sps:$4 sm:$0xff]   ;;  %v5002_v52 = vld [vmem:[%s7597_s4 + $0xc0] ss:$8 sps:$4 sm:$0xff]  }
 0x20b   : > { %v1129_v27 = vadd.bf16 1056980736, %v1113_v2  ;;  %v5003_v2 = vld [vmem:[%s7597_s4 + $0xd4] ss:$8 sps:$4 sm:$0xff]  }
 0x20c   : > { %v1128_v15 = vadd.bf16 1056980736, %v1112_v48  ;;  %v5005_v48 = vld [vmem:[%s7597_s4 + $0xd0] ss:$8 sps:$4 sm:$0xff]   ;;  %v5009_v18 = vld [vmem:[%s7597_s4 + $0xf4] ss:$8 sps:$4 sm:$0xff]  }
 0x20d   : > { %4061 = vmatpush3.bf16.msra.mxu1 %v1135_v0  ;;  %v1145_v61 = vmul.bf16 %v1129_v27, %v6080_v46  ;;  %v4970_v46 = vld [vmem:[%s7597_s4 + $0x24] ss:$8 sps:$4 sm:$0xff]   ;;  %v6188_v27 = vpop.permute.xlu1 %1228 }
 0x20e   : > { %v1144_v60 = vmul.bf16 %v1128_v15, %v1064_v50  ;;  %v4973_v50 = vld [vmem:[%s7597_s4 + $0x34] ss:$8 sps:$4 sm:$0xff]   ;;  %v5006_v0 = vld [vmem:[%s7597_s4 + $0xe4] ss:$8 sps:$4 sm:$0xff]   ;;  %v5011_v15 = vld [vmem:[%s7597_s4 + $0xf0] ss:$8 sps:$4 sm:$0xff]  }
 0x20f   : > { %7788 = vst [vmem:[#allocation42_spill] sm:$0xff] %v6188_v27 }
 0x210   : > { %4062 = vmatprep.subr.bf16.mxu1 %v1144_v60 }
 0x211   : > { %4063 = vmatpush3.bf16.msra.mxu1 %v1136_v41  ;;  %v6190_v60 = vpop.permute.xlu1 %1148 }
 0x212   : > { %4064 = vmatprep.subr.bf16.mxu1 %v1145_v61  ;;  %7789 = vst [vmem:[#allocation43_spill] sm:$0xff] %v6190_v60 }
 0x215   : > { %4065 = vmatpush3.bf16.msra.mxu1 %v1137_v13  ;;  %v6192_v41 = vpop.permute.xlu1 %1238  ;;  %v6198_v13 = vpop.permute.xlu0 %1831 }
 0x216   : > { %7790 = vst [vmem:[#allocation44_spill] sm:$0xff] %v6192_v41 }
 0x218   : > { %1499 = vmatmul.mubr.bf16.vlgmr.msra.gmra.mrb[0].mxu1 %v4966_v29 }
 0x219   : > { %1506 = vmatprep.mubr.bf16.mxu1 %v4967_v7  ;;  %v6196_v61 = vpop.permute.xlu1 %1158  ;;  %v6202_v7 = vpop.permute.xlu0 %1233 }
 0x21a   : > { %7791 = vst [vmem:[#allocation45_spill] sm:$0xff] %v6196_v61  ;;  %7793 = vst [vmem:[#allocation47_spill] sm:$0xff] %v6202_v7 }
 0x21d   : > { %v6200_v29 = vpop.permute.xlu1 %1248 }
 0x21e   : > { %7792 = vst [vmem:[#allocation46_spill] sm:$0xff] %v6200_v29 }
 0x220   : > { %1507 = vmatmul.mubr.bf16.gmra.mrb[4].mxu1 %v4969_v59 }
 0x221   : > { %1514 = vmatprep.mubr.bf16.mxu1 %v4970_v46  ;;  %v6204_v59 = vpop.permute.xlu1 %1168  ;;  %v6206_v46 = vpop.permute.xlu0 %1153 }
 0x222   : > { %7794 = vst [vmem:[#allocation48_spill] sm:$0xff] %v6204_v59  ;;  %7795 = vst [vmem:[#allocation49_spill] sm:$0xff] %v6206_v46 }
 0x228   : > { %1515 = vmatmul.mubr.bf16.gmra.mrb[8].mxu1 %v4972_v58  ;;  %v6208_v58 = vpop.permute.xlu1 %1821 }
 0x229   : > { %1522 = vmatprep.mubr.bf16.mxu1 %v4973_v50  ;;  %v6210_v50 = vpop.permute.xlu0 %1243 }
 0x22a   : > { %7796 = vst [vmem:[#allocation50_spill] sm:$0xff] %v6210_v50 }
 0x230   : > { %1523 = vmatmul.mubr.bf16.gmra.mrb[12].mxu1 %v4975_v17  ;;  %v6212_v17 = vpop.permute.xlu1 %1258 }
 0x231   : > { %1530 = vmatprep.mubr.bf16.mxu1 %v4976_v51  ;;  %7797 = vst [vmem:[#allocation51_spill] sm:$0xff] %v6212_v17  ;;  %v6214_v51 = vpop.permute.xlu0 %1163 }
 0x232   : > { %7798 = vst [vmem:[#allocation52_spill] sm:$0xff] %v6214_v51 }
 0x238   : > { %1531 = vmatmul.mubr.bf16.gmra.mrb[16].mxu1 %v4978_v1 }
 0x239   : > { %1538 = vmatprep.mubr.bf16.mxu1 %v4979_v56  ;;  %v6216_v56 = vpop.permute.xlu1 %1263 }
 0x23a   : > { %7799 = vst [vmem:[#allocation53_spill] sm:$0xff] %v6216_v56 }
 0x240   : > { %1539 = vmatmul.mubr.bf16.gmra.mrb[20].mxu1 %v4981_v62 }
 0x241   : > { %1546 = vmatprep.mubr.bf16.mxu1 %v4982_v28 }
 0x248   : > { %1547 = vmatmul.mubr.bf16.gmra.mrb[24].mxu1 %v4984_v55 }
 0x249   : > { %1554 = vmatprep.mubr.bf16.mxu1 %v4985_v32 }
 0x250   : > { %1555 = vmatmul.mubr.bf16.gmra.mrb[28].mxu1 %v4987_v36 }
 0x251   : > { %1562 = vmatprep.mubr.bf16.mxu1 %v4988_v11  ;;  %v6218_v11 = vpop.permute.xlu0 %1253 }
 0x252   : > { %7800 = vst [vmem:[#allocation54_spill] sm:$0xff] %v6218_v11 }
 0x258   : > { %1563 = vmatmul.mubr.bf16.gmra.mrb[32].mxu1 %v4990_v43 }
 0x259   : > { %1570 = vmatprep.mubr.bf16.mxu1 %v4991_v5 }
 0x260   : > { %1571 = vmatmul.mubr.bf16.gmra.mrb[36].mxu1 %v4993_v54  ;;  %v6222_v54 = vpop.permute.xlu1 %1178 }
 0x261   : > { %1578 = vmatprep.mubr.bf16.mxu1 %v4994_v9  ;;  %7801 = vst [vmem:[#allocation55_spill] sm:$0xff] %v6222_v54 }
 0x268   : > { %1579 = vmatmul.mubr.bf16.gmra.mrb[40].mxu1 %v4996_v49 }
 0x269   : > { %1586 = vmatprep.mubr.bf16.mxu1 %v4997_v8 }
 0x270   : > { %1587 = vmatmul.mubr.bf16.gmra.mrb[44].mxu1 %v4999_v39 }
 0x271   : > { %1594 = vmatprep.mubr.bf16.mxu1 %v5000_v40 }
 0x278   : > { %1595 = vmatmul.mubr.bf16.gmra.mrb[48].mxu1 %v5002_v52 }
 0x279   : > { %1602 = vmatprep.mubr.bf16.mxu1 %v5003_v2  ;;  %v6226_v2 = vpop.permute.xlu0 %1173 }
 0x27a   : > { %7802 = vst [vmem:[#allocation56_spill] sm:$0xff] %v6226_v2 }
 0x280   : > { %1603 = vmatmul.mubr.bf16.gmra.mrb[52].mxu1 %v5005_v48 }
 0x281   : > { %1610 = vmatprep.mubr.bf16.mxu1 %v5006_v0  ;;  %v6228_v0 = vpop.permute.xlu1 %1183 }
 0x282   : > { %7803 = vst [vmem:[#allocation57_spill] sm:$0xff] %v6228_v0 }
 0x288   : > { %1611 = vmatmul.mubr.bf16.gmra.mrb[56].mxu1 %v5008_v6 }
 0x289   : > { %1618 = vmatprep.mubr.bf16.mxu1 %v5009_v18 }
 0x290   : > { %1619 = vmatmul.mubr.bf16.gmra.mrb[60].mxu1 %v5011_v15 }
 0x291   : > { %2253 = vmatprep.mubr.bf16.mxu1 %v4991_v5 }
 0x2eb   : > { %v4066_v1 = vpop.f32.mrb[0].mxu1 }
 0x2ec   : > { %v4067_v62 = vpop.f32.mrb[1].mxu1 }
 0x2ed   : > { %v4068_v28 = vadd.f32 %v4067_v62, %v4066_v1  ;;  %v4069_v55 = vpop.f32.mrb[2].mxu1 }
 0x2ee   : > { %v4070_v32 = vpop.f32.mrb[3].mxu1 }
 0x2ef   : > { %v4071_v36 = vadd.f32 %v4070_v32, %v4069_v55  ;;  %v1501_v43 = vadd.f32 %v4068_v28, %v6190_v60  ;;  %v6234_v28 = vpop.permute.xlu0 %1268 }
 0x2f0   : > { %7804 = vst [vmem:[#allocation58_spill] sm:$0xff] %v6234_v28 }
 0x2f1   : > { %v1504_v5 = vadd.f32 %v4071_v36, %v6206_v46  ;;  %v6236_v36 = vpop.permute.xlu1 %1273 }
 0x2f2   : > { %7805 = vst [vmem:[#allocation59_spill] sm:$0xff] %v6236_v36 }
 0x2f3   : > { %v6224_v9 = vpack.c.bf16 %v1504_v5, %v1501_v43  ;;  %v4072_v49 = vpop.f32.mrb[4].mxu1 }
 0x2f4   : > { %v4073_v8 = vpop.f32.mrb[5].mxu1 }
 0x2f5   : > { %v4074_v39 = vadd.f32 %v4073_v8, %v4072_v49  ;;  %v4075_v40 = vpop.f32.mrb[6].mxu1 }
 0x2f6   : > { %v4076_v52 = vpop.f32.mrb[7].mxu1 }
 0x2f7   : > { %v4077_v48 = vadd.f32 %v4076_v52, %v4075_v40  ;;  %v1509_v6 = vadd.f32 %v4074_v39, %v6196_v61  ;;  %v6240_v40 = vpop.permute.xlu0 %1193 }
 0x2f8   : > { %7806 = vst [vmem:[#allocation60_spill] sm:$0xff] %v6240_v40 }
 0x2f9   : > { %v1512_v18 = vadd.f32 %v4077_v48, %v6214_v51  ;;  %v6244_v48 = vpop.permute.xlu1 %1188 }
 0x2fa   : > { %7807 = vst [vmem:[#allocation61_spill] sm:$0xff] %v6244_v48 }
 0x2fb   : > { %v6232_v15 = vpack.c.bf16 %v1512_v18, %v1509_v6  ;;  %v4078_v1 = vpop.f32.mrb[8].mxu1  ;;  %v5014_v18 = vld [vmem:[%s7599_s6 + $0x4] ss:$8 sps:$4 sm:$0xff]  }
 0x2fc   : > { %v4079_v62 = vpop.f32.mrb[9].mxu1  ;;  %1795 = vmatprep.mubr.bf16.mxu0 %v5014_v18 }
 0x2fd   : > { %v4080_v55 = vadd.f32 %v4079_v62, %v4078_v1  ;;  %v4081_v32 = vpop.f32.mrb[10].mxu1 }
 0x2fe   : > { %v4082_v43 = vpop.f32.mrb[11].mxu1 }
 0x2ff   : > { %v4083_v5 = vadd.f32 %v4082_v43, %v4081_v32  ;;  %v1517_v49 = vadd.f32 %v4080_v55, %v6204_v59  ;;  %v6249_v55 = vpop.permute.xlu0 %1283 }
 0x300   : > { %7808 = vst [vmem:[#allocation62_spill] sm:$0xff] %v6249_v55 }
 0x301   : > { %v1520_v8 = vadd.f32 %v4083_v5, %v6226_v2 }
 0x303   : > { %v6242_v39 = vpack.c.bf16 %v1520_v8, %v1517_v49  ;;  %v4084_v52 = vpop.f32.mrb[12].mxu1  ;;  %v6253_v49 = vpop.permute.xlu1 %1278 }
 0x304   : > { %v4085_v6 = vpop.f32.mrb[13].mxu1  ;;  %7809 = vst [vmem:[#allocation63_spill] sm:$0xff] %v6253_v49 }
 0x305   : > { %v4086_v1 = vadd.f32 %v4085_v6, %v4084_v52  ;;  %v4087_v62 = vpop.f32.mrb[14].mxu1  ;;  %v6257_v52 = vpop.permute.xlu0 %1203 }
 0x306   : > { %v4088_v51 = vpop.f32.mrb[15].mxu1  ;;  %7810 = vst [vmem:[#allocation64_spill] sm:$0xff] %v6257_v52 }
 0x307   : > { %v4089_v32 = vadd.f32 %v4088_v51, %v4087_v62  ;;  %v1525_v43 = vadd.f32 %v4086_v1, %v6222_v54  ;;  %v6259_v18 = vpop.permute.xlu1 %1198 }
 0x308   : > { %7811 = vst [vmem:[#allocation65_spill] sm:$0xff] %v6259_v18 }
 0x309   : > { %v1528_v5 = vadd.f32 %v4089_v32, %v6228_v0 }
 0x30b   : > { %v6255_v8 = vpack.c.bf16 %v1528_v5, %v1525_v43  ;;  %v4090_v2 = vpop.f32.mrb[16].mxu1  ;;  %v6265_v43 = vpop.permute.xlu0 %1293 }
 0x30c   : > { %v4091_v59 = vpop.f32.mrb[17].mxu1  ;;  %7812 = vst [vmem:[#allocation66_spill] sm:$0xff] %v6265_v43 }
 0x30d   : > { %v4092_v61 = vadd.f32 %v4091_v59, %v4090_v2  ;;  %v4093_v46 = vpop.f32.mrb[18].mxu1  ;;  %v6267_v59 = vpop.permute.xlu1 %1288 }
 0x30e   : > { %v4094_v60 = vpop.f32.mrb[19].mxu1  ;;  %7813 = vst [vmem:[#allocation67_spill] sm:$0xff] %v6267_v59 }
 0x30f   : > { %v4095_v6 = vadd.f32 %v4094_v60, %v4093_v46  ;;  %v1533_v51 = vadd.f32 %v4092_v61, %v6244_v48  ;;  %v6271_v16 = vpop.permute.xlu0 %1213 }
 0x310   : > { %7814 = vst [vmem:[#allocation68_spill] sm:$0xff] %v6271_v16 }
 0x311   : > { %v1536_v1 = vadd.f32 %v4095_v6, %v6240_v40 }
 0x313   : > { %v6263_v62 = vpack.c.bf16 %v1536_v1, %v1533_v51  ;;  %v4096_v32 = vpop.f32.mrb[20].mxu1  ;;  %v6275_v51 = vpop.permute.xlu1 %1208 }
 0x314   : > { %v4097_v0 = vpop.f32.mrb[21].mxu1  ;;  %7815 = vst [vmem:[#allocation69_spill] sm:$0xff] %v6275_v51 }
 0x315   : > { %v4098_v5 = vadd.f32 %v4097_v0, %v4096_v32  ;;  %v4099_v54 = vpop.f32.mrb[22].mxu1 }
 0x316   : > { %v4100_v2 = vpop.f32.mrb[23].mxu1 }
 0x317   : > { %v4101_v53 = vadd.f32 %v4100_v2, %v4099_v54  ;;  %v1541_v60 = vadd.f32 %v4098_v5, %v6259_v18  ;;  %v6279_v2 = vpop.permute.xlu1 %1298  ;;  %v6281_v5 = vpop.permute.xlu0 %1303 }
 0x318   : > { %7816 = vst [vmem:[#allocation70_spill] sm:$0xff] %v6279_v2  ;;  %7817 = vst [vmem:[#allocation71_spill] sm:$0xff] %v6281_v5 }
 0x319   : > { %v1544_v46 = vadd.f32 %v4101_v53, %v6257_v52 }
 0x31b   : > { %v6273_v61 = vpack.c.bf16 %v1544_v46, %v1541_v60  ;;  %v4102_v6 = vpop.f32.mrb[24].mxu1 }
 0x31c   : > { %v4103_v1 = vpop.f32.mrb[25].mxu1 }
 0x31d   : > { %v4104_v40 = vadd.f32 %v4103_v1, %v4102_v6  ;;  %v4105_v48 = vpop.f32.mrb[26].mxu1  ;;  %v6285_v6 = vpop.permute.xlu1 %1218 }
 0x31e   : > { %v4106_v0 = vpop.f32.mrb[27].mxu1  ;;  %7818 = vst [vmem:[#allocation72_spill] sm:$0xff] %v6285_v6  ;;  %v6287_v1 = vpop.permute.xlu0 %1223 }
 0x31f   : > { %v4107_v32 = vadd.f32 %v4106_v0, %v4105_v48  ;;  %v1549_v35 = vadd.f32 %v4104_v40, %v6275_v51  ;;  %7819 = vst [vmem:[#allocation73_spill] sm:$0xff] %v6287_v1  ;;  %v1643_v51 = vmul.bf16 1056980736, %v6224_v9 }
 0x321   : > { %v1552_v54 = vadd.f32 %v4107_v32, %v6271_v16  ;;  %5054 = vtanh.bf16 %v1643_v51 }
 0x323   : > { %v6283_v53 = vpack.c.bf16 %v1552_v54, %v1549_v35  ;;  %v4108_v60 = vpop.f32.mrb[28].mxu1 }
 0x324   : > { %v4109_v46 = vpop.f32.mrb[29].mxu1 }
 0x325   : > { %v4110_v52 = vadd.f32 %v4109_v46, %v4108_v60  ;;  %v4111_v18 = vpop.f32.mrb[30].mxu1 }
 0x326   : > { %v4112_v4 = vpop.f32.mrb[31].mxu1 }
 0x327   : > { %v4113_v20 = vadd.f32 %v4112_v4, %v4111_v18  ;;  %v1557_v40 = vadd.f32 %v4110_v52, %v6285_v6  ;;  %v6296_v4 = vsub.f32 %v6194_v57, %v5852_v14  ;;  %v6300_v18 = vsub.f32 %v6208_v58, %v5848_v10 }
 0x329   : > { %v1560_v48 = vadd.f32 %v4113_v20, %v6287_v1  ;;  %v1835_v57 = vmul.f32 %v6300_v18, %v6300_v18 }
 0x32b   : > { %v6291_v0 = vpack.c.bf16 %v1560_v48, %v1557_v40  ;;  %v4114_v32 = vpop.f32.mrb[32].mxu1  ;;  %v1836_v48 = vmul.f32 %v6296_v4, %v6296_v4 }
 0x32c   : > { %v4115_v16 = vpop.f32.mrb[33].mxu1 }
 0x32d   : > { %v4116_v35 = vadd.f32 %v4115_v16, %v4114_v32  ;;  %v4117_v54 = vpop.f32.mrb[34].mxu1  ;;  %v6308_v32 = vsub.f32 %v6198_v13, %v5850_v12 }
 0x32e   : > { %v4118_v60 = vpop.f32.mrb[35].mxu1 }
 0x32f   : > { %v4119_v46 = vadd.f32 %v4118_v60, %v4117_v54  ;;  %v1565_v20 = vadd.f32 %v4116_v35, %v6188_v27  ;;  %v1644_v35 = vmul.bf16 1056980736, %v6232_v15 }
 0x331   : > { %v1568_v52 = vadd.f32 %v4119_v46, %v6202_v7 }
 0x333   : > { %v1635_v40 = vpack.c.bf16 %v1568_v52, %v1565_v20  ;;  %v4120_v16 = vpop.f32.mrb[36].mxu1  ;;  %v1838_v20 = vmul.f32 %v6308_v32, %v6308_v32  ;;  %v1837_v52 = vadd.f32 %v1836_v48, %v1835_v57 }
 0x334   : > { %v4121_v54 = vpop.f32.mrb[37].mxu1 }
 0x335   : > { %v1651_v58 = vmul.bf16 1056980736, %v1635_v40  ;;  %v4122_v60 = vadd.f32 %v4121_v54, %v4120_v16  ;;  %v4123_v1 = vpop.f32.mrb[38].mxu1  ;;  %v6319_v19 = vadd.f32 %v1838_v20, %v1837_v52  ;;  %v5055_v54 = vpop.eup %5054 }
 0x336   : > { %v4124_v46 = vpop.f32.mrb[39].mxu1  ;;  %v1675_v57 = vmul.bf16 1056980736, %v5055_v54  ;;  %v1646_v54 = vmul.bf16 1056980736, %v6255_v8 }
 0x337   : > { %5056 = vtanh.bf16 %v1651_v58  ;;  %v4125_v51 = vadd.f32 %v4124_v46, %v4123_v1  ;;  %v1573_v7 = vadd.f32 %v4122_v60, %v6192_v41  ;;  %v1645_v46 = vmul.bf16 1056980736, %v6242_v39 }
 0x338   : > { %5058 = vtanh.bf16 %v1644_v35  ;;  %vm1842_vm3 = vcmp.eq.f32.partialorder %v6319_v19, inf  ;;  %vm1844_vm4 = vcmp.eq.f32.partialorder %v6319_v19, 0.0 }
 0x339   : > { %v1576_v13 = vadd.f32 %v4125_v51, %v6210_v50 }
 0x33b   : > { %v6317_v27 = vpack.c.bf16 %v1576_v13, %v1573_v7  ;;  %v4126_v6 = vpop.f32.mrb[40].mxu1 }
 0x33c   : > { %v4127_v16 = vpop.f32.mrb[41].mxu1 }
 0x33d   : > { %v1652_v23 = vmul.bf16 1056980736, %v6317_v27  ;;  %v4128_v58 = vadd.f32 %v4127_v16, %v4126_v6  ;;  %v4129_v1 = vpop.f32.mrb[42].mxu1  ;;  %v1691_v6 = vadd.bf16 1056980736, %v1675_v57 }
 0x33e   : > { %v4130_v24 = vpop.f32.mrb[43].mxu1 }
 0x33f   : > { %5060 = vtanh.bf16 %v1652_v23  ;;  %v4131_v48 = vadd.f32 %v4130_v24, %v4129_v1  ;;  %v1581_v7 = vadd.f32 %v4128_v58, %v6200_v29 }
 0x340   : > { %5062 = vrsqrt.f32 %v6319_v19 }
 0x341   : > { %v1584_v60 = vadd.f32 %v4131_v48, %v6218_v11  ;;  %5064 = vtanh.bf16 %v1645_v46  ;;  %v1707_v46 = vmul.bf16 %v1691_v6, %v6224_v9 }
 0x342   : > { %v5057_v35 = vpop.eup %5056 }
 0x343   : > { %v6326_v51 = vpack.c.bf16 %v1584_v60, %v1581_v7  ;;  %v4132_v20 = vpop.f32.mrb[44].mxu1  ;;  %v1683_v52 = vmul.bf16 1056980736, %v5057_v35  ;;  %v5059_v16 = vpop.eup %5058 }
 0x344   : > { %v4133_v13 = vpop.f32.mrb[45].mxu1  ;;  %v1676_v7 = vmul.bf16 1056980736, %v5059_v16 }
 0x345   : > { %v1653_v50 = vmul.bf16 1056980736, %v6326_v51  ;;  %v4134_v23 = vadd.f32 %v4133_v13, %v4132_v20  ;;  %v4135_v24 = vpop.f32.mrb[46].mxu1  ;;  %v1699_v1 = vadd.bf16 1056980736, %v1683_v52 }
 0x346   : > { %v4136_v41 = vpop.f32.mrb[47].mxu1 }
 0x347   : > { %5066 = vtanh.bf16 %v1653_v50  ;;  %v4137_v58 = vadd.f32 %v4136_v41, %v4135_v24  ;;  %v1715_v48 = vmul.bf16 %v1699_v1, %v1635_v40  ;;  %v1589_v60 = vadd.f32 %v4134_v23, %v6212_v17  ;;  %v377_v1 = vld [vmem:[%s5653_s21 + $0x18] sm:$0xff] }
 0x348   : > { %5068 = vtanh.bf16 %v1646_v54  ;;  %v1692_v50 = vadd.bf16 1056980736, %v1676_v7  ;;  %v1647_v54 = vmul.bf16 1056980736, %v6263_v62  ;;  %3101 = vperm.xlu1 %4943, %v377_v1   ;;  %3106 = vperm.xlu0 %4941, %v377_v1   ;;  %v1845_v7 = vand.u32 2147483648, %v6319_v19 }
 0x349   : > { %v1592_v57 = vadd.f32 %v4137_v58, %v6216_v56  ;;  %4162 = vmatprep.subr.bf16.mxu0 %v1715_v48 }
 0x34a   : > { %v5061_v35 = vpop.eup %5060  ;;  %4163 = vmatpush3.bf16.msra.mxu0 %v1707_v46 }
 0x34b   : > { %v5063_v11 = vpop.eup %5062  ;;  %v6333_v20 = vpack.c.bf16 %v1592_v57, %v1589_v60  ;;  %v4138_v52 = vpop.f32.mrb[48].mxu1  ;;  %v1684_v13 = vmul.bf16 1056980736, %v5061_v35 }
 0x34c   : > { %v4139_v41 = vpop.f32.mrb[49].mxu1  ;;  %v5065_v40 = vpop.eup %5064  ;;  %v1841_v9 = vmul.f32 %v5063_v11, %v6319_v19  ;;  %v1708_v11 = vmul.bf16 %v1692_v50, %v6232_v15 }
 0x34d   : > { %v1654_v6 = vmul.bf16 1056980736, %v6333_v20  ;;  %v4140_v16 = vadd.f32 %v4139_v41, %v4138_v52  ;;  %v4141_v23 = vpop.f32.mrb[50].mxu1  ;;  %v1700_v24 = vadd.bf16 1056980736, %v1684_v13  ;;  %v511_v13 = vld [vmem:[%s7600_s7] sm:$0xff] }
 0x34e   : > { %v4142_v58 = vpop.f32.mrb[51].mxu1  ;;  %v1677_v60 = vmul.bf16 1056980736, %v5065_v40  ;;  %v1843_v57 = vsel %vm1842_vm3, %v6319_v19, %v1841_v9  ;;  %v7821_v19 = vmov 0  }
 0x34f   : > { %5070 = vtanh.bf16 %v1654_v6  ;;  %v4143_v48 = vadd.f32 %v4142_v58, %v4141_v23  ;;  %v1716_v46 = vmul.bf16 %v1700_v24, %v6317_v27  ;;  %v1597_v35 = vadd.f32 %v4140_v16, %v6234_v28  ;;  %4945 = vset.pattern.permute.xlu0 %v7821_v19  ;;  %v512_v23 = vld [vmem:[%s7600_s7 + $0x8] sm:$0xff] }
 0x350   : > { %5072 = vtanh.bf16 %v1647_v54  ;;  %v7820_v27 = vmov 2   ;;  %v1846_v9 = vsel %vm1844_vm4, %v1845_v7, %v1843_v57  ;;  %v1693_v6 = vadd.bf16 1056980736, %v1677_v60  ;;  %1725 = vperm.xlu0 %4945, %v511_v13  }
 0x351   : > { %v1600_v52 = vadd.f32 %v4143_v48, %v6236_v36  ;;  %4164 = vmatprep.subr.bf16.mxu0 %v1716_v46  ;;  %4944 = vset.pattern.permute.xlu1 %v7820_v27  ;;  %v1847_v60 = vadd.f32 1e-06, %v1846_v9 }
 0x352   : > { %v5067_v41 = vpop.eup %5066  ;;  %4165 = vmatpush3.bf16.msra.mxu0 %v1708_v11  ;;  %3111 = vperm.xlu1 %4944, %v377_v1   ;;  %v514_v1 = vld [vmem:[%s7600_s7 + $0x18] sm:$0xff]  ;;  %v1648_v11 = vmul.bf16 1056980736, %v6273_v61 }
 0x353   : > { %v6351_v15 = vpack.c.bf16 %v1600_v52, %v1597_v35  ;;  %v4144_v50 = vpop.f32.mrb[52].mxu1  ;;  %v1685_v40 = vmul.bf16 1056980736, %v5067_v41  ;;  %v5069_v24 = vpop.eup %5068  ;;  %v1709_v52 = vmul.bf16 %v1693_v6, %v6242_v39 }
 0x354   : > { %v4145_v16 = vpop.f32.mrb[53].mxu1  ;;  %v1678_v13 = vmul.bf16 1056980736, %v5069_v24  ;;  %1740 = vperm.xlu0 %4945, %v514_v1  }
 0x355   : > { %v1655_v54 = vmul.bf16 1056980736, %v6351_v15  ;;  %v4146_v58 = vadd.f32 %v4145_v16, %v4144_v50  ;;  %v4147_v48 = vpop.f32.mrb[54].mxu1  ;;  %v1701_v46 = vadd.bf16 1056980736, %v1685_v40  ;;  %v513_v40 = vld [vmem:[%s7600_s7 + $0x10] sm:$0xff] }
 0x356   : > { %v4148_v7 = vpop.f32.mrb[55].mxu1  ;;  %4946 = vset.pattern.permute.xlu1 %v7821_v19  ;;  %v1694_v6 = vadd.bf16 1056980736, %v1678_v13 }
 0x357   : > { %5074 = vtanh.bf16 %v1655_v54  ;;  %v4149_v57 = vadd.f32 %v4148_v7, %v4147_v48  ;;  %v1717_v35 = vmul.bf16 %v1701_v46, %v6326_v51  ;;  %1730 = vperm.xlu1 %4946, %v512_v23   ;;  %v1605_v41 = vadd.f32 %v4146_v58, %v6253_v49 }
 0x358   : > { %5076 = vtanh.bf16 %v1648_v11  ;;  %v1848_v51 = vmul.f32 1e-12, %v1847_v60  ;;  %4947 = vset.pattern.permute.xlu0 %v7820_v27  ;;  %v1649_v7 = vmul.bf16 1056980736, %v6283_v53 }
 0x359   : > { %v1608_v50 = vadd.f32 %v4149_v57, %v6249_v55  ;;  %4166 = vmatprep.subr.bf16.mxu0 %v1717_v35 }
 0x35a   : > { %v5071_v16 = vpop.eup %5070  ;;  %4167 = vmatpush3.bf16.msra.mxu0 %v1709_v52  ;;  %v1849_v57 = vmax.f32 %v1846_v9, %v1848_v51  ;;  %v1710_v52 = vmul.bf16 %v1694_v6, %v6255_v8  ;;  %v1650_v6 = vmul.bf16 1056980736, %v6291_v0 }
 0x35b   : > { %v6370_v54 = vpack.c.bf16 %v1608_v50, %v1605_v41  ;;  %v4150_v19 = vpop.f32.mrb[56].mxu1  ;;  %v1686_v39 = vmul.bf16 1056980736, %v5071_v16  ;;  %1735 = vperm.xlu1 %4946, %v513_v40   ;;  %v5073_v24 = vpop.eup %5072 }
 0x35c   : > { %v4151_v23 = vpop.f32.mrb[57].mxu1  ;;  %v1679_v13 = vmul.bf16 1056980736, %v5073_v24 }
 0x35d   : > { %v1656_v58 = vmul.bf16 1056980736, %v6370_v54  ;;  %v4152_v48 = vadd.f32 %v4151_v23, %v4150_v19  ;;  %v4153_v46 = vpop.f32.mrb[58].mxu1  ;;  %v1702_v1 = vadd.bf16 1056980736, %v1686_v39 }
 0x35e   : > { %v4154_v11 = vpop.f32.mrb[59].mxu1  ;;  %v1695_v9 = vadd.bf16 1056980736, %v1679_v13 }
 0x35f   : > { %5078 = vtanh.bf16 %v1656_v58  ;;  %v4155_v60 = vadd.f32 %v4154_v11, %v4153_v46  ;;  %v1718_v35 = vmul.bf16 %v1702_v1, %v6333_v20  ;;  %v1613_v41 = vadd.f32 %v4152_v48, %v6267_v59 }
 0x360   : > { %5080 = vtanh.bf16 %v1649_v7  ;;  %v1711_v1 = vmul.bf16 %v1695_v9, %v6263_v62 }
 0x361   : > { %v1616_v27 = vadd.f32 %v4155_v60, %v6265_v43  ;;  %4168 = vmatprep.subr.bf16.mxu0 %v1718_v35  ;;  %5082 = vrcp.f32 %v1849_v57 }
 0x362   : > { %v5075_v50 = vpop.eup %5074  ;;  %4169 = vmatpush3.bf16.msra.mxu0 %v1710_v52 }
 0x363   : > { %v1641_v40 = vpack.c.bf16 %v1616_v27, %v1613_v41  ;;  %v4156_v16 = vpop.f32.mrb[60].mxu1  ;;  %v1687_v19 = vmul.bf16 1056980736, %v5075_v50  ;;  %v5077_v39 = vpop.eup %5076 }
 0x364   : > { %v4157_v51 = vpop.f32.mrb[61].mxu1  ;;  %v1680_v7 = vmul.bf16 1056980736, %v5077_v39 }
 0x365   : > { %v1657_v23 = vmul.bf16 1056980736, %v1641_v40  ;;  %v4158_v20 = vadd.f32 %v4157_v51, %v4156_v16  ;;  %v4159_v58 = vpop.f32.mrb[62].mxu1  ;;  %v1703_v8 = vadd.bf16 1056980736, %v1687_v19 }
 0x366   : > { %v4160_v24 = vpop.f32.mrb[63].mxu1  ;;  %v1696_v13 = vadd.bf16 1056980736, %v1680_v7 }
 0x367   : > { %5084 = vtanh.bf16 %v1657_v23  ;;  %v4161_v48 = vadd.f32 %v4160_v24, %v4159_v58  ;;  %v1719_v46 = vmul.bf16 %v1703_v8, %v6351_v15  ;;  %v1621_v11 = vadd.f32 %v4158_v20, %v6279_v2 }
 0x368   : > { %5086 = vtanh.bf16 %v1650_v6  ;;  %v1712_v19 = vmul.bf16 %v1696_v13, %v6273_v61 }
 0x369   : > { %v1624_v57 = vadd.f32 %v4161_v48, %v6281_v5  ;;  %4170 = vmatprep.subr.bf16.mxu0 %v1719_v46 }
 0x36a   : > { %v5079_v60 = vpop.eup %5078  ;;  %4171 = vmatpush3.bf16.msra.mxu0 %v1711_v1 }
 0x36b   : > { %v1642_v35 = vpack.c.bf16 %v1624_v57, %v1621_v11  ;;  %v1688_v52 = vmul.bf16 1056980736, %v5079_v60  ;;  %v5081_v41 = vpop.eup %5080 }
 0x36c   : > { %v5083_v27 = vpop.eup %5082  ;;  %v1681_v9 = vmul.bf16 1056980736, %v5081_v41 }
 0x36d   : > { %v1658_v50 = vmul.bf16 1056980736, %v1642_v35  ;;  %v1704_v16 = vadd.bf16 1056980736, %v1688_v52  ;;  %v1852_v62 = vmul.f32 %v5083_v27, %v6300_v18  ;;  %v1854_v51 = vmul.f32 %v5083_v27, %v6308_v32 }
 0x36e   : > { %v1697_v58 = vadd.bf16 1056980736, %v1681_v9  ;;  %v1853_v61 = vmul.f32 %v5083_v27, %v6296_v4 }
 0x36f   : > { %5088 = vtanh.bf16 %v1658_v50  ;;  %v1720_v15 = vmul.bf16 %v1704_v16, %v6370_v54  ;;  %v1862_v20 = vmul.f32 %v1852_v62, %v1852_v62  ;;  %v1863_v8 = vmul.f32 %v1854_v51, %v1854_v51  ;;  %v5012_v16 = vld [vmem:[%s7599_s6] ss:$8 sps:$4 sm:$0xff]  }
 0x370   : > { %v1713_v46 = vmul.bf16 %v1697_v58, %v6283_v53  ;;  %v1858_v7 = vmul.f32 1.0925485, %v1852_v62  ;;  %v1855_v52 = vmul.f32 0.48860252, %v1852_v62  ;;  %v1856_v13 = vmul.f32 0.48860252, %v1853_v61 }
 0x371   : > { %4172 = vmatprep.subr.bf16.mxu0 %v1720_v15  ;;  %v1864_v1 = vadd.f32 %v1863_v8, %v1862_v20  ;;  %v1861_v41 = vmul.f32 %v1853_v61, %v1853_v61  ;;  %v1857_v4 = vmul.f32 0.48860252, %v1854_v51  ;;  %v5017_v58 = vld [vmem:[%s7599_s6 + $0x10] ss:$8 sps:$4 sm:$0xff]  }
 0x372   : > { %v5085_v39 = vpop.eup %5084  ;;  %4173 = vmatpush3.bf16.msra.mxu0 %v1712_v19  ;;  %v1888_v53 = vpack.c.bf16 %v1856_v13, %v1855_v52  ;;  %v1859_v27 = vmul.f32 %v1858_v7, %v1854_v51  ;;  %v5015_v19 = vld [vmem:[%s7599_s6 + $0x14] ss:$8 sps:$4 sm:$0xff]   ;;  %v1860_v62 = vmul.f32 %v1858_v7, %v1853_v61  ;;  %v5299_v7 = vld [vmem:[%s7595_s2 + $0x48] sm:$0xff]   ;;  %v6452_v52 = vpop.permute.xlu1 %2461 }
 0x373   : > { %v1689_v23 = vmul.bf16 1056980736, %v5085_v39  ;;  %v5087_v6 = vpop.eup %5086  ;;  %v1865_v57 = vmul.f32 0.5, %v1864_v1  ;;  %v1870_v39 = vsub.f32 %v1863_v8, %v1862_v20  ;;  %v5291_v20 = vld [vmem:[%s7595_s2 + $0x8] sm:$0xff]   ;;  %v5293_v8 = vld [vmem:[%s7595_s2 + $0x18] sm:$0xff]  }
 0x374   : > { %v1682_v54 = vmul.bf16 1056980736, %v5087_v6  ;;  %v5295_v1 = vld [vmem:[%s7595_s2 + $0x28] sm:$0xff]  }
 0x375   : > { %v1705_v24 = vadd.bf16 1056980736, %v1689_v23  ;;  %v1866_v15 = vsub.f32 %v1861_v41, %v1865_v57  ;;  %v5301_v57 = vld [vmem:[%s7595_s2 + $0x58] sm:$0xff]   ;;  %v5303_v13 = vld [vmem:[%s7595_s2 + $0x68] sm:$0xff]   ;;  %v5304_v41 = vld [vmem:[%s7595_s2 + $0x70] sm:$0xff]  }
 0x376   : > { %v1698_v11 = vadd.bf16 1056980736, %v1682_v54  ;;  %v5294_v54 = vld [vmem:[%s7595_s2 + $0x20] sm:$0xff]  }
 0x377   : > { %v1721_v48 = vmul.bf16 %v1705_v24, %v1641_v40  ;;  %v1867_v9 = vmul.f32 0.63078314, %v1866_v15  ;;  %v1871_v24 = vmul.f32 0.54627424, %v1870_v39 }
 0x378   : > { %v1714_v40 = vmul.bf16 %v1698_v11, %v6291_v0  ;;  %v1868_v0 = vmul.f32 1.0925485, %v1853_v61  ;;  %v5296_v61 = vld [vmem:[%s7595_s2 + $0x30] sm:$0xff]  }
 0x379   : > { %4174 = vmatprep.subr.bf16.mxu0 %v1721_v48  ;;  %v1890_v23 = vpack.c.bf16 %v1867_v9, %v1860_v62  ;;  %v5300_v11 = vld [vmem:[%s7595_s2 + $0x50] sm:$0xff]  }
 0x37a   : > { %v5089_v18 = vpop.eup %5088  ;;  %4175 = vmatpush3.bf16.msra.mxu0 %v1713_v46  ;;  %v1869_v6 = vmul.f32 %v1868_v0, %v1854_v51  ;;  %v5290_v46 = vld [vmem:[%s7595_s2] sm:$0xff]   ;;  %v5292_v51 = vld [vmem:[%s7595_s2 + $0x10] sm:$0xff]  }
 0x37b   : > { %v1690_v32 = vmul.bf16 1056980736, %v5089_v18  ;;  %v5297_v18 = vld [vmem:[%s7595_s2 + $0x38] sm:$0xff]  }
 0x37c   : > { %v1891_v48 = vpack.c.bf16 %v1871_v24, %v1869_v6 }
 0x37d   : > { %v1706_v60 = vadd.bf16 1056980736, %v1690_v32  ;;  %v5298_v32 = vld [vmem:[%s7595_s2 + $0x40] sm:$0xff]  }
 0x37f   : > { %v1722_v50 = vmul.bf16 %v1706_v60, %v1642_v35  ;;  %v1889_v35 = vpack.c.bf16 %v1859_v27, %v1857_v4  ;;  %v5302_v60 = vld [vmem:[%s7595_s2 + $0x60] sm:$0xff]  }
 0x381   : > { %4176 = vmatprep.subr.bf16.mxu0 %v1722_v50  ;;  %v6462_v50 = vpop.permute.xlu0 %2466 }
 0x382   : > { %4177 = vmatpush3.bf16.msra.mxu0 %v1714_v40  ;;  %v6464_v40 = vpop.permute.xlu1 %2471 }
 0x383   : > { %4710 = vmatprep.subr.bf16.mxu0 %v1888_v53 }
 0x385   : > { %1796 = vmatmul.mubr.bf16.vlgmr.msra.gmra.mrb[32].mxu0 %v5012_v16 }
 0x386   : > { %4711 = vmatpush3.bf16.msra.mxu0 %v1888_v53  ;;  %1803 = vmatprep.mubr.bf16.mxu0 %v5015_v19  ;;  %v5305_v53 = vld [vmem:[%s7595_s2 + $0x78] sm:$0xff]   ;;  %v5306_v19 = vld [vmem:[%s7597_s4 + $0x4] ss:$8 sps:$4 sm:$0xff]  }
 0x387   : > { %4712 = vmatprep.subr.bf16.mxu0 %v1889_v35 }
 0x38a   : > { %4713 = vmatpush3.bf16.msra.mxu0 %v1889_v35 }
 0x38b   : > { %4714 = vmatprep.subr.bf16.mxu0 %v1890_v23 }
 0x38d   : > { %1804 = vmatmul.mubr.bf16.gmra.mrb[36].mxu0 %v5017_v58 }
 0x38e   : > { %4715 = vmatpush3.bf16.msra.mxu0 %v1890_v23  ;;  %4718 = vmatprep.mubr.msk.bf16.mxu0 %vm840_vm0, %v5290_v46 }
 0x38f   : > { %4716 = vmatprep.subr.bf16.mxu0 %v1891_v48 }
 0x392   : > { %4717 = vmatpush3.bf16.msra.mxu0 %v1891_v48 }
 0x395   : > { %4719 = vmatmul.mubr.msk.bf16.vlgmr.msra.gmra.mrb[40].mxu0 %vm840_vm0, %v5291_v20 }
 0x396   : > { %4722 = vmatprep.mubr.msk.bf16.mxu0 %vm840_vm0, %v5292_v51 }
 0x39d   : > { %4723 = vmatmul.mubr.msk.bf16.gmra.mrb[44].mxu0 %vm840_vm0, %v5293_v8 }
 0x39e   : > { %4726 = vmatprep.mubr.msk.bf16.mxu0 %vm840_vm0, %v5294_v54 }
 0x3a5   : > { %4727 = vmatmul.mubr.msk.bf16.gmra.mrb[48].mxu0 %vm840_vm0, %v5295_v1 }
 0x3a6   : > { %4730 = vmatprep.mubr.msk.bf16.mxu0 %vm840_vm0, %v5296_v61 }
 0x3ad   : > { %4731 = vmatmul.mubr.msk.bf16.gmra.mrb[52].mxu0 %vm840_vm0, %v5297_v18 }
 0x3ae   : > { %4734 = vmatprep.mubr.msk.bf16.mxu0 %vm840_vm0, %v5298_v32 }
 0x3b5   : > { %4735 = vmatmul.mubr.msk.bf16.gmra.mrb[56].mxu0 %vm840_vm0, %v5299_v7 }
 0x3b6   : > { %4738 = vmatprep.mubr.msk.bf16.mxu0 %vm840_vm0, %v5300_v11 }
 0x3bd   : > { %4739 = vmatmul.mubr.msk.bf16.gmra.mrb[60].mxu0 %vm840_vm0, %v5301_v57 }
 0x3be   : > { %4742 = vmatprep.mubr.msk.bf16.mxu0 %vm840_vm0, %v5302_v60 }
 0x3c5   : > { %4743 = vmatmul.mubr.msk.bf16.gmra.mrb[64].mxu0 %vm840_vm0, %v5303_v13 }
 0x3c6   : > { %4746 = vmatprep.mubr.msk.bf16.mxu0 %vm840_vm0, %v5304_v41 }
 0x3c7   : > { %v3102_v16 = vpop.permute.xlu1 %3101  ;;  %v3107_v4 = vpop.permute.xlu0 %3106 }
 0x3c8   : > { %v6471_v27 = vsub.f32 %v3102_v16, %v5848_v10  ;;  %v6474_v15 = vsub.f32 %v3107_v4, %v5852_v14 }
 0x3ca   : > { %v3115_v62 = vmul.f32 %v6471_v27, %v6471_v27  ;;  %v3116_v35 = vmul.f32 %v6474_v15, %v6474_v15 }
 0x3cc   : > { %v3117_v9 = vadd.f32 %v3116_v35, %v3115_v62 }
 0x3cd   : > { %4747 = vmatmul.mubr.msk.bf16.gmra.mrb[68].mxu0 %vm840_vm0, %v5305_v53 }
 0x3ce   : > { %2181 = vmatprep.mubr.bf16.mxu0 %v5306_v19 }
 0x3cf   : > { %v6492_v7 = vpop.permute.xlu0 %1725 }
 0x3d0   : > { %7822 = vst [vmem:[#allocation74_spill] sm:$0xff] %v6492_v7 }
 0x3d1   : > { %v3112_v0 = vpop.permute.xlu1 %3111 }
 0x3d2   : > { %v3114_v39 = vsub.f32 %v3112_v0, %v5850_v12 }
 0x3d4   : > { %v3118_v23 = vmul.f32 %v3114_v39, %v3114_v39 }
 0x3d6   : > { %v3119_v58 = vadd.f32 %v3118_v23, %v3117_v9  ;;  %v6494_v13 = vpop.permute.xlu1 %1730 }
 0x3d7   : > { %7823 = vst [vmem:[#allocation75_spill] sm:$0xff] %v6494_v13 }
 0x3d8   : > { %5090 = vrsqrt.f32 %v3119_v58  ;;  %vm3122_vm5 = vcmp.eq.f32.partialorder %v3119_v58, inf  ;;  %v3125_v24 = vand.u32 2147483648, %v3119_v58  ;;  %vm3124_vm6 = vcmp.eq.f32.partialorder %v3119_v58, 0.0 }
 0x3da   : > { %v6502_v62 = vpop.permute.xlu1 %1735 }
 0x3db   : > { %7824 = vst [vmem:[#allocation76_spill] sm:$0xff] %v6502_v62 }
 0x3e2   : > { %v5091_v6 = vpop.eup %5090 }
 0x3e3   : > { %v3121_v48 = vmul.f32 %v5091_v6, %v3119_v58 }
 0x3e5   : > { %v3123_v46 = vsel %vm3122_vm5, %v3119_v58, %v3121_v48 }
 0x3e6   : > { %v3126_v20 = vsel %vm3124_vm6, %v3125_v24, %v3123_v46 }
 0x3e7   : > { %v3127_v51 = vadd.f32 1e-06, %v3126_v20 }
 0x3e9   : > { %v3128_v8 = vmul.f32 1e-12, %v3127_v51 }
 0x3eb   : > { %v3129_v54 = vmax.f32 %v3126_v20, %v3128_v8 }
 0x3ed   : > { %5092 = vrcp.f32 %v3129_v54 }
 0x3f7   : > { %v6485_v1 = vpop.eup %5092 }
 0x3f8   : > { %v6488_v61 = vmul.f32 %v6485_v1, %v3114_v39  ;;  %v6504_v39 = vpop.permute.xlu0 %1740 }
 0x3f9   : > { %7825 = vst [vmem:[#allocation77_spill] sm:$0xff] %v6504_v39 }
 0x458   : > { %v4178_v18 = vpop.f32.mrb[32].mxu0 }
 0x459   : > { %v4179_v32 = vpop.f32.mrb[33].mxu0 }
 0x45a   : > { %v4180_v11 = vadd.f32 %v4179_v32, %v4178_v18  ;;  %v4181_v57 = vpop.f32.mrb[34].mxu0 }
 0x45b   : > { %v4182_v60 = vpop.f32.mrb[35].mxu0 }
 0x45c   : > { %v4183_v41 = vadd.f32 %v4182_v60, %v4181_v57  ;;  %v1798_v53 = vadd.f32 %v4180_v11, %v6492_v7 }
 0x45e   : > { %1812 = vst [vmem:[%s6497_s22] sm:$0xff] %v1798_v53  ;;  %v1801_v16 = vadd.f32 %v4183_v41, %v6494_v13 }
 0x460   : > { %3964 = vst [vmem:[%s6497_s22 + $0x20] sm:$0xff] %v1801_v16  ;;  %v4184_v4 = vpop.f32.mrb[36].mxu0 }
 0x461   : > { %v4185_v19 = vpop.f32.mrb[37].mxu0 }
 0x462   : > { %v4186_v35 = vadd.f32 %v4185_v19, %v4184_v4  ;;  %v4187_v9 = vpop.f32.mrb[38].mxu0 }
 0x463   : > { %v4188_v0 = vpop.f32.mrb[39].mxu0 }
 0x464   : > { %v1806_v23 = vadd.f32 %v4186_v35, %v6502_v62  ;;  %v4189_v58 = vadd.f32 %v4188_v0, %v4187_v9 }
 0x466   : > { %3965 = vst [vmem:[%s6497_s22 + $0x40] sm:$0xff] %v1806_v23  ;;  %v1809_v6 = vadd.f32 %v4189_v58, %v6504_v39 }
 0x468   : > { %3966 = vst [vmem:[%s6497_s22 + $0x60] sm:$0xff] %v1809_v6  ;;  %v4720_v24 = vpop.f32.mrb[40].mxu0 }
 0x469   : > { %v1926_v48 = vpop.f32.mrb[41].mxu0  ;;  %v1935_v20 = vadd.f32 %v4720_v24, %v5950_v26 }
 0x46a   : > { %v4721_v46 = vpop.f32.mrb[42].mxu0  ;;  %v1927_v54 = vadd.f32 %v1926_v48, %v5940_v21 }
 0x46b   : > { %v1938_v51 = vadd.f32 %v4721_v46, %v5948_v25  ;;  %v1929_v8 = vpop.f32.mrb[43].mxu0  ;;  %v7840_v25 = vld [vmem:[#allocation35_spill] sm:$0xff] }
 0x46c   : > { %v1930_v18 = vadd.f32 %v1929_v8, %v5942_v22 }
 0x46d   : > { %v6514_v32 = vpack.c.bf16 %v1938_v51, %v1935_v20 }
 0x46e   : > { %v6516_v11 = vpack.c.bf16 %v1930_v18, %v1927_v54 }
 0x470   : > { %v4724_v57 = vpop.f32.mrb[44].mxu0 }
 0x471   : > { %v1942_v60 = vpop.f32.mrb[45].mxu0  ;;  %v1951_v53 = vadd.f32 %v4724_v57, %v5969_v34 }
 0x472   : > { %v4725_v41 = vpop.f32.mrb[46].mxu0  ;;  %v1943_v19 = vadd.f32 %v1942_v60, %v5961_v31 }
 0x473   : > { %v1954_v16 = vadd.f32 %v4725_v41, %v5967_v33  ;;  %v1945_v4 = vpop.f32.mrb[47].mxu0 }
 0x474   : > { %v1946_v35 = vadd.f32 %v1945_v4, %v5959_v30 }
 0x475   : > { %v6522_v9 = vpack.c.bf16 %v1954_v16, %v1951_v53 }
 0x476   : > { %v6524_v0 = vpack.c.bf16 %v1946_v35, %v1943_v19 }
 0x478   : > { %v4728_v23 = vpop.f32.mrb[48].mxu0 }
 0x479   : > { %v1958_v58 = vpop.f32.mrb[49].mxu0  ;;  %v1967_v24 = vadd.f32 %v4728_v23, %v5985_v44  ;;  %v7837_v44 = vld [vmem:[#allocation26_spill] sm:$0xff] }
 0x47a   : > { %v4729_v6 = vpop.f32.mrb[50].mxu0  ;;  %v1959_v20 = vadd.f32 %v1958_v58, %v5977_v38 }
 0x47b   : > { %v1970_v48 = vadd.f32 %v4729_v6, %v5983_v42  ;;  %v1961_v46 = vpop.f32.mrb[51].mxu0  ;;  %v2069_v6 = vmul.bf16 1056980736, %v6516_v11 }
 0x47c   : > { %v1962_v51 = vadd.f32 %v1961_v46, %v5975_v37  ;;  %v7826_v46 = vld [vmem:[#allocation15_spill] sm:$0xff] }
 0x47d   : > { %v6530_v8 = vpack.c.bf16 %v1970_v48, %v1967_v24  ;;  %5094 = vtanh.bf16 %v2069_v6  ;;  %v2072_v6 = vmul.bf16 1056980736, %v6522_v9 }
 0x47e   : > { %v6532_v54 = vpack.c.bf16 %v1962_v51, %v1959_v20  ;;  %v7827_v51 = vld [vmem:[#allocation14_spill] sm:$0xff] }
 0x47f   : > { %v2074_v38 = vmul.bf16 1056980736, %v6530_v8 }
 0x480   : > { %v4732_v18 = vpop.f32.mrb[52].mxu0 }
 0x481   : > { %v1974_v57 = vpop.f32.mrb[53].mxu0  ;;  %v1983_v41 = vadd.f32 %v4732_v18, %v6025_v47 }
 0x482   : > { %v4733_v60 = vpop.f32.mrb[54].mxu0  ;;  %v1975_v4 = vadd.f32 %v1974_v57, %v6007_v3  ;;  %v7829_v3 = vld [vmem:[#allocation11_spill] sm:$0xff] }
 0x483   : > { %v1986_v53 = vadd.f32 %v4733_v60, %v6023_v45  ;;  %v1977_v16 = vpop.f32.mrb[55].mxu0  ;;  %v2070_v60 = vmul.bf16 1056980736, %v6514_v32  ;;  %v7828_v45 = vld [vmem:[#allocation10_spill] sm:$0xff] }
 0x484   : > { %v1978_v19 = vadd.f32 %v1977_v16, %v6003_v63 }
 0x485   : > { %v6538_v35 = vpack.c.bf16 %v1986_v53, %v1983_v41  ;;  %5096 = vtanh.bf16 %v2070_v60 }
 0x486   : > { %v6540_v23 = vpack.c.bf16 %v1978_v19, %v1975_v4 }
 0x488   : > { %v4736_v58 = vpop.f32.mrb[56].mxu0 }
 0x489   : > { %v1990_v24 = vpop.f32.mrb[57].mxu0  ;;  %v1999_v20 = vadd.f32 %v4736_v58, %v7826_v46  ;;  %v2071_v58 = vmul.bf16 1056980736, %v6524_v0  ;;  %v7830_v46 = vld [vmem:[#allocation23_spill] sm:$0xff] }
 0x48a   : > { %v4737_v48 = vpop.f32.mrb[58].mxu0  ;;  %v1991_v57 = vadd.f32 %v1990_v24, %v7828_v45  ;;  %v7831_v24 = vld [vmem:[#allocation22_spill] sm:$0xff] }
 0x48b   : > { %v2002_v18 = vadd.f32 %v4737_v48, %v7827_v51  ;;  %v1993_v47 = vpop.f32.mrb[59].mxu0 }
 0x48c   : > { %v1994_v16 = vadd.f32 %v1993_v47, %v7829_v3 }
 0x48d   : > { %v6548_v41 = vpack.c.bf16 %v2002_v18, %v1999_v20  ;;  %v7832_v20 = vld [vmem:[#allocation19_spill] sm:$0xff] }
 0x48e   : > { %v2061_v53 = vpack.c.bf16 %v1994_v16, %v1991_v57  ;;  %v7833_v57 = vld [vmem:[#allocation18_spill] sm:$0xff] }
 0x48f   : > { %v2078_v4 = vmul.bf16 1056980736, %v6548_v41 }
 0x490   : > { %v2077_v19 = vmul.bf16 1056980736, %v2061_v53  ;;  %v4740_v63 = vpop.f32.mrb[60].mxu0 }
 0x491   : > { %5098 = vtanh.bf16 %v2078_v4  ;;  %v2006_v48 = vpop.f32.mrb[61].mxu0  ;;  %v2015_v37 = vadd.f32 %v4740_v63, %v7830_v46 }
 0x492   : > { %5100 = vtanh.bf16 %v2077_v19  ;;  %v4741_v51 = vpop.f32.mrb[62].mxu0  ;;  %v2007_v18 = vadd.f32 %v2006_v48, %v7832_v20  ;;  %v5095_v19 = vpop.eup %5094 }
 0x493   : > { %v2018_v45 = vadd.f32 %v4741_v51, %v7831_v24  ;;  %v2009_v47 = vpop.f32.mrb[63].mxu0  ;;  %5102 = vtanh.bf16 %v2071_v58  ;;  %v2073_v51 = vmul.bf16 1056980736, %v6532_v54  ;;  %v5097_v20 = vpop.eup %5096  ;;  %v7834_v58 = vld [vmem:[#allocation31_spill] sm:$0xff] }
 0x494   : > { %v2010_v16 = vadd.f32 %v2009_v47, %v7833_v57  ;;  %5104 = vtanh.bf16 %v2072_v6  ;;  %v2101_v47 = vmul.bf16 1056980736, %v5095_v19  ;;  %v7836_v6 = vld [vmem:[#allocation27_spill] sm:$0xff]  ;;  %v2102_v33 = vmul.bf16 1056980736, %v5097_v20 }
 0x495   : > { %v6557_v60 = vpack.c.bf16 %v2018_v45, %v2015_v37  ;;  %v7835_v45 = vld [vmem:[#allocation30_spill] sm:$0xff] }
 0x496   : > { %v6559_v3 = vpack.c.bf16 %v2010_v16, %v2007_v18 }
 0x497   : > { %v2080_v4 = vmul.bf16 1056980736, %v6557_v60 }
 0x498   : > { %v2079_v63 = vmul.bf16 1056980736, %v6559_v3  ;;  %v4744_v46 = vpop.f32.mrb[64].mxu0 }
 0x499   : > { %5106 = vtanh.bf16 %v2080_v4  ;;  %v2022_v24 = vpop.f32.mrb[65].mxu0  ;;  %v2031_v37 = vadd.f32 %v4744_v46, %v7834_v58  ;;  %v2117_v46 = vadd.bf16 1056980736, %v2101_v47  ;;  %v7838_v47 = vld [vmem:[#allocation39_spill] sm:$0xff] }
 0x49a   : > { %5108 = vtanh.bf16 %v2079_v63  ;;  %v4745_v48 = vpop.f32.mrb[66].mxu0  ;;  %v2023_v42 = vadd.f32 %v2022_v24, %v7836_v6 }
 0x49b   : > { %v2034_v18 = vadd.f32 %v4745_v48, %v7835_v45  ;;  %v2025_v16 = vpop.f32.mrb[67].mxu0  ;;  %5110 = vtanh.bf16 %v2073_v51 }
 0x49c   : > { %v5099_v57 = vpop.eup %5098  ;;  %v2026_v30 = vadd.f32 %v2025_v16, %v7837_v44  ;;  %5112 = vtanh.bf16 %v2074_v38  ;;  %v2075_v16 = vmul.bf16 1056980736, %v6540_v23 }
 0x49d   : > { %v5101_v31 = vpop.eup %5100  ;;  %v6569_v4 = vpack.c.bf16 %v2034_v18, %v2031_v37  ;;  %v2110_v63 = vmul.bf16 1056980736, %v5099_v57  ;;  %v2118_v37 = vadd.bf16 1056980736, %v2102_v33 }
 0x49e   : > { %v6571_v34 = vpack.c.bf16 %v2026_v30, %v2023_v42  ;;  %v2109_v19 = vmul.bf16 1056980736, %v5101_v31  ;;  %v5103_v58 = vpop.eup %5102  ;;  %v2133_v31 = vmul.bf16 %v2117_v46, %v6516_v11 }
 0x49f   : > { %v2082_v48 = vmul.bf16 1056980736, %v6569_v4  ;;  %v2126_v45 = vadd.bf16 1056980736, %v2110_v63  ;;  %v5105_v42 = vpop.eup %5104  ;;  %v2103_v57 = vmul.bf16 1056980736, %v5103_v58  ;;  %v2134_v46 = vmul.bf16 %v2118_v37, %v6514_v32 }
 0x4a0   : > { %v2081_v22 = vmul.bf16 1056980736, %v6571_v34  ;;  %v4748_v24 = vpop.f32.mrb[68].mxu0  ;;  %v2125_v6 = vadd.bf16 1056980736, %v2109_v19  ;;  %v7839_v63 = vld [vmem:[#allocation38_spill] sm:$0xff] }
 0x4a1   : > { %5114 = vtanh.bf16 %v2082_v48  ;;  %v2038_v51 = vpop.f32.mrb[69].mxu0  ;;  %v2047_v18 = vadd.f32 %v4748_v24, %v7838_v47  ;;  %v2076_v19 = vmul.bf16 1056980736, %v6538_v35  ;;  %v7841_v48 = vld [vmem:[#allocation34_spill] sm:$0xff]  ;;  %v2104_v24 = vmul.bf16 1056980736, %v5105_v42 }
 0x4a2   : > { %5116 = vtanh.bf16 %v2081_v22  ;;  %v4749_v20 = vpop.f32.mrb[70].mxu0  ;;  %v2141_v30 = vmul.bf16 %v2125_v6, %v2061_v53  ;;  %v2039_v26 = vadd.f32 %v2038_v51, %v7840_v25  ;;  %v2142_v22 = vmul.bf16 %v2126_v45, %v6548_v41 }
 0x4a3   : > { %v2050_v38 = vadd.f32 %v4749_v20, %v7839_v63  ;;  %v2041_v44 = vpop.f32.mrb[71].mxu0  ;;  %5118 = vtanh.bf16 %v2075_v16 }
 0x4a4   : > { %v5107_v21 = vpop.eup %5106  ;;  %v2042_v39 = vadd.f32 %v2041_v44, %v7841_v48  ;;  %4210 = vmatprep.subr.bf16.mxu0 %v2141_v30  ;;  %4830 = vmatprep.subr.bf16.mxu1 %v2141_v30  ;;  %v2119_v44 = vadd.bf16 1056980736, %v2103_v57  ;;  %5120 = vtanh.bf16 %v2076_v19 }
 0x4a5   : > { %v5109_v33 = vpop.eup %5108  ;;  %v6583_v11 = vpack.c.bf16 %v2050_v38, %v2047_v18  ;;  %4211 = vmatpush3.bf16.msra.mxu0 %v2133_v31  ;;  %4838 = vmatpush3.bf16.msra.mxu1 %v2133_v31  ;;  %v2112_v53 = vmul.bf16 1056980736, %v5107_v21 }
 0x4a6   : > { %v6585_v58 = vpack.c.bf16 %v2042_v39, %v2039_v26  ;;  %4212 = vmatprep.subr.bf16.mxu0 %v2142_v22  ;;  %4831 = vmatprep.subr.bf16.mxu1 %v2142_v22  ;;  %v2111_v6 = vmul.bf16 1056980736, %v5109_v33  ;;  %v5111_v20 = vpop.eup %5110  ;;  %v2120_v39 = vadd.bf16 1056980736, %v2104_v24  ;;  %v2135_v32 = vmul.bf16 %v2119_v44, %v6524_v0 }
 0x4a7   : > { %v2084_v51 = vmul.bf16 1056980736, %v6583_v11  ;;  %v2128_v16 = vadd.bf16 1056980736, %v2112_v53  ;;  %v5113_v26 = vpop.eup %5112  ;;  %v2105_v37 = vmul.bf16 1056980736, %v5111_v20 }
 0x4a8   : > { %v2083_v41 = vmul.bf16 1056980736, %v6585_v58  ;;  %v2127_v45 = vadd.bf16 1056980736, %v2111_v6  ;;  %v2136_v38 = vmul.bf16 %v2120_v39, %v6522_v9 }
 0x4a9   : > { %5122 = vtanh.bf16 %v2084_v51  ;;  %4213 = vmatpush3.bf16.msra.mxu0 %v2134_v46  ;;  %4839 = vmatpush3.bf16.msra.mxu1 %v2134_v46  ;;  %v2144_v42 = vmul.bf16 %v2128_v16, %v6557_v60  ;;  %v2121_v19 = vadd.bf16 1056980736, %v2105_v37  ;;  %v5307_v37 = vld [vmem:[%s7597_s4] ss:$8 sps:$4 sm:$0xff]  }
 0x4aa   : > { %5124 = vtanh.bf16 %v2083_v41  ;;  %v2143_v21 = vmul.bf16 %v2127_v45, %v6559_v3  ;;  %v2106_v3 = vmul.bf16 1056980736, %v5113_v26 }
 0x4ab   : > { %v2137_v46 = vmul.bf16 %v2121_v19, %v6532_v54  ;;  %v5319_v19 = vld [vmem:[%s7597_s4 + $0x30] ss:$8 sps:$4 sm:$0xff]  }
 0x4ac   : > { %v5115_v30 = vpop.eup %5114  ;;  %4214 = vmatprep.subr.bf16.mxu0 %v2143_v21  ;;  %4832 = vmatprep.subr.bf16.mxu1 %v2143_v21  ;;  %v2122_v60 = vadd.bf16 1056980736, %v2106_v3  ;;  %v5318_v3 = vld [vmem:[%s7597_s4 + $0xc4] ss:$8 sps:$4 sm:$0xff]  }
 0x4ad   : > { %v5117_v31 = vpop.eup %5116  ;;  %4215 = vmatpush3.bf16.msra.mxu0 %v2135_v32  ;;  %4840 = vmatpush3.bf16.msra.mxu1 %v2135_v32  ;;  %v2114_v57 = vmul.bf16 1056980736, %v5115_v30  ;;  %v5312_v30 = vld [vmem:[%s7597_s4 + $0xa0] ss:$8 sps:$4 sm:$0xff]  }
 0x4ae   : > { %4216 = vmatprep.subr.bf16.mxu0 %v2144_v42  ;;  %4833 = vmatprep.subr.bf16.mxu1 %v2144_v42  ;;  %v2113_v18 = vmul.bf16 1056980736, %v5117_v31  ;;  %v5119_v22 = vpop.eup %5118  ;;  %v2138_v45 = vmul.bf16 %v2122_v60, %v6530_v8  ;;  %v5313_v42 = vld [vmem:[%s7597_s4 + $0x24] ss:$8 sps:$4 sm:$0xff]   ;;  %v5314_v31 = vld [vmem:[%s7597_s4 + $0xb4] ss:$8 sps:$4 sm:$0xff]  }
 0x4af   : > { %v2130_v0 = vadd.bf16 1056980736, %v2114_v57  ;;  %v5121_v6 = vpop.eup %5120  ;;  %v2107_v24 = vmul.bf16 1056980736, %v5119_v22  ;;  %v5315_v57 = vld [vmem:[%s7597_s4 + $0x20] ss:$8 sps:$4 sm:$0xff]  }
 0x4b0   : > { %v2129_v33 = vadd.bf16 1056980736, %v2113_v18  ;;  %v5316_v18 = vld [vmem:[%s7597_s4 + $0xb0] ss:$8 sps:$4 sm:$0xff]   ;;  %v5320_v22 = vld [vmem:[%s7597_s4 + $0xc0] ss:$8 sps:$4 sm:$0xff]  }
 0x4b1   : > { %4217 = vmatpush3.bf16.msra.mxu0 %v2136_v38  ;;  %4841 = vmatpush3.bf16.msra.mxu1 %v2136_v38  ;;  %v2146_v51 = vmul.bf16 %v2130_v0, %v6569_v4  ;;  %v2123_v16 = vadd.bf16 1056980736, %v2107_v24  ;;  %v5317_v38 = vld [vmem:[%s7597_s4 + $0x34] ss:$8 sps:$4 sm:$0xff]   ;;  %v5327_v24 = vld [vmem:[%s7597_s4 + $0x50] ss:$8 sps:$4 sm:$0xff]  }
 0x4b2   : > { %v2145_v53 = vmul.bf16 %v2129_v33, %v6571_v34  ;;  %v2108_v34 = vmul.bf16 1056980736, %v5121_v6  ;;  %v5321_v33 = vld [vmem:[%s7597_s4 + $0x44] ss:$8 sps:$4 sm:$0xff]   ;;  %v5322_v0 = vld [vmem:[%s7597_s4 + $0xd4] ss:$8 sps:$4 sm:$0xff]  }
 0x4b3   : > { %v2139_v4 = vmul.bf16 %v2123_v16, %v6540_v23  ;;  %v5308_v23 = vld [vmem:[%s7597_s4 + $0x90] ss:$8 sps:$4 sm:$0xff]   ;;  %v5325_v60 = vld [vmem:[%s7597_s4 + $0x54] ss:$8 sps:$4 sm:$0xff]  }
 0x4b4   : > { %v5123_v44 = vpop.eup %5122  ;;  %4218 = vmatprep.subr.bf16.mxu0 %v2145_v53  ;;  %4834 = vmatprep.subr.bf16.mxu1 %v2145_v53  ;;  %v2124_v39 = vadd.bf16 1056980736, %v2108_v34  ;;  %v5323_v53 = vld [vmem:[%s7597_s4 + $0x40] ss:$8 sps:$4 sm:$0xff]   ;;  %v5324_v6 = vld [vmem:[%s7597_s4 + $0xd0] ss:$8 sps:$4 sm:$0xff]  }
 0x4b5   : > { %v5125_v9 = vpop.eup %5124  ;;  %4219 = vmatpush3.bf16.msra.mxu0 %v2137_v46  ;;  %4842 = vmatpush3.bf16.msra.mxu1 %v2137_v46  ;;  %v2116_v20 = vmul.bf16 1056980736, %v5123_v44  ;;  %v5326_v46 = vld [vmem:[%s7597_s4 + $0xe4] ss:$8 sps:$4 sm:$0xff]   ;;  %v5328_v44 = vld [vmem:[%s7597_s4 + $0xe0] ss:$8 sps:$4 sm:$0xff]  }
 0x4b6   : > { %4220 = vmatprep.subr.bf16.mxu0 %v2146_v51  ;;  %4835 = vmatprep.subr.bf16.mxu1 %v2146_v51  ;;  %v2115_v41 = vmul.bf16 1056980736, %v5125_v9  ;;  %v2140_v8 = vmul.bf16 %v2124_v39, %v6538_v35  ;;  %v5310_v35 = vld [vmem:[%s7597_s4 + $0xa4] ss:$8 sps:$4 sm:$0xff]   ;;  %v5330_v9 = vld [vmem:[%s7597_s4 + $0xf4] ss:$8 sps:$4 sm:$0xff]   ;;  %v3132_v39 = vmul.f32 %v6485_v1, %v6471_v27 }
 0x4b7   : > { %v2132_v26 = vadd.bf16 1056980736, %v2116_v20  ;;  %v5329_v51 = vld [vmem:[%s7597_s4 + $0x64] ss:$8 sps:$4 sm:$0xff]   ;;  %v5331_v20 = vld [vmem:[%s7597_s4 + $0x60] ss:$8 sps:$4 sm:$0xff]  }
 0x4b8   : > { %v2131_v21 = vadd.bf16 1056980736, %v2115_v41  ;;  %v5332_v41 = vld [vmem:[%s7597_s4 + $0xf0] ss:$8 sps:$4 sm:$0xff]   ;;  %v5334_v34 = vld [vmem:[%s7599_s6 + $0x4] ss:$8 sps:$4 sm:$0xff]  }
 0x4b9   : > { %4221 = vmatpush3.bf16.msra.mxu0 %v2138_v45  ;;  %4843 = vmatpush3.bf16.msra.mxu1 %v2138_v45  ;;  %v2148_v32 = vmul.bf16 %v2132_v26, %v6583_v11  ;;  %v5309_v11 = vld [vmem:[%s7597_s4 + $0x14] ss:$8 sps:$4 sm:$0xff]   ;;  %v5335_v16 = vld [vmem:[%s7597_s4 + $0x70] ss:$8 sps:$4 sm:$0xff]   ;;  %v5337_v26 = vld [vmem:[%s7597_s4 + $0x80] ss:$8 sps:$4 sm:$0xff]  }
 0x4ba   : > { %v2147_v54 = vmul.bf16 %v2131_v21, %v6585_v58  ;;  %v5311_v58 = vld [vmem:[%s7597_s4 + $0x10] ss:$8 sps:$4 sm:$0xff]   ;;  %v5333_v45 = vld [vmem:[%s7597_s4 + $0x74] ss:$8 sps:$4 sm:$0xff]   ;;  %v5336_v21 = vld [vmem:[%s7597_s4 + $0x84] ss:$8 sps:$4 sm:$0xff]  }
 0x4bc   : > { %4222 = vmatprep.subr.bf16.mxu0 %v2147_v54  ;;  %4836 = vmatprep.subr.bf16.mxu1 %v2147_v54  ;;  %v3143_v54 = vmul.f32 %v6488_v61, %v6488_v61 }
 0x4bd   : > { %4223 = vmatpush3.bf16.msra.mxu0 %v2139_v4  ;;  %4844 = vmatpush3.bf16.msra.mxu1 %v2139_v4  ;;  %v3142_v4 = vmul.f32 %v3132_v39, %v3132_v39 }
 0x4be   : > { %4224 = vmatprep.subr.bf16.mxu0 %v2148_v32  ;;  %4837 = vmatprep.subr.bf16.mxu1 %v2148_v32  ;;  %v3133_v32 = vmul.f32 %v6485_v1, %v6474_v15  ;;  %v3137_v15 = vmul.f32 0.48860252, %v6488_v61 }
 0x4c1   : > { %4225 = vmatpush3.bf16.msra.mxu0 %v2140_v8  ;;  %4845 = vmatpush3.bf16.msra.mxu1 %v2140_v8  ;;  %v3144_v8 = vadd.f32 %v3143_v54, %v3142_v4 }
 0x4c4   : > { %2182 = vmatmul.mubr.bf16.vlgmr.msra.gmra.mrb[72].mxu0 %v5307_v37  ;;  %2254 = vmatmul.mubr.bf16.vlgmr.msra.gmra.mrb[64].mxu1 %v5308_v23  ;;  %v3141_v37 = vmul.f32 %v3133_v32, %v3133_v32  ;;  %v3145_v23 = vmul.f32 0.5, %v3144_v8 }
 0x4c5   : > { %2189 = vmatprep.mubr.bf16.mxu0 %v5309_v11  ;;  %2261 = vmatprep.mubr.bf16.mxu1 %v5310_v35  ;;  %v3138_v11 = vmul.f32 1.0925485, %v3132_v39 }
 0x4c6   : > { %v3146_v35 = vsub.f32 %v3141_v37, %v3145_v23 }
 0x4c7   : > { %v3139_v1 = vmul.f32 %v3138_v11, %v6488_v61 }
 0x4cc   : > { %2190 = vmatmul.mubr.bf16.gmra.mrb[76].mxu0 %v5311_v58  ;;  %2262 = vmatmul.mubr.bf16.gmra.mrb[68].mxu1 %v5312_v30  ;;  %v3135_v58 = vmul.f32 0.48860252, %v3132_v39  ;;  %v3136_v30 = vmul.f32 0.48860252, %v3133_v32  ;;  %v7849_v39 = vld [vmem:[#allocation50_spill] sm:$0xff] }
 0x4cd   : > { %2197 = vmatprep.mubr.bf16.mxu0 %v5313_v42  ;;  %2269 = vmatprep.mubr.bf16.mxu1 %v5314_v31  ;;  %v3140_v42 = vmul.f32 %v3138_v11, %v3133_v32  ;;  %v3147_v31 = vmul.f32 0.63078314, %v3146_v35 }
 0x4d4   : > { %2198 = vmatmul.mubr.bf16.gmra.mrb[80].mxu0 %v5315_v57  ;;  %2270 = vmatmul.mubr.bf16.gmra.mrb[72].mxu1 %v5316_v18  ;;  %v3148_v57 = vmul.f32 1.0925485, %v3133_v32  ;;  %v3150_v18 = vsub.f32 %v3143_v54, %v3142_v4  ;;  %v7848_v54 = vld [vmem:[#allocation49_spill] sm:$0xff] }
 0x4d5   : > { %2205 = vmatprep.mubr.bf16.mxu0 %v5317_v38  ;;  %2277 = vmatprep.mubr.bf16.mxu1 %v5318_v3  ;;  %v6701_v38 = vpack.c.bf16 %v3136_v30, %v3135_v58  ;;  %v6703_v3 = vpack.c.bf16 %v3147_v31, %v3140_v42 }
 0x4d6   : > { %v3149_v27 = vmul.f32 %v3148_v57, %v6488_v61 }
 0x4d7   : > { %7842 = vst [vmem:[#allocation39_spill] sm:$0xff] %v6701_v38  ;;  %7843 = vst [vmem:[#allocation34_spill] sm:$0xff] %v6703_v3 }
 0x4dc   : > { %2206 = vmatmul.mubr.bf16.gmra.mrb[84].mxu0 %v5319_v19  ;;  %2278 = vmatmul.mubr.bf16.gmra.mrb[76].mxu1 %v5320_v22  ;;  %v3151_v19 = vmul.f32 0.54627424, %v3150_v18 }
 0x4dd   : > { %2213 = vmatprep.mubr.bf16.mxu0 %v5321_v33  ;;  %2285 = vmatprep.mubr.bf16.mxu1 %v5322_v0  ;;  %v6710_v33 = vpack.c.bf16 %v3139_v1, %v3137_v15  ;;  %v7850_v15 = vld [vmem:[#allocation45_spill] sm:$0xff] }
 0x4de   : > { %v6706_v22 = vpack.c.bf16 %v3151_v19, %v3149_v27 }
 0x4df   : > { %7845 = vst [vmem:[#allocation79_spill] sm:$0xff] %v6710_v33 }
 0x4e0   : > { %7844 = vst [vmem:[#allocation78_spill] sm:$0xff] %v6706_v22 }
 0x4e4   : > { %2214 = vmatmul.mubr.bf16.gmra.mrb[88].mxu0 %v5323_v53  ;;  %2286 = vmatmul.mubr.bf16.gmra.mrb[80].mxu1 %v5324_v6 }
 0x4e5   : > { %2221 = vmatprep.mubr.bf16.mxu0 %v5325_v60  ;;  %2293 = vmatprep.mubr.bf16.mxu1 %v5326_v46 }
 0x4ec   : > { %2222 = vmatmul.mubr.bf16.gmra.mrb[92].mxu0 %v5327_v24  ;;  %2294 = vmatmul.mubr.bf16.gmra.mrb[84].mxu1 %v5328_v44 }
 0x4ed   : > { %2229 = vmatprep.mubr.bf16.mxu0 %v5329_v51  ;;  %2301 = vmatprep.mubr.bf16.mxu1 %v5330_v9 }
 0x4f4   : > { %2230 = vmatmul.mubr.bf16.gmra.mrb[96].mxu0 %v5331_v20  ;;  %2302 = vmatmul.mubr.bf16.gmra.mrb[88].mxu1 %v5332_v41 }
 0x4f5   : > { %2237 = vmatprep.mubr.bf16.mxu0 %v5333_v45  ;;  %2438 = vmatprep.mubr.bf16.mxu1 %v5334_v34 }
 0x4fc   : > { %2238 = vmatmul.mubr.bf16.gmra.mrb[100].mxu0 %v5335_v16 }
 0x4fd   : > { %2245 = vmatprep.mubr.bf16.mxu0 %v5336_v21  ;;  %v7847_v21 = vld [vmem:[#allocation44_spill] sm:$0xff] }
 0x504   : > { %2246 = vmatmul.mubr.bf16.gmra.mrb[104].mxu0 %v5337_v26 }
 0x505   : > { %3078 = vmatprep.mubr.bf16.mxu0 %v5334_v34  ;;  %v7846_v34 = vld [vmem:[#allocation43_spill] sm:$0xff] }
 0x597   : > { %v4226_v0 = vpop.f32.mrb[72].mxu0  ;;  %v4280_v53 = vpop.f32.mrb[64].mxu1 }
 0x598   : > { %v4227_v6 = vpop.f32.mrb[73].mxu0  ;;  %v4281_v60 = vpop.f32.mrb[65].mxu1 }
 0x599   : > { %v4228_v46 = vadd.f32 %v4227_v6, %v4226_v0  ;;  %v4282_v24 = vadd.f32 %v4281_v60, %v4280_v53  ;;  %v4229_v44 = vpop.f32.mrb[74].mxu0  ;;  %v4283_v51 = vpop.f32.mrb[66].mxu1  ;;  %v7851_v0 = vld [vmem:[#allocation52_spill] sm:$0xff]  ;;  %v7852_v60 = vld [vmem:[#allocation54_spill] sm:$0xff] }
 0x59a   : > { %v4230_v9 = vpop.f32.mrb[75].mxu0  ;;  %v4284_v20 = vpop.f32.mrb[67].mxu1 }
 0x59b   : > { %v4231_v41 = vadd.f32 %v4230_v9, %v4229_v44  ;;  %v4285_v45 = vadd.f32 %v4284_v20, %v4283_v51  ;;  %v2184_v16 = vadd.f32 %v4228_v46, %v7846_v34  ;;  %v2256_v26 = vadd.f32 %v4282_v24, %v7847_v21 }
 0x59d   : > { %v2187_v61 = vadd.f32 %v4231_v41, %v7848_v54  ;;  %v2259_v4 = vadd.f32 %v4285_v45, %v7849_v39 }
 0x59f   : > { %v6716_v32 = vpack.c.bf16 %v2187_v61, %v2184_v16  ;;  %v6718_v8 = vpack.c.bf16 %v2259_v4, %v2256_v26  ;;  %v4232_v37 = vpop.f32.mrb[76].mxu0  ;;  %v4286_v23 = vpop.f32.mrb[68].mxu1 }
 0x5a0   : > { %v4233_v11 = vpop.f32.mrb[77].mxu0  ;;  %v4287_v35 = vpop.f32.mrb[69].mxu1 }
 0x5a1   : > { %v4234_v58 = vadd.f32 %v4233_v11, %v4232_v37  ;;  %v4288_v30 = vadd.f32 %v4287_v35, %v4286_v23  ;;  %v4235_v42 = vpop.f32.mrb[78].mxu0  ;;  %v4289_v31 = vpop.f32.mrb[70].mxu1  ;;  %v7853_v35 = vld [vmem:[#allocation48_spill] sm:$0xff] }
 0x5a2   : > { %v4236_v57 = vpop.f32.mrb[79].mxu0  ;;  %v4290_v18 = vpop.f32.mrb[71].mxu1 }
 0x5a3   : > { %v4237_v27 = vadd.f32 %v4236_v57, %v4235_v42  ;;  %v4291_v19 = vadd.f32 %v4290_v18, %v4289_v31  ;;  %v2192_v1 = vadd.f32 %v4234_v58, %v7850_v15  ;;  %v2264_v6 = vadd.f32 %v4288_v30, %v6200_v29  ;;  %v7854_v30 = vld [vmem:[#allocation56_spill] sm:$0xff] }
 0x5a5   : > { %v2195_v53 = vadd.f32 %v4237_v27, %v7851_v0  ;;  %v2267_v46 = vadd.f32 %v4291_v19, %v7852_v60 }
 0x5a7   : > { %v6724_v24 = vpack.c.bf16 %v2195_v53, %v2192_v1  ;;  %v4238_v44 = vpop.f32.mrb[80].mxu0  ;;  %v4292_v51 = vpop.f32.mrb[72].mxu1  ;;  %v6726_v9 = vpack.c.bf16 %v2267_v46, %v2264_v6 }
 0x5a8   : > { %v4239_v20 = vpop.f32.mrb[81].mxu0  ;;  %v4293_v41 = vpop.f32.mrb[73].mxu1 }
 0x5a9   : > { %v4240_v45 = vadd.f32 %v4239_v20, %v4238_v44  ;;  %v4294_v16 = vadd.f32 %v4293_v41, %v4292_v51  ;;  %v4241_v26 = vpop.f32.mrb[82].mxu0  ;;  %v4295_v61 = vpop.f32.mrb[74].mxu1 }
 0x5aa   : > { %v4242_v4 = vpop.f32.mrb[83].mxu0  ;;  %v4296_v37 = vpop.f32.mrb[75].mxu1 }
 0x5ab   : > { %v4243_v23 = vadd.f32 %v4242_v4, %v4241_v26  ;;  %v4297_v11 = vadd.f32 %v4296_v37, %v4295_v61  ;;  %v2200_v58 = vadd.f32 %v4240_v45, %v7853_v35  ;;  %v2272_v31 = vadd.f32 %v4294_v16, %v6212_v17  ;;  %v7855_v4 = vld [vmem:[#allocation55_spill] sm:$0xff] }
 0x5ad   : > { %v2203_v42 = vadd.f32 %v4243_v23, %v7854_v30  ;;  %v2275_v57 = vadd.f32 %v4297_v11, %v6216_v56  ;;  %v7856_v23 = vld [vmem:[#allocation57_spill] sm:$0xff] }
 0x5af   : > { %v6732_v18 = vpack.c.bf16 %v2203_v42, %v2200_v58  ;;  %v4244_v27 = vpop.f32.mrb[84].mxu0  ;;  %v4298_v19 = vpop.f32.mrb[76].mxu1  ;;  %v6734_v1 = vpack.c.bf16 %v2275_v57, %v2272_v31 }
 0x5b0   : > { %v4245_v53 = vpop.f32.mrb[85].mxu0  ;;  %v4299_v6 = vpop.f32.mrb[77].mxu1 }
 0x5b1   : > { %v4246_v46 = vadd.f32 %v4245_v53, %v4244_v27  ;;  %v4300_v44 = vadd.f32 %v4299_v6, %v4298_v19  ;;  %v4247_v51 = vpop.f32.mrb[86].mxu0  ;;  %v4301_v20 = vpop.f32.mrb[78].mxu1 }
 0x5b2   : > { %v4248_v41 = vpop.f32.mrb[87].mxu0  ;;  %v4302_v45 = vpop.f32.mrb[79].mxu1 }
 0x5b3   : > { %v4249_v26 = vadd.f32 %v4248_v41, %v4247_v51  ;;  %v4303_v61 = vadd.f32 %v4302_v45, %v4301_v20  ;;  %v2208_v16 = vadd.f32 %v4246_v46, %v7855_v4  ;;  %v2280_v37 = vadd.f32 %v4300_v44, %v6234_v28 }
 0x5b4   : > { %v6746_v44 = vsub.f32 %v6462_v50, %v5852_v14 }
 0x5b5   : > { %v2211_v11 = vadd.f32 %v4249_v26, %v7856_v23  ;;  %v2283_v58 = vadd.f32 %v4303_v61, %v6236_v36  ;;  %v6750_v61 = vsub.f32 %v6452_v52, %v5848_v10 }
 0x5b6   : > { %v2476_v14 = vmul.f32 %v6746_v44, %v6746_v44 }
 0x5b7   : > { %v4250_v42 = vpop.f32.mrb[88].mxu0  ;;  %v4304_v31 = vpop.f32.mrb[80].mxu1  ;;  %v6740_v57 = vpack.c.bf16 %v2211_v11, %v2208_v16  ;;  %v6742_v27 = vpack.c.bf16 %v2283_v58, %v2280_v37  ;;  %v7857_v16 = vld [vmem:[#allocation61_spill] sm:$0xff]  ;;  %v7858_v11 = vld [vmem:[#allocation60_spill] sm:$0xff]  ;;  %v2475_v52 = vmul.f32 %v6750_v61, %v6750_v61 }
 0x5b8   : > { %v4251_v19 = vpop.f32.mrb[89].mxu0  ;;  %v4305_v53 = vpop.f32.mrb[81].mxu1 }
 0x5b9   : > { %v4252_v6 = vadd.f32 %v4251_v19, %v4250_v42  ;;  %v4306_v22 = vadd.f32 %v4305_v53, %v4304_v31  ;;  %v4253_v51 = vpop.f32.mrb[90].mxu0  ;;  %v4307_v20 = vpop.f32.mrb[82].mxu1  ;;  %v2477_v33 = vadd.f32 %v2476_v14, %v2475_v52 }
 0x5ba   : > { %v4254_v41 = vpop.f32.mrb[91].mxu0  ;;  %v4308_v46 = vpop.f32.mrb[83].mxu1 }
 0x5bb   : > { %v4255_v45 = vadd.f32 %v4254_v41, %v4253_v51  ;;  %v4309_v26 = vadd.f32 %v4308_v46, %v4307_v20  ;;  %v2216_v37 = vadd.f32 %v4252_v6, %v7857_v16  ;;  %v2288_v42 = vadd.f32 %v4306_v22, %v6253_v49  ;;  %v7860_v49 = vld [vmem:[#allocation64_spill] sm:$0xff] }
 0x5bc   : > { %v6766_v6 = vsub.f32 %v6464_v40, %v5850_v12 }
 0x5bd   : > { %v2219_v58 = vadd.f32 %v4255_v45, %v7858_v11  ;;  %v2291_v31 = vadd.f32 %v4309_v26, %v6249_v55 }
 0x5bf   : > { %v6756_v19 = vpack.c.bf16 %v2219_v58, %v2216_v37  ;;  %v4256_v53 = vpop.f32.mrb[92].mxu0  ;;  %v4310_v51 = vpop.f32.mrb[84].mxu1  ;;  %v6760_v50 = vpack.c.bf16 %v2291_v31, %v2288_v42  ;;  %v2478_v42 = vmul.f32 %v6766_v6, %v6766_v6  ;;  %v7859_v31 = vld [vmem:[#allocation65_spill] sm:$0xff] }
 0x5c0   : > { %v4257_v20 = vpop.f32.mrb[93].mxu0  ;;  %v4311_v10 = vpop.f32.mrb[85].mxu1 }
 0x5c1   : > { %v4258_v22 = vadd.f32 %v4257_v20, %v4256_v53  ;;  %v4312_v41 = vadd.f32 %v4311_v10, %v4310_v51  ;;  %v4259_v46 = vpop.f32.mrb[94].mxu0  ;;  %v4313_v45 = vpop.f32.mrb[86].mxu1  ;;  %v2479_v14 = vadd.f32 %v2478_v42, %v2477_v33 }
 0x5c2   : > { %v4260_v26 = vpop.f32.mrb[95].mxu0  ;;  %v4314_v37 = vpop.f32.mrb[87].mxu1 }
 0x5c3   : > { %v4261_v58 = vadd.f32 %v4260_v26, %v4259_v46  ;;  %v4315_v3 = vadd.f32 %v4314_v37, %v4313_v45  ;;  %v2224_v38 = vadd.f32 %v4258_v22, %v7859_v31  ;;  %v2296_v55 = vadd.f32 %v4312_v41, %v6267_v59 }
 0x5c4   : > { %5126 = vrsqrt.f32 %v2479_v14  ;;  %vm2482_vm7 = vcmp.eq.f32.partialorder %v2479_v14, inf  ;;  %vm2484_vm8 = vcmp.eq.f32.partialorder %v2479_v14, 0.0 }
 0x5c5   : > { %v2227_v36 = vadd.f32 %v4261_v58, %v7860_v49  ;;  %v2299_v12 = vadd.f32 %v4315_v3, %v6265_v43  ;;  %v7861_v58 = vld [vmem:[#allocation69_spill] sm:$0xff] }
 0x5c7   : > { %v4262_v40 = vpop.f32.mrb[96].mxu0  ;;  %v4316_v53 = vpop.f32.mrb[88].mxu1  ;;  %v6774_v51 = vpack.c.bf16 %v2227_v36, %v2224_v38  ;;  %v6776_v20 = vpack.c.bf16 %v2299_v12, %v2296_v55  ;;  %v7862_v36 = vld [vmem:[#allocation68_spill] sm:$0xff] }
 0x5c8   : > { %v4263_v10 = vpop.f32.mrb[97].mxu0  ;;  %v4317_v46 = vpop.f32.mrb[89].mxu1 }
 0x5c9   : > { %v4264_v52 = vadd.f32 %v4263_v10, %v4262_v40  ;;  %v4318_v45 = vadd.f32 %v4317_v46, %v4316_v53  ;;  %v4265_v26 = vpop.f32.mrb[98].mxu0  ;;  %v4319_v37 = vpop.f32.mrb[90].mxu1  ;;  %v2340_v60 = vmul.bf16 1056980736, %v6776_v20 }
 0x5ca   : > { %v4266_v22 = vpop.f32.mrb[99].mxu0  ;;  %v4320_v28 = vpop.f32.mrb[91].mxu1 }
 0x5cb   : > { %v4267_v41 = vadd.f32 %v4266_v22, %v4265_v26  ;;  %v4321_v59 = vadd.f32 %v4320_v28, %v4319_v37  ;;  %v2232_v3 = vadd.f32 %v4264_v52, %v7861_v58  ;;  %v2304_v43 = vadd.f32 %v4318_v45, %v6279_v2  ;;  %v7863_v28 = vld [vmem:[#allocation72_spill] sm:$0xff]  ;;  %v7864_v37 = vld [vmem:[#allocation73_spill] sm:$0xff] }
 0x5cd   : > { %v2235_v38 = vadd.f32 %v4267_v41, %v7862_v36  ;;  %v2307_v55 = vadd.f32 %v4321_v59, %v6281_v5 }
 0x5ce   : > { %v5127_v22 = vpop.eup %5126 }
 0x5cf   : > { %v4268_v12 = vpop.f32.mrb[100].mxu0  ;;  %v6782_v56 = vpack.c.bf16 %v2235_v38, %v2232_v3  ;;  %v6784_v33 = vpack.c.bf16 %v2307_v55, %v2304_v43  ;;  %v2326_v3 = vmul.bf16 1056980736, %v6716_v32  ;;  %v2481_v38 = vmul.f32 %v5127_v22, %v2479_v14 }
 0x5d0   : > { %v4269_v42 = vpop.f32.mrb[101].mxu0  ;;  %v2335_v55 = vmul.bf16 1056980736, %v6718_v8 }
 0x5d1   : > { %v4270_v40 = vadd.f32 %v4269_v42, %v4268_v12  ;;  %v4271_v53 = vpop.f32.mrb[102].mxu0  ;;  %v2327_v42 = vmul.bf16 1056980736, %v6724_v24  ;;  %5128 = vtanh.bf16 %v2326_v3  ;;  %v2338_v3 = vmul.bf16 1056980736, %v6742_v27 }
 0x5d2   : > { %v4272_v10 = vpop.f32.mrb[103].mxu0  ;;  %5130 = vtanh.bf16 %v2335_v55 }
 0x5d3   : > { %v4273_v46 = vadd.f32 %v4272_v10, %v4271_v53  ;;  %v2240_v26 = vadd.f32 %v4270_v40, %v7863_v28  ;;  %v7865_v40 = vld [vmem:[#allocation42_spill] sm:$0xff]  ;;  %v7866_v10 = vld [vmem:[#allocation47_spill] sm:$0xff]  ;;  %5132 = vtanh.bf16 %v2327_v42  ;;  %v2330_v42 = vmul.bf16 1056980736, %v6756_v19 }
 0x5d5   : > { %v2243_v52 = vadd.f32 %v4273_v46, %v7864_v37 }
 0x5d7   : > { %v6788_v45 = vpack.c.bf16 %v2243_v52, %v2240_v26  ;;  %v4274_v41 = vpop.f32.mrb[104].mxu0  ;;  %v2485_v26 = vand.u32 2147483648, %v2479_v14  ;;  %v2336_v52 = vmul.bf16 1056980736, %v6726_v9 }
 0x5d8   : > { %v4275_v2 = vpop.f32.mrb[105].mxu0 }
 0x5d9   : > { %v4276_v59 = vadd.f32 %v4275_v2, %v4274_v41  ;;  %v4277_v5 = vpop.f32.mrb[106].mxu0  ;;  %v2483_v2 = vsel %vm2482_vm7, %v2479_v14, %v2481_v38  ;;  %5134 = vtanh.bf16 %v2336_v52 }
 0x5da   : > { %v4278_v43 = vpop.f32.mrb[107].mxu0  ;;  %v2486_v17 = vsel %vm2484_vm8, %v2485_v26, %v2483_v2 }
 0x5db   : > { %v4279_v12 = vadd.f32 %v4278_v43, %v4277_v5  ;;  %v2248_v53 = vadd.f32 %v4276_v59, %v7865_v40  ;;  %v2328_v5 = vmul.bf16 1056980736, %v6732_v18  ;;  %v2337_v43 = vmul.bf16 1056980736, %v6734_v1 }
 0x5dc   : > { %v2487_v59 = vadd.f32 1e-06, %v2486_v17  ;;  %v5129_v38 = vpop.eup %5128 }
 0x5dd   : > { %v2251_v46 = vadd.f32 %v4279_v12, %v7866_v10  ;;  %v2329_v12 = vmul.bf16 1056980736, %v6740_v57  ;;  %v5131_v55 = vpop.eup %5130  ;;  %v2358_v26 = vmul.bf16 1056980736, %v5129_v38  ;;  %v2341_v38 = vmul.bf16 1056980736, %v6784_v33 }
 0x5de   : > { %v2488_v14 = vmul.f32 1e-12, %v2487_v59 }
 0x5df   : > { %v2318_v41 = vpack.c.bf16 %v2251_v46, %v2248_v53  ;;  %v2339_v53 = vmul.bf16 1056980736, %v6760_v50  ;;  %v5133_v46 = vpop.eup %5132  ;;  %v2374_v29 = vadd.bf16 1056980736, %v2358_v26 }
 0x5e0   : > { %v2489_v2 = vmax.f32 %v2486_v17, %v2488_v14  ;;  %v2332_v17 = vmul.bf16 1056980736, %v6782_v56 }
 0x5e1   : > { %v2334_v22 = vmul.bf16 1056980736, %v2318_v41 }
 0x5e3   : > { %5136 = vtanh.bf16 %v2334_v22  ;;  %v2367_v22 = vmul.bf16 1056980736, %v5131_v55  ;;  %v2390_v55 = vmul.bf16 %v2374_v29, %v6716_v32 }
 0x5e4   : > { %5138 = vtanh.bf16 %v2328_v5  ;;  %v5135_v52 = vpop.eup %5134 }
 0x5e5   : > { %5140 = vtanh.bf16 %v2337_v43  ;;  %v2331_v43 = vmul.bf16 1056980736, %v6774_v51  ;;  %v2383_v21 = vadd.bf16 1056980736, %v2367_v22  ;;  %v2368_v10 = vmul.bf16 1056980736, %v5135_v52 }
 0x5e6   : > { %5142 = vtanh.bf16 %v2329_v12  ;;  %v2359_v12 = vmul.bf16 1056980736, %v5133_v46  ;;  %v2333_v52 = vmul.bf16 1056980736, %v6788_v45 }
 0x5e7   : > { %5144 = vtanh.bf16 %v2338_v3  ;;  %v2399_v46 = vmul.bf16 %v2383_v21, %v6718_v8  ;;  %v2384_v26 = vadd.bf16 1056980736, %v2368_v10 }
 0x5e8   : > { %5146 = vtanh.bf16 %v2330_v42  ;;  %v2375_v42 = vadd.bf16 1056980736, %v2359_v12 }
 0x5e9   : > { %5148 = vtanh.bf16 %v2339_v53 }
 0x5ea   : > { %5150 = vrcp.f32 %v2489_v2 }
 0x5eb   : > { %5152 = vtanh.bf16 %v2331_v43 }
 0x5ec   : > { %5154 = vtanh.bf16 %v2340_v60  ;;  %v2391_v60 = vmul.bf16 %v2375_v42, %v6724_v24 }
 0x5ed   : > { %5156 = vtanh.bf16 %v2332_v17 }
 0x5ee   : > { %v5137_v5 = vpop.eup %5136  ;;  %5158 = vtanh.bf16 %v2341_v38 }
 0x5ef   : > { %v2366_v59 = vmul.bf16 1056980736, %v5137_v5  ;;  %v5139_v39 = vpop.eup %5138  ;;  %5160 = vtanh.bf16 %v2333_v52 }
 0x5f0   : > { %v5141_v40 = vpop.eup %5140  ;;  %v2360_v53 = vmul.bf16 1056980736, %v5139_v39  ;;  %v2400_v39 = vmul.bf16 %v2384_v26, %v6726_v9 }
 0x5f1   : > { %v2382_v3 = vadd.bf16 1056980736, %v2366_v59  ;;  %v5143_v5 = vpop.eup %5142  ;;  %v2369_v2 = vmul.bf16 1056980736, %v5141_v40 }
 0x5f2   : > { %v5145_v22 = vpop.eup %5144  ;;  %v2361_v43 = vmul.bf16 1056980736, %v5143_v5 }
 0x5f3   : > { %v2398_v14 = vmul.bf16 %v2382_v3, %v2318_v41  ;;  %v2376_v41 = vadd.bf16 1056980736, %v2360_v53  ;;  %v5147_v29 = vpop.eup %5146  ;;  %v2385_v32 = vadd.bf16 1056980736, %v2369_v2  ;;  %v2370_v59 = vmul.bf16 1056980736, %v5145_v22 }
 0x5f4   : > { %v5149_v12 = vpop.eup %5148  ;;  %v2377_v40 = vadd.bf16 1056980736, %v2361_v43  ;;  %v2362_v10 = vmul.bf16 1056980736, %v5147_v29 }
 0x5f5   : > { %4322 = vmatprep.subr.bf16.mxu1 %v2398_v14  ;;  %v5151_v21 = vpop.eup %5150  ;;  %v2392_v8 = vmul.bf16 %v2376_v41, %v6732_v18  ;;  %v2401_v17 = vmul.bf16 %v2385_v32, %v6734_v1  ;;  %v2386_v24 = vadd.bf16 1056980736, %v2370_v59  ;;  %v2371_v38 = vmul.bf16 1056980736, %v5149_v12 }
 0x5f6   : > { %4323 = vmatpush3.bf16.msra.mxu1 %v2390_v55  ;;  %v5153_v3 = vpop.eup %5152  ;;  %v2494_v9 = vmul.f32 %v5151_v21, %v6766_v6  ;;  %v2393_v55 = vmul.bf16 %v2377_v40, %v6740_v57  ;;  %v2378_v42 = vadd.bf16 1056980736, %v2362_v10  ;;  %v2492_v2 = vmul.f32 %v5151_v21, %v6750_v61 }
 0x5f7   : > { %4324 = vmatprep.subr.bf16.mxu1 %v2399_v46  ;;  %v5155_v14 = vpop.eup %5154  ;;  %v2363_v53 = vmul.bf16 1056980736, %v5153_v3  ;;  %v2402_v46 = vmul.bf16 %v2386_v24, %v6742_v27  ;;  %v2387_v18 = vadd.bf16 1056980736, %v2371_v38 }
 0x5f8   : > { %v5157_v5 = vpop.eup %5156  ;;  %v2372_v26 = vmul.bf16 1056980736, %v5155_v14  ;;  %v2503_v1 = vmul.f32 %v2494_v9, %v2494_v9  ;;  %v2394_v52 = vmul.bf16 %v2378_v42, %v6756_v19  ;;  %v2495_v10 = vmul.f32 0.48860252, %v2492_v2 }
 0x5f9   : > { %v5159_v22 = vpop.eup %5158  ;;  %v2364_v41 = vmul.bf16 1056980736, %v5157_v5  ;;  %v2403_v57 = vmul.bf16 %v2387_v18, %v6760_v50  ;;  %v2498_v24 = vmul.f32 1.0925485, %v2492_v2 }
 0x5fa   : > { %4325 = vmatpush3.bf16.msra.mxu1 %v2391_v60  ;;  %v2379_v60 = vadd.bf16 1056980736, %v2363_v53  ;;  %v5161_v6 = vpop.eup %5160  ;;  %v2388_v43 = vadd.bf16 1056980736, %v2372_v26  ;;  %v2373_v29 = vmul.bf16 1056980736, %v5159_v22 }
 0x5fb   : > { %4326 = vmatprep.subr.bf16.mxu1 %v2400_v39  ;;  %v2502_v39 = vmul.f32 %v2492_v2, %v2492_v2  ;;  %v2380_v32 = vadd.bf16 1056980736, %v2364_v41  ;;  %v2365_v61 = vmul.bf16 1056980736, %v5161_v6  ;;  %v5340_v22 = vld [vmem:[%s7599_s6 + $0x10] ss:$8 sps:$4 sm:$0xff]  }
 0x5fc   : > { %v2395_v27 = vmul.bf16 %v2379_v60, %v6774_v51  ;;  %v2404_v59 = vmul.bf16 %v2388_v43, %v6776_v20  ;;  %v2389_v12 = vadd.bf16 1056980736, %v2373_v29  ;;  %v5343_v60 = vld [vmem:[%s7595_s2 + $0x10] sm:$0xff]   ;;  %v5344_v41 = vld [vmem:[%s7595_s2 + $0x18] sm:$0xff]   ;;  %v5345_v6 = vld [vmem:[%s7595_s2 + $0x20] sm:$0xff]  }
 0x5fd   : > { %v2504_v19 = vadd.f32 %v2503_v1, %v2502_v39  ;;  %v2396_v40 = vmul.bf16 %v2380_v32, %v6782_v56  ;;  %v2381_v50 = vadd.bf16 1056980736, %v2365_v61  ;;  %v5338_v56 = vld [vmem:[%s7599_s6] ss:$8 sps:$4 sm:$0xff]   ;;  %v5347_v43 = vld [vmem:[%s7595_s2 + $0x30] sm:$0xff]   ;;  %v5348_v29 = vld [vmem:[%s7595_s2 + $0x38] sm:$0xff]  }
 0x5fe   : > { %4327 = vmatpush3.bf16.msra.mxu1 %v2392_v8  ;;  %v2493_v8 = vmul.f32 %v5151_v21, %v6746_v44  ;;  %v2499_v44 = vmul.f32 %v2498_v24, %v2494_v9  ;;  %v5351_v32 = vld [vmem:[%s7595_s2 + $0x50] sm:$0xff]   ;;  %v5352_v61 = vld [vmem:[%s7595_s2 + $0x58] sm:$0xff]  }
 0x5ff   : > { %4328 = vmatprep.subr.bf16.mxu1 %v2401_v17  ;;  %v2405_v17 = vmul.bf16 %v2389_v12, %v6784_v33  ;;  %v2505_v51 = vmul.f32 0.5, %v2504_v19  ;;  %v2397_v20 = vmul.bf16 %v2381_v50, %v6788_v45  ;;  %v5339_v45 = vld [vmem:[%s7599_s6 + $0x14] ss:$8 sps:$4 sm:$0xff]   ;;  %v5354_v12 = vld [vmem:[%s7595_s2 + $0x68] sm:$0xff]  }
 0x600   : > { %v2496_v3 = vmul.f32 0.48860252, %v2493_v8  ;;  %v2501_v38 = vmul.f32 %v2493_v8, %v2493_v8  ;;  %v2508_v42 = vmul.f32 1.0925485, %v2493_v8  ;;  %v2500_v53 = vmul.f32 %v2498_v24, %v2493_v8  ;;  %v5355_v8 = vld [vmem:[%s7595_s2 + $0x70] sm:$0xff]   ;;  %v5356_v19 = vld [vmem:[%s7595_s2 + $0x78] sm:$0xff]  }
 0x602   : > { %4329 = vmatpush3.bf16.msra.mxu1 %v2393_v55  ;;  %v2528_v14 = vpack.c.bf16 %v2496_v3, %v2495_v10  ;;  %v2497_v55 = vmul.f32 0.48860252, %v2494_v9  ;;  %v2506_v21 = vsub.f32 %v2501_v38, %v2505_v51  ;;  %v2509_v26 = vmul.f32 %v2508_v42, %v2494_v9  ;;  %v5342_v9 = vld [vmem:[%s7595_s2 + $0x8] sm:$0xff]  }
 0x603   : > { %4330 = vmatprep.subr.bf16.mxu1 %v2402_v46  ;;  %v2510_v46 = vsub.f32 %v2503_v1, %v2502_v39  ;;  %v5341_v1 = vld [vmem:[%s7595_s2] sm:$0xff]  }
 0x604   : > { %v2529_v33 = vpack.c.bf16 %v2499_v44, %v2497_v55  ;;  %v2507_v5 = vmul.f32 0.63078314, %v2506_v21  ;;  %v5349_v39 = vld [vmem:[%s7595_s2 + $0x40] sm:$0xff]  }
 0x605   : > { %v2511_v2 = vmul.f32 0.54627424, %v2510_v46 }
 0x606   : > { %4331 = vmatpush3.bf16.msra.mxu1 %v2394_v52  ;;  %v2530_v18 = vpack.c.bf16 %v2507_v5, %v2500_v53  ;;  %v7867_v53 = vld [vmem:[#allocation77_spill] sm:$0xff] }
 0x607   : > { %4332 = vmatprep.subr.bf16.mxu1 %v2403_v57  ;;  %v2531_v52 = vpack.c.bf16 %v2511_v2, %v2509_v26  ;;  %v5346_v57 = vld [vmem:[%s7595_s2 + $0x28] sm:$0xff]   ;;  %v7868_v26 = vld [vmem:[#allocation17_spill] sm:$0xff] }
 0x60a   : > { %4333 = vmatpush3.bf16.msra.mxu1 %v2395_v27  ;;  %v5350_v27 = vld [vmem:[%s7595_s2 + $0x48] sm:$0xff]  }
 0x60b   : > { %4334 = vmatprep.subr.bf16.mxu1 %v2404_v59  ;;  %v5353_v59 = vld [vmem:[%s7595_s2 + $0x60] sm:$0xff]  }
 0x60e   : > { %4335 = vmatpush3.bf16.msra.mxu1 %v2396_v40  ;;  %v5357_v40 = vld [vmem:[%s7597_s4 + $0x4] ss:$8 sps:$4 sm:$0xff]  }
 0x60f   : > { %4336 = vmatprep.subr.bf16.mxu1 %v2405_v17 }
 0x612   : > { %4337 = vmatpush3.bf16.msra.mxu1 %v2397_v20 }
 0x613   : > { %4750 = vmatprep.subr.bf16.mxu1 %v2528_v14 }
 0x615   : > { %2439 = vmatmul.mubr.bf16.vlgmr.msra.gmra.mrb[92].mxu1 %v5338_v56 }
 0x616   : > { %4751 = vmatpush3.bf16.msra.mxu1 %v2528_v14  ;;  %2446 = vmatprep.mubr.bf16.mxu1 %v5339_v45 }
 0x617   : > { %4752 = vmatprep.subr.bf16.mxu1 %v2529_v33 }
 0x61a   : > { %4753 = vmatpush3.bf16.msra.mxu1 %v2529_v33 }
 0x61b   : > { %4754 = vmatprep.subr.bf16.mxu1 %v2530_v18 }
 0x61d   : > { %2447 = vmatmul.mubr.bf16.gmra.mrb[96].mxu1 %v5340_v22  ;;  %v7869_v22 = vld [vmem:[#allocation16_spill] sm:$0xff] }
 0x61e   : > { %4755 = vmatpush3.bf16.msra.mxu1 %v2530_v18  ;;  %4758 = vmatprep.mubr.msk.bf16.mxu1 %vm840_vm0, %v5341_v1 }
 0x61f   : > { %4756 = vmatprep.subr.bf16.mxu1 %v2531_v52 }
 0x622   : > { %4757 = vmatpush3.bf16.msra.mxu1 %v2531_v52 }
 0x625   : > { %4759 = vmatmul.mubr.msk.bf16.vlgmr.msra.gmra.mrb[100].mxu1 %vm840_vm0, %v5342_v9  ;;  %v7870_v9 = vld [vmem:[#allocation12_spill] sm:$0xff] }
 0x626   : > { %4762 = vmatprep.mubr.msk.bf16.mxu1 %vm840_vm0, %v5343_v60 }
 0x62d   : > { %4763 = vmatmul.mubr.msk.bf16.gmra.mrb[104].mxu1 %vm840_vm0, %v5344_v41  ;;  %v7871_v41 = vld [vmem:[#allocation13_spill] sm:$0xff] }
 0x62e   : > { %4766 = vmatprep.mubr.msk.bf16.mxu1 %vm840_vm0, %v5345_v6 }
 0x635   : > { %4767 = vmatmul.mubr.msk.bf16.gmra.mrb[108].mxu1 %vm840_vm0, %v5346_v57 }
 0x636   : > { %4770 = vmatprep.mubr.msk.bf16.mxu1 %vm840_vm0, %v5347_v43 }
 0x63d   : > { %4771 = vmatmul.mubr.msk.bf16.gmra.mrb[112].mxu1 %vm840_vm0, %v5348_v29 }
 0x63e   : > { %4774 = vmatprep.mubr.msk.bf16.mxu1 %vm840_vm0, %v5349_v39 }
 0x645   : > { %4775 = vmatmul.mubr.msk.bf16.gmra.mrb[116].mxu1 %vm840_vm0, %v5350_v27 }
 0x646   : > { %4778 = vmatprep.mubr.msk.bf16.mxu1 %vm840_vm0, %v5351_v32  ;;  %v7872_v32 = vld [vmem:[#allocation25_spill] sm:$0xff] }
 0x64d   : > { %4779 = vmatmul.mubr.msk.bf16.gmra.mrb[120].mxu1 %vm840_vm0, %v5352_v61 }
 0x64e   : > { %4782 = vmatprep.mubr.msk.bf16.mxu1 %vm840_vm0, %v5353_v59  ;;  %v7873_v59 = vld [vmem:[#allocation24_spill] sm:$0xff] }
 0x655   : > { %4783 = vmatmul.mubr.msk.bf16.gmra.mrb[124].mxu1 %vm840_vm0, %v5354_v12 }
 0x656   : > { %4786 = vmatprep.mubr.msk.bf16.mxu1 %vm840_vm0, %v5355_v8 }
 0x65d   : > { %4787 = vmatmul.mubr.msk.bf16.gmra.mrb[128].mxu1 %vm840_vm0, %v5356_v19  ;;  %v7874_v19 = vld [vmem:[#allocation21_spill] sm:$0xff] }
 0x65e   : > { %2821 = vmatprep.mubr.bf16.mxu1 %v5357_v40 }
 0x6e8   : > { %v4338_v50 = vpop.f32.mrb[92].mxu1 }
 0x6e9   : > { %v4339_v10 = vpop.f32.mrb[93].mxu1 }
 0x6ea   : > { %v4340_v3 = vadd.f32 %v4339_v10, %v4338_v50  ;;  %v4341_v17 = vpop.f32.mrb[94].mxu1  ;;  %v7875_v50 = vld [vmem:[#allocation20_spill] sm:$0xff] }
 0x6eb   : > { %v4342_v24 = vpop.f32.mrb[95].mxu1 }
 0x6ec   : > { %v2441_v38 = vadd.f32 %v4340_v3, %v6492_v7  ;;  %v4343_v51 = vadd.f32 %v4342_v24, %v4341_v17 }
 0x6ee   : > { %2455 = vst [vmem:[%s6497_s22 + $0x8] sm:$0xff] %v2441_v38  ;;  %v2444_v20 = vadd.f32 %v4343_v51, %v6494_v13 }
 0x6f0   : > { %3983 = vst [vmem:[%s6497_s22 + $0x28] sm:$0xff] %v2444_v20  ;;  %v4344_v14 = vpop.f32.mrb[96].mxu1  ;;  %v7876_v20 = vld [vmem:[#allocation33_spill] sm:$0xff] }
 0x6f1   : > { %v4345_v55 = vpop.f32.mrb[97].mxu1 }
 0x6f2   : > { %v4346_v44 = vadd.f32 %v4345_v55, %v4344_v14  ;;  %v4347_v21 = vpop.f32.mrb[98].mxu1  ;;  %v7877_v55 = vld [vmem:[#allocation32_spill] sm:$0xff] }
 0x6f3   : > { %v4348_v42 = vpop.f32.mrb[99].mxu1 }
 0x6f4   : > { %v2449_v56 = vadd.f32 %v4346_v44, %v6502_v62  ;;  %v4349_v33 = vadd.f32 %v4348_v42, %v4347_v21  ;;  %v7878_v42 = vld [vmem:[#allocation29_spill] sm:$0xff] }
 0x6f6   : > { %3984 = vst [vmem:[%s6497_s22 + $0x48] sm:$0xff] %v2449_v56  ;;  %v2452_v5 = vadd.f32 %v4349_v33, %v7867_v53  ;;  %v7879_v33 = vld [vmem:[#allocation28_spill] sm:$0xff] }
 0x6f8   : > { %3985 = vst [vmem:[%s6497_s22 + $0x68] sm:$0xff] %v2452_v5  ;;  %v4760_v46 = vpop.f32.mrb[100].mxu1 }
 0x6f9   : > { %v2566_v45 = vpop.f32.mrb[101].mxu1  ;;  %v2575_v2 = vadd.f32 %v4760_v46, %v7868_v26 }
 0x6fa   : > { %v4761_v18 = vpop.f32.mrb[102].mxu1  ;;  %v2567_v60 = vadd.f32 %v2566_v45, %v7870_v9 }
 0x6fb   : > { %v2578_v52 = vadd.f32 %v4761_v18, %v7869_v22  ;;  %v2569_v1 = vpop.f32.mrb[103].mxu1 }
 0x6fc   : > { %v2570_v6 = vadd.f32 %v2569_v1, %v7871_v41  ;;  %v7880_v1 = vld [vmem:[#allocation41_spill] sm:$0xff] }
 0x6fd   : > { %v6913_v57 = vpack.c.bf16 %v2578_v52, %v2575_v2 }
 0x6fe   : > { %v6915_v43 = vpack.c.bf16 %v2570_v6, %v2567_v60  ;;  %v7881_v6 = vld [vmem:[#allocation40_spill] sm:$0xff] }
 0x700   : > { %v4764_v29 = vpop.f32.mrb[104].mxu1 }
 0x701   : > { %v2582_v39 = vpop.f32.mrb[105].mxu1  ;;  %v2591_v61 = vadd.f32 %v4764_v29, %v7872_v32 }
 0x702   : > { %v4765_v27 = vpop.f32.mrb[106].mxu1  ;;  %v2583_v40 = vadd.f32 %v2582_v39, %v7874_v19 }
 0x703   : > { %v2594_v12 = vadd.f32 %v4765_v27, %v7873_v59  ;;  %v2585_v8 = vpop.f32.mrb[107].mxu1  ;;  %v7882_v27 = vld [vmem:[#allocation37_spill] sm:$0xff] }
 0x704   : > { %v2586_v10 = vadd.f32 %v2585_v8, %v7875_v50 }
 0x705   : > { %v6921_v3 = vpack.c.bf16 %v2594_v12, %v2591_v61  ;;  %v7883_v12 = vld [vmem:[#allocation36_spill] sm:$0xff] }
 0x706   : > { %v6923_v17 = vpack.c.bf16 %v2586_v10, %v2583_v40 }
 0x708   : > { %v4768_v24 = vpop.f32.mrb[108].mxu1 }
 0x709   : > { %v2598_v38 = vpop.f32.mrb[109].mxu1  ;;  %v2607_v14 = vadd.f32 %v4768_v24, %v7876_v20 }
 0x70a   : > { %v4769_v51 = vpop.f32.mrb[110].mxu1  ;;  %v2599_v56 = vadd.f32 %v2598_v38, %v7878_v42  ;;  %v2709_v38 = vmul.bf16 1056980736, %v6915_v43 }
 0x70b   : > { %v2610_v44 = vadd.f32 %v4769_v51, %v7877_v55  ;;  %v2601_v21 = vpop.f32.mrb[111].mxu1  ;;  %v7895_v55 = vld [vmem:[#allocation26_spill] sm:$0xff] }
 0x70c   : > { %v2602_v5 = vadd.f32 %v2601_v21, %v7879_v33  ;;  %5162 = vtanh.bf16 %v2709_v38 }
 0x70d   : > { %v6929_v46 = vpack.c.bf16 %v2610_v44, %v2607_v14  ;;  %v7884_v44 = vld [vmem:[#allocation15_spill] sm:$0xff] }
 0x70e   : > { %v6931_v45 = vpack.c.bf16 %v2602_v5, %v2599_v56  ;;  %v7885_v56 = vld [vmem:[#allocation14_spill] sm:$0xff] }
 0x70f   : > { %v2714_v33 = vmul.bf16 1056980736, %v6929_v46 }
 0x710   : > { %v4772_v18 = vpop.f32.mrb[112].mxu1 }
 0x711   : > { %v2614_v2 = vpop.f32.mrb[113].mxu1  ;;  %v2623_v60 = vadd.f32 %v4772_v18, %v7880_v1 }
 0x712   : > { %v4773_v52 = vpop.f32.mrb[114].mxu1  ;;  %v2615_v61 = vadd.f32 %v2614_v2, %v7882_v27  ;;  %v7887_v27 = vld [vmem:[#allocation11_spill] sm:$0xff] }
 0x713   : > { %v2626_v29 = vadd.f32 %v4773_v52, %v7881_v6  ;;  %v2617_v39 = vpop.f32.mrb[115].mxu1  ;;  %v2710_v52 = vmul.bf16 1056980736, %v6913_v57  ;;  %v7886_v6 = vld [vmem:[#allocation10_spill] sm:$0xff] }
 0x714   : > { %v2618_v8 = vadd.f32 %v2617_v39, %v7883_v12 }
 0x715   : > { %v6937_v40 = vpack.c.bf16 %v2626_v29, %v2623_v60  ;;  %5164 = vtanh.bf16 %v2710_v52 }
 0x716   : > { %v6939_v10 = vpack.c.bf16 %v2618_v8, %v2615_v61 }
 0x718   : > { %v4776_v24 = vpop.f32.mrb[116].mxu1 }
 0x719   : > { %v2630_v51 = vpop.f32.mrb[117].mxu1  ;;  %v2639_v21 = vadd.f32 %v4776_v24, %v7884_v44 }
 0x71a   : > { %v4777_v14 = vpop.f32.mrb[118].mxu1  ;;  %v2631_v2 = vadd.f32 %v2630_v51, %v7886_v6  ;;  %v7888_v51 = vld [vmem:[#allocation23_spill] sm:$0xff] }
 0x71b   : > { %v2642_v5 = vadd.f32 %v4777_v14, %v7885_v56  ;;  %v2633_v18 = vpop.f32.mrb[119].mxu1  ;;  %v2711_v14 = vmul.bf16 1056980736, %v6923_v17 }
 0x71c   : > { %v2634_v39 = vadd.f32 %v2633_v18, %v7887_v27  ;;  %v7889_v18 = vld [vmem:[#allocation22_spill] sm:$0xff] }
 0x71d   : > { %v6947_v60 = vpack.c.bf16 %v2642_v5, %v2639_v21  ;;  %v2712_v5 = vmul.bf16 1056980736, %v6921_v3  ;;  %v7891_v27 = vld [vmem:[#allocation18_spill] sm:$0xff] }
 0x71e   : > { %v6949_v29 = vpack.c.bf16 %v2634_v39, %v2631_v2  ;;  %v7890_v2 = vld [vmem:[#allocation19_spill] sm:$0xff] }
 0x71f   : > { %v2718_v61 = vmul.bf16 1056980736, %v6947_v60 }
 0x720   : > { %v2717_v8 = vmul.bf16 1056980736, %v6949_v29  ;;  %v4780_v24 = vpop.f32.mrb[120].mxu1 }
 0x721   : > { %5166 = vtanh.bf16 %v2718_v61  ;;  %v2646_v56 = vpop.f32.mrb[121].mxu1  ;;  %v2655_v6 = vadd.f32 %v4780_v24, %v7888_v51 }
 0x722   : > { %5168 = vtanh.bf16 %v2717_v8  ;;  %v4781_v44 = vpop.f32.mrb[122].mxu1  ;;  %v2647_v39 = vadd.f32 %v2646_v56, %v7890_v2  ;;  %v5163_v8 = vpop.eup %5162 }
 0x723   : > { %v2658_v38 = vadd.f32 %v4781_v44, %v7889_v18  ;;  %v2649_v21 = vpop.f32.mrb[123].mxu1  ;;  %5170 = vtanh.bf16 %v2711_v14  ;;  %v2713_v44 = vmul.bf16 1056980736, %v6931_v45  ;;  %v5165_v2 = vpop.eup %5164  ;;  %v7892_v14 = vld [vmem:[#allocation31_spill] sm:$0xff] }
 0x724   : > { %v2650_v52 = vadd.f32 %v2649_v21, %v7891_v27  ;;  %5172 = vtanh.bf16 %v2712_v5  ;;  %v2741_v21 = vmul.bf16 1056980736, %v5163_v8  ;;  %v7894_v5 = vld [vmem:[#allocation27_spill] sm:$0xff]  ;;  %v2742_v19 = vmul.bf16 1056980736, %v5165_v2 }
 0x725   : > { %v6959_v12 = vpack.c.bf16 %v2658_v38, %v2655_v6  ;;  %v7893_v38 = vld [vmem:[#allocation30_spill] sm:$0xff] }
 0x726   : > { %v6961_v1 = vpack.c.bf16 %v2650_v52, %v2647_v39 }
 0x727   : > { %v2720_v61 = vmul.bf16 1056980736, %v6959_v12 }
 0x728   : > { %v2719_v24 = vmul.bf16 1056980736, %v6961_v1  ;;  %v4784_v51 = vpop.f32.mrb[124].mxu1 }
 0x729   : > { %5174 = vtanh.bf16 %v2720_v61  ;;  %v2662_v18 = vpop.f32.mrb[125].mxu1  ;;  %v2671_v6 = vadd.f32 %v4784_v51, %v7892_v14  ;;  %v2757_v51 = vadd.bf16 1056980736, %v2741_v21 }
 0x72a   : > { %5176 = vtanh.bf16 %v2719_v24  ;;  %v4785_v56 = vpop.f32.mrb[126].mxu1  ;;  %v2663_v42 = vadd.f32 %v2662_v18, %v7894_v5 }
 0x72b   : > { %v2674_v39 = vadd.f32 %v4785_v56, %v7893_v38  ;;  %v2665_v52 = vpop.f32.mrb[127].mxu1  ;;  %5178 = vtanh.bf16 %v2713_v44 }
 0x72c   : > { %v5167_v27 = vpop.eup %5166  ;;  %v2666_v20 = vadd.f32 %v2665_v52, %v7895_v55  ;;  %5180 = vtanh.bf16 %v2714_v33  ;;  %v2715_v52 = vmul.bf16 1056980736, %v6939_v10 }
 0x72d   : > { %v5169_v50 = vpop.eup %5168  ;;  %v6971_v61 = vpack.c.bf16 %v2674_v39, %v2671_v6  ;;  %v2750_v24 = vmul.bf16 1056980736, %v5167_v27  ;;  %v2758_v6 = vadd.bf16 1056980736, %v2742_v19 }
 0x72e   : > { %v6973_v59 = vpack.c.bf16 %v2666_v20, %v2663_v42  ;;  %v2749_v8 = vmul.bf16 1056980736, %v5169_v50  ;;  %v5171_v14 = vpop.eup %5170  ;;  %v2773_v42 = vmul.bf16 %v2757_v51, %v6915_v43 }
 0x72f   : > { %v2722_v56 = vmul.bf16 1056980736, %v6971_v61  ;;  %v2766_v38 = vadd.bf16 1056980736, %v2750_v24  ;;  %v5173_v50 = vpop.eup %5172  ;;  %v2743_v2 = vmul.bf16 1056980736, %v5171_v14 }
 0x730   : > { %v2721_v32 = vmul.bf16 1056980736, %v6973_v59  ;;  %v4788_v18 = vpop.f32.mrb[128].mxu1  ;;  %v2765_v5 = vadd.bf16 1056980736, %v2749_v8 }
 0x731   : > { %5182 = vtanh.bf16 %v2722_v56  ;;  %v2678_v44 = vpop.f32.mrb[129].mxu1  ;;  %v2687_v21 = vadd.f32 %v4788_v18, %v7838_v47  ;;  %v2716_v8 = vmul.bf16 1056980736, %v6937_v40  ;;  %v2774_v18 = vmul.bf16 %v2758_v6, %v6913_v57 }
 0x732   : > { %5184 = vtanh.bf16 %v2721_v32  ;;  %v4789_v27 = vpop.f32.mrb[130].mxu1  ;;  %v2781_v20 = vmul.bf16 %v2765_v5, %v6949_v29  ;;  %v2679_v56 = vadd.f32 %v2678_v44, %v7840_v25  ;;  %v2782_v32 = vmul.bf16 %v2766_v38, %v6947_v60 }
 0x733   : > { %v2690_v33 = vadd.f32 %v4789_v27, %v7839_v63  ;;  %v2681_v39 = vpop.f32.mrb[131].mxu1  ;;  %5186 = vtanh.bf16 %v2715_v52  ;;  %v2744_v27 = vmul.bf16 1056980736, %v5173_v50  ;;  %v2759_v63 = vadd.bf16 1056980736, %v2743_v2 }
 0x734   : > { %v5175_v24 = vpop.eup %5174  ;;  %v2682_v19 = vadd.f32 %v2681_v39, %v7841_v48  ;;  %4370 = vmatprep.subr.bf16.mxu1 %v2781_v20  ;;  %5188 = vtanh.bf16 %v2716_v8 }
 0x735   : > { %v5177_v29 = vpop.eup %5176  ;;  %v6986_v5 = vpack.c.bf16 %v2690_v33, %v2687_v21  ;;  %4371 = vmatpush3.bf16.msra.mxu1 %v2773_v42  ;;  %v2752_v43 = vmul.bf16 1056980736, %v5175_v24  ;;  %v2760_v42 = vadd.bf16 1056980736, %v2744_v27  ;;  %v2775_v21 = vmul.bf16 %v2759_v63, %v6923_v17 }
 0x736   : > { %v2707_v14 = vpack.c.bf16 %v2682_v19, %v2679_v56  ;;  %4372 = vmatprep.subr.bf16.mxu1 %v2782_v32  ;;  %v2751_v51 = vmul.bf16 1056980736, %v5177_v29  ;;  %v5179_v25 = vpop.eup %5178 }
 0x737   : > { %v2724_v44 = vmul.bf16 1056980736, %v6986_v5  ;;  %v2768_v60 = vadd.bf16 1056980736, %v2752_v43  ;;  %v5181_v52 = vpop.eup %5180  ;;  %v2745_v33 = vmul.bf16 1056980736, %v5179_v25  ;;  %v2776_v8 = vmul.bf16 %v2760_v42, %v6921_v3 }
 0x738   : > { %v2723_v20 = vmul.bf16 1056980736, %v2707_v14  ;;  %v2767_v39 = vadd.bf16 1056980736, %v2751_v51  ;;  %v2746_v56 = vmul.bf16 1056980736, %v5181_v52 }
 0x739   : > { %5190 = vtanh.bf16 %v2724_v44  ;;  %4373 = vmatpush3.bf16.msra.mxu1 %v2774_v18  ;;  %v2784_v6 = vmul.bf16 %v2768_v60, %v6959_v12  ;;  %v2761_v19 = vadd.bf16 1056980736, %v2745_v33  ;;  %v5363_v33 = vld [vmem:[%s7597_s4 + $0x34] ss:$8 sps:$4 sm:$0xff]  }
 0x73a   : > { %5192 = vtanh.bf16 %v2723_v20  ;;  %v2783_v38 = vmul.bf16 %v2767_v39, %v6961_v1  ;;  %v2762_v17 = vadd.bf16 1056980736, %v2746_v56  ;;  %v5370_v56 = vld [vmem:[%s7597_s4 + $0x60] ss:$8 sps:$4 sm:$0xff]  }
 0x73b   : > { %v2777_v43 = vmul.bf16 %v2761_v19, %v6931_v45  ;;  %v5371_v19 = vld [vmem:[%s7597_s4 + $0x74] ss:$8 sps:$4 sm:$0xff]  }
 0x73c   : > { %v5183_v57 = vpop.eup %5182  ;;  %4374 = vmatprep.subr.bf16.mxu1 %v2783_v38  ;;  %v2778_v20 = vmul.bf16 %v2762_v17, %v6929_v46  ;;  %v5358_v46 = vld [vmem:[%s7597_s4] ss:$8 sps:$4 sm:$0xff]   ;;  %v5377_v17 = vld [vmem:[%s7597_s4 + $0xa4] ss:$8 sps:$4 sm:$0xff]  }
 0x73d   : > { %v5185_v50 = vpop.eup %5184  ;;  %4375 = vmatpush3.bf16.msra.mxu1 %v2775_v21  ;;  %v2754_v2 = vmul.bf16 1056980736, %v5183_v57  ;;  %v5364_v57 = vld [vmem:[%s7597_s4 + $0x30] ss:$8 sps:$4 sm:$0xff]  }
 0x73e   : > { %4376 = vmatprep.subr.bf16.mxu1 %v2784_v6  ;;  %v2753_v24 = vmul.bf16 1056980736, %v5185_v50  ;;  %v5187_v32 = vpop.eup %5186  ;;  %v5365_v6 = vld [vmem:[%s7597_s4 + $0x44] ss:$8 sps:$4 sm:$0xff]   ;;  %v5366_v50 = vld [vmem:[%s7597_s4 + $0x40] ss:$8 sps:$4 sm:$0xff]  }
 0x73f   : > { %v2770_v29 = vadd.bf16 1056980736, %v2754_v2  ;;  %v5189_v25 = vpop.eup %5188  ;;  %v2747_v12 = vmul.bf16 1056980736, %v5187_v32  ;;  %v5367_v2 = vld [vmem:[%s7597_s4 + $0x54] ss:$8 sps:$4 sm:$0xff]  }
 0x740   : > { %v2769_v1 = vadd.bf16 1056980736, %v2753_v24  ;;  %v2748_v39 = vmul.bf16 1056980736, %v5189_v25  ;;  %v5368_v24 = vld [vmem:[%s7597_s4 + $0x50] ss:$8 sps:$4 sm:$0xff]  }
 0x741   : > { %4377 = vmatpush3.bf16.msra.mxu1 %v2776_v8  ;;  %v2786_v18 = vmul.bf16 %v2770_v29, %v6971_v61  ;;  %v2763_v60 = vadd.bf16 1056980736, %v2747_v12  ;;  %v5369_v8 = vld [vmem:[%s7597_s4 + $0x64] ss:$8 sps:$4 sm:$0xff]   ;;  %v5372_v32 = vld [vmem:[%s7597_s4 + $0x70] ss:$8 sps:$4 sm:$0xff]  }
 0x742   : > { %v2785_v63 = vmul.bf16 %v2769_v1, %v6973_v59  ;;  %v2764_v42 = vadd.bf16 1056980736, %v2748_v39  ;;  %v5373_v1 = vld [vmem:[%s7597_s4 + $0x84] ss:$8 sps:$4 sm:$0xff]   ;;  %v5374_v29 = vld [vmem:[%s7597_s4 + $0x80] ss:$8 sps:$4 sm:$0xff]  }
 0x743   : > { %v2779_v45 = vmul.bf16 %v2763_v60, %v6939_v10  ;;  %v5360_v10 = vld [vmem:[%s7597_s4 + $0x10] ss:$8 sps:$4 sm:$0xff]   ;;  %v5379_v12 = vld [vmem:[%s7597_s4 + $0xb4] ss:$8 sps:$4 sm:$0xff]   ;;  %v5386_v39 = vld [vmem:[%s7597_s4 + $0xe0] ss:$8 sps:$4 sm:$0xff]  }
 0x744   : > { %v5191_v51 = vpop.eup %5190  ;;  %4378 = vmatprep.subr.bf16.mxu1 %v2785_v63  ;;  %v2780_v61 = vmul.bf16 %v2764_v42, %v6937_v40  ;;  %v5361_v40 = vld [vmem:[%s7597_s4 + $0x24] ss:$8 sps:$4 sm:$0xff]   ;;  %v5375_v63 = vld [vmem:[%s7597_s4 + $0x94] ss:$8 sps:$4 sm:$0xff]   ;;  %v5376_v25 = vld [vmem:[%s7597_s4 + $0x90] ss:$8 sps:$4 sm:$0xff]  }
 0x745   : > { %v5193_v27 = vpop.eup %5192  ;;  %4379 = vmatpush3.bf16.msra.mxu1 %v2777_v43  ;;  %v2756_v3 = vmul.bf16 1056980736, %v5191_v51  ;;  %v5378_v43 = vld [vmem:[%s7597_s4 + $0xa0] ss:$8 sps:$4 sm:$0xff]   ;;  %v5380_v51 = vld [vmem:[%s7597_s4 + $0xb0] ss:$8 sps:$4 sm:$0xff]  }
 0x746   : > { %4380 = vmatprep.subr.bf16.mxu1 %v2786_v18  ;;  %v2755_v44 = vmul.bf16 1056980736, %v5193_v27  ;;  %v5381_v18 = vld [vmem:[%s7597_s4 + $0xc4] ss:$8 sps:$4 sm:$0xff]   ;;  %v5382_v27 = vld [vmem:[%s7597_s4 + $0xc0] ss:$8 sps:$4 sm:$0xff]  }
 0x747   : > { %v2772_v59 = vadd.bf16 1056980736, %v2756_v3  ;;  %v5383_v3 = vld [vmem:[%s7597_s4 + $0xd4] ss:$8 sps:$4 sm:$0xff]  }
 0x748   : > { %v2771_v38 = vadd.bf16 1056980736, %v2755_v44  ;;  %v5384_v44 = vld [vmem:[%s7597_s4 + $0xd0] ss:$8 sps:$4 sm:$0xff]   ;;  %v5387_v60 = vld [vmem:[%s7597_s4 + $0xf4] ss:$8 sps:$4 sm:$0xff]  }
 0x749   : > { %4381 = vmatpush3.bf16.msra.mxu1 %v2778_v20  ;;  %v2788_v21 = vmul.bf16 %v2772_v59, %v6986_v5  ;;  %v5362_v5 = vld [vmem:[%s7597_s4 + $0x20] ss:$8 sps:$4 sm:$0xff]   ;;  %v5385_v20 = vld [vmem:[%s7597_s4 + $0xe4] ss:$8 sps:$4 sm:$0xff]  }
 0x74a   : > { %v2787_v52 = vmul.bf16 %v2771_v38, %v2707_v14  ;;  %v5359_v14 = vld [vmem:[%s7597_s4 + $0x14] ss:$8 sps:$4 sm:$0xff]   ;;  %v5388_v38 = vld [vmem:[%s7597_s4 + $0xf0] ss:$8 sps:$4 sm:$0xff]   ;;  %v5389_v59 = vld [vmem:[%s7599_s6 + $0x4] ss:$8 sps:$4 sm:$0xff]  }
 0x74c   : > { %4382 = vmatprep.subr.bf16.mxu1 %v2787_v52 }
 0x74d   : > { %4383 = vmatpush3.bf16.msra.mxu1 %v2779_v45 }
 0x74e   : > { %4384 = vmatprep.subr.bf16.mxu1 %v2788_v21 }
 0x751   : > { %4385 = vmatpush3.bf16.msra.mxu1 %v2780_v61 }
 0x754   : > { %2822 = vmatmul.mubr.bf16.vlgmr.msra.gmra.mrb[132].mxu1 %v5358_v46 }
 0x755   : > { %2829 = vmatprep.mubr.bf16.mxu1 %v5359_v14 }
 0x75c   : > { %2830 = vmatmul.mubr.bf16.gmra.mrb[136].mxu1 %v5360_v10 }
 0x75d   : > { %2837 = vmatprep.mubr.bf16.mxu1 %v5361_v40 }
 0x764   : > { %2838 = vmatmul.mubr.bf16.gmra.mrb[140].mxu1 %v5362_v5 }
 0x765   : > { %2845 = vmatprep.mubr.bf16.mxu1 %v5363_v33 }
 0x76c   : > { %2846 = vmatmul.mubr.bf16.gmra.mrb[144].mxu1 %v5364_v57 }
 0x76d   : > { %2853 = vmatprep.mubr.bf16.mxu1 %v5365_v6 }
 0x774   : > { %2854 = vmatmul.mubr.bf16.gmra.mrb[148].mxu1 %v5366_v50 }
 0x775   : > { %2861 = vmatprep.mubr.bf16.mxu1 %v5367_v2 }
 0x77c   : > { %2862 = vmatmul.mubr.bf16.gmra.mrb[152].mxu1 %v5368_v24 }
 0x77d   : > { %2869 = vmatprep.mubr.bf16.mxu1 %v5369_v8 }
 0x784   : > { %2870 = vmatmul.mubr.bf16.gmra.mrb[156].mxu1 %v5370_v56 }
 0x785   : > { %2877 = vmatprep.mubr.bf16.mxu1 %v5371_v19 }
 0x78c   : > { %2878 = vmatmul.mubr.bf16.gmra.mrb[160].mxu1 %v5372_v32 }
 0x78d   : > { %2885 = vmatprep.mubr.bf16.mxu1 %v5373_v1 }
 0x794   : > { %2886 = vmatmul.mubr.bf16.gmra.mrb[164].mxu1 %v5374_v29 }
 0x795   : > { %2893 = vmatprep.mubr.bf16.mxu1 %v5375_v63 }
 0x79c   : > { %2894 = vmatmul.mubr.bf16.gmra.mrb[168].mxu1 %v5376_v25 }
 0x79d   : > { %2901 = vmatprep.mubr.bf16.mxu1 %v5377_v17 }
 0x7a4   : > { %2902 = vmatmul.mubr.bf16.gmra.mrb[172].mxu1 %v5378_v43 }
 0x7a5   : > { %2909 = vmatprep.mubr.bf16.mxu1 %v5379_v12 }
 0x7ac   : > { %2910 = vmatmul.mubr.bf16.gmra.mrb[176].mxu1 %v5380_v51 }
 0x7ad   : > { %2917 = vmatprep.mubr.bf16.mxu1 %v5381_v18 }
 0x7b4   : > { %2918 = vmatmul.mubr.bf16.gmra.mrb[180].mxu1 %v5382_v27 }
 0x7b5   : > { %2925 = vmatprep.mubr.bf16.mxu1 %v5383_v3 }
 0x7bc   : > { %2926 = vmatmul.mubr.bf16.gmra.mrb[184].mxu1 %v5384_v44 }
 0x7bd   : > { %2933 = vmatprep.mubr.bf16.mxu1 %v5385_v20 }
 0x7c4   : > { %2934 = vmatmul.mubr.bf16.gmra.mrb[188].mxu1 %v5386_v39 }
 0x7c5   : > { %2941 = vmatprep.mubr.bf16.mxu1 %v5387_v60 }
 0x7cc   : > { %2942 = vmatmul.mubr.bf16.gmra.mrb[192].mxu1 %v5388_v38 }
 0x7cd   : > { %3718 = vmatprep.mubr.bf16.mxu1 %v5389_v59 }
 0x827   : > { %v4386_v52 = vpop.f32.mrb[132].mxu1 }
 0x828   : > { %v4387_v42 = vpop.f32.mrb[133].mxu1 }
 0x829   : > { %v4388_v45 = vadd.f32 %v4387_v42, %v4386_v52  ;;  %v4389_v21 = vpop.f32.mrb[134].mxu1 }
 0x82a   : > { %v4390_v61 = vpop.f32.mrb[135].mxu1 }
 0x82b   : > { %v4391_v46 = vadd.f32 %v4390_v61, %v4389_v21  ;;  %v2824_v14 = vadd.f32 %v4388_v45, %v7846_v34 }
 0x82d   : > { %v2827_v10 = vadd.f32 %v4391_v46, %v7848_v54 }
 0x82f   : > { %v7099_v40 = vpack.c.bf16 %v2827_v10, %v2824_v14  ;;  %v4392_v5 = vpop.f32.mrb[136].mxu1 }
 0x830   : > { %v4393_v33 = vpop.f32.mrb[137].mxu1 }
 0x831   : > { %v4394_v57 = vadd.f32 %v4393_v33, %v4392_v5  ;;  %v4395_v6 = vpop.f32.mrb[138].mxu1 }
 0x832   : > { %v4396_v50 = vpop.f32.mrb[139].mxu1 }
 0x833   : > { %v4397_v2 = vadd.f32 %v4396_v50, %v4395_v6  ;;  %v2832_v24 = vadd.f32 %v4394_v57, %v7850_v15 }
 0x835   : > { %v2835_v8 = vadd.f32 %v4397_v2, %v7851_v0 }
 0x837   : > { %v7103_v56 = vpack.c.bf16 %v2835_v8, %v2832_v24  ;;  %v4398_v19 = vpop.f32.mrb[140].mxu1 }
 0x838   : > { %v4399_v32 = vpop.f32.mrb[141].mxu1 }
 0x839   : > { %v4400_v1 = vadd.f32 %v4399_v32, %v4398_v19  ;;  %v4401_v29 = vpop.f32.mrb[142].mxu1 }
 0x83a   : > { %v4402_v63 = vpop.f32.mrb[143].mxu1 }
 0x83b   : > { %v4403_v25 = vadd.f32 %v4402_v63, %v4401_v29  ;;  %v2840_v17 = vadd.f32 %v4400_v1, %v7853_v35 }
 0x83d   : > { %v2843_v43 = vadd.f32 %v4403_v25, %v7854_v30 }
 0x83f   : > { %v7107_v12 = vpack.c.bf16 %v2843_v43, %v2840_v17  ;;  %v4404_v51 = vpop.f32.mrb[144].mxu1 }
 0x840   : > { %v4405_v18 = vpop.f32.mrb[145].mxu1 }
 0x841   : > { %v4406_v27 = vadd.f32 %v4405_v18, %v4404_v51  ;;  %v4407_v3 = vpop.f32.mrb[146].mxu1 }
 0x842   : > { %v4408_v44 = vpop.f32.mrb[147].mxu1 }
 0x843   : > { %v4409_v20 = vadd.f32 %v4408_v44, %v4407_v3  ;;  %v2848_v39 = vadd.f32 %v4406_v27, %v7855_v4 }
 0x845   : > { %v2851_v60 = vadd.f32 %v4409_v20, %v7856_v23 }
 0x847   : > { %v7111_v38 = vpack.c.bf16 %v2851_v60, %v2848_v39  ;;  %v4410_v59 = vpop.f32.mrb[148].mxu1 }
 0x848   : > { %v4411_v52 = vpop.f32.mrb[149].mxu1 }
 0x849   : > { %v4412_v42 = vadd.f32 %v4411_v52, %v4410_v59  ;;  %v4413_v45 = vpop.f32.mrb[150].mxu1 }
 0x84a   : > { %v4414_v21 = vpop.f32.mrb[151].mxu1 }
 0x84b   : > { %v4415_v61 = vadd.f32 %v4414_v21, %v4413_v45  ;;  %v2856_v46 = vadd.f32 %v4412_v42, %v7857_v16 }
 0x84d   : > { %v2859_v14 = vadd.f32 %v4415_v61, %v7858_v11 }
 0x84f   : > { %v7115_v10 = vpack.c.bf16 %v2859_v14, %v2856_v46  ;;  %v4416_v5 = vpop.f32.mrb[152].mxu1  ;;  %v2966_v14 = vmul.bf16 1056980736, %v7099_v40 }
 0x850   : > { %v4417_v33 = vpop.f32.mrb[153].mxu1 }
 0x851   : > { %v4418_v57 = vadd.f32 %v4417_v33, %v4416_v5  ;;  %v4419_v6 = vpop.f32.mrb[154].mxu1  ;;  %5194 = vtanh.bf16 %v2966_v14 }
 0x852   : > { %v4420_v50 = vpop.f32.mrb[155].mxu1 }
 0x853   : > { %v4421_v2 = vadd.f32 %v4420_v50, %v4419_v6  ;;  %v2864_v24 = vadd.f32 %v4418_v57, %v7859_v31  ;;  %v7896_v57 = vld [vmem:[#allocation42_spill] sm:$0xff]  ;;  %v7897_v50 = vld [vmem:[#allocation47_spill] sm:$0xff] }
 0x855   : > { %v2867_v8 = vadd.f32 %v4421_v2, %v7860_v49 }
 0x857   : > { %v7119_v19 = vpack.c.bf16 %v2867_v8, %v2864_v24  ;;  %v4422_v32 = vpop.f32.mrb[156].mxu1 }
 0x858   : > { %v4423_v1 = vpop.f32.mrb[157].mxu1 }
 0x859   : > { %v4424_v29 = vadd.f32 %v4423_v1, %v4422_v32  ;;  %v4425_v63 = vpop.f32.mrb[158].mxu1 }
 0x85a   : > { %v4426_v25 = vpop.f32.mrb[159].mxu1 }
 0x85b   : > { %v4427_v17 = vadd.f32 %v4426_v25, %v4425_v63  ;;  %v2872_v43 = vadd.f32 %v4424_v29, %v7861_v58  ;;  %v2967_v25 = vmul.bf16 1056980736, %v7103_v56 }
 0x85d   : > { %v2875_v51 = vadd.f32 %v4427_v17, %v7862_v36 }
 0x85f   : > { %v7123_v18 = vpack.c.bf16 %v2875_v51, %v2872_v43  ;;  %v4428_v27 = vpop.f32.mrb[160].mxu1  ;;  %v7898_v51 = vld [vmem:[#allocation44_spill] sm:$0xff] }
 0x860   : > { %v4429_v3 = vpop.f32.mrb[161].mxu1 }
 0x861   : > { %v4430_v44 = vadd.f32 %v4429_v3, %v4428_v27  ;;  %v4431_v20 = vpop.f32.mrb[162].mxu1  ;;  %v7899_v3 = vld [vmem:[#allocation50_spill] sm:$0xff] }
 0x862   : > { %v4432_v39 = vpop.f32.mrb[163].mxu1 }
 0x863   : > { %v4433_v60 = vadd.f32 %v4432_v39, %v4431_v20  ;;  %v2880_v59 = vadd.f32 %v4430_v44, %v7863_v28 }
 0x865   : > { %v2883_v52 = vadd.f32 %v4433_v60, %v7864_v37 }
 0x867   : > { %v7127_v42 = vpack.c.bf16 %v2883_v52, %v2880_v59  ;;  %v4434_v45 = vpop.f32.mrb[164].mxu1  ;;  %v5195_v59 = vpop.eup %5194 }
 0x868   : > { %v4435_v21 = vpop.f32.mrb[165].mxu1 }
 0x869   : > { %v4436_v61 = vadd.f32 %v4435_v21, %v4434_v45  ;;  %v4437_v46 = vpop.f32.mrb[166].mxu1 }
 0x86a   : > { %v4438_v5 = vpop.f32.mrb[167].mxu1 }
 0x86b   : > { %v4439_v33 = vadd.f32 %v4438_v5, %v4437_v46  ;;  %v2888_v6 = vadd.f32 %v4436_v61, %v7896_v57  ;;  %v2968_v61 = vmul.bf16 1056980736, %v7107_v12  ;;  %v2998_v5 = vmul.bf16 1056980736, %v5195_v59 }
 0x86c   : > { %v2969_v59 = vmul.bf16 1056980736, %v7111_v38 }
 0x86d   : > { %v2891_v2 = vadd.f32 %v4439_v33, %v7897_v50  ;;  %v7900_v33 = vld [vmem:[#allocation46_spill] sm:$0xff] }
 0x86f   : > { %v2958_v24 = vpack.c.bf16 %v2891_v2, %v2888_v6  ;;  %v4440_v8 = vpop.f32.mrb[168].mxu1  ;;  %v7901_v2 = vld [vmem:[#allocation54_spill] sm:$0xff] }
 0x870   : > { %v4441_v32 = vpop.f32.mrb[169].mxu1 }
 0x871   : > { %v2974_v1 = vmul.bf16 1056980736, %v2958_v24  ;;  %v4442_v29 = vadd.f32 %v4441_v32, %v4440_v8  ;;  %v4443_v63 = vpop.f32.mrb[170].mxu1 }
 0x872   : > { %v4444_v17 = vpop.f32.mrb[171].mxu1 }
 0x873   : > { %5196 = vtanh.bf16 %v2974_v1  ;;  %v4445_v43 = vadd.f32 %v4444_v17, %v4443_v63  ;;  %v2896_v27 = vadd.f32 %v4442_v29, %v7898_v51 }
 0x874   : > { %5198 = vtanh.bf16 %v2967_v25  ;;  %v3014_v25 = vadd.bf16 1056980736, %v2998_v5 }
 0x875   : > { %v2899_v44 = vadd.f32 %v4445_v43, %v7899_v3 }
 0x877   : > { %v2959_v20 = vpack.c.bf16 %v2899_v44, %v2896_v27  ;;  %v4446_v39 = vpop.f32.mrb[172].mxu1 }
 0x878   : > { %v4447_v60 = vpop.f32.mrb[173].mxu1 }
 0x879   : > { %v2975_v52 = vmul.bf16 1056980736, %v2959_v20  ;;  %v4448_v45 = vadd.f32 %v4447_v60, %v4446_v39  ;;  %v4449_v21 = vpop.f32.mrb[174].mxu1 }
 0x87a   : > { %v4450_v46 = vpop.f32.mrb[175].mxu1 }
 0x87b   : > { %5200 = vtanh.bf16 %v2975_v52  ;;  %v4451_v14 = vadd.f32 %v4450_v46, %v4449_v21  ;;  %v2904_v6 = vadd.f32 %v4448_v45, %v7900_v33 }
 0x87c   : > { %5202 = vtanh.bf16 %v2968_v61  ;;  %v3030_v61 = vmul.bf16 %v3014_v25, %v7099_v40 }
 0x87d   : > { %v2907_v8 = vadd.f32 %v4451_v14, %v7901_v2  ;;  %v7902_v14 = vld [vmem:[#allocation51_spill] sm:$0xff] }
 0x87e   : > { %v5197_v32 = vpop.eup %5196 }
 0x87f   : > { %v7138_v1 = vpack.c.bf16 %v2907_v8, %v2904_v6  ;;  %v4452_v29 = vpop.f32.mrb[176].mxu1  ;;  %v3006_v63 = vmul.bf16 1056980736, %v5197_v32  ;;  %v5199_v43 = vpop.eup %5198  ;;  %v7903_v8 = vld [vmem:[#allocation53_spill] sm:$0xff] }
 0x880   : > { %v4453_v17 = vpop.f32.mrb[177].mxu1  ;;  %v2999_v46 = vmul.bf16 1056980736, %v5199_v43  ;;  %v2970_v43 = vmul.bf16 1056980736, %v7115_v10 }
 0x881   : > { %v2976_v27 = vmul.bf16 1056980736, %v7138_v1  ;;  %v4454_v44 = vadd.f32 %v4453_v17, %v4452_v29  ;;  %v4455_v39 = vpop.f32.mrb[178].mxu1  ;;  %v3022_v60 = vadd.bf16 1056980736, %v3006_v63 }
 0x882   : > { %v4456_v52 = vpop.f32.mrb[179].mxu1  ;;  %v3015_v2 = vadd.bf16 1056980736, %v2999_v46 }
 0x883   : > { %5204 = vtanh.bf16 %v2976_v27  ;;  %v4457_v45 = vadd.f32 %v4456_v52, %v4455_v39  ;;  %v3038_v21 = vmul.bf16 %v3022_v60, %v2958_v24  ;;  %v2912_v6 = vadd.f32 %v4454_v44, %v7902_v14 }
 0x884   : > { %5206 = vtanh.bf16 %v2969_v59  ;;  %v3031_v59 = vmul.bf16 %v3015_v2, %v7103_v56 }
 0x885   : > { %v2915_v5 = vadd.f32 %v4457_v45, %v7903_v8  ;;  %4482 = vmatprep.subr.bf16.mxu0 %v3038_v21  ;;  %v7904_v21 = vld [vmem:[#allocation58_spill] sm:$0xff] }
 0x886   : > { %v5201_v32 = vpop.eup %5200  ;;  %4483 = vmatpush3.bf16.msra.mxu0 %v3030_v61 }
 0x887   : > { %v7145_v29 = vpack.c.bf16 %v2915_v5, %v2912_v6  ;;  %v4458_v63 = vpop.f32.mrb[180].mxu1  ;;  %v3007_v17 = vmul.bf16 1056980736, %v5201_v32  ;;  %v5203_v27 = vpop.eup %5202  ;;  %v7905_v6 = vld [vmem:[#allocation59_spill] sm:$0xff] }
 0x888   : > { %v4459_v33 = vpop.f32.mrb[181].mxu1  ;;  %v3000_v45 = vmul.bf16 1056980736, %v5203_v27  ;;  %v2971_v27 = vmul.bf16 1056980736, %v7119_v19 }
 0x889   : > { %v2977_v24 = vmul.bf16 1056980736, %v7145_v29  ;;  %v4460_v39 = vadd.f32 %v4459_v33, %v4458_v63  ;;  %v4461_v40 = vpop.f32.mrb[182].mxu1  ;;  %v3023_v25 = vadd.bf16 1056980736, %v3007_v17 }
 0x88a   : > { %v4462_v44 = vpop.f32.mrb[183].mxu1  ;;  %v3016_v17 = vadd.bf16 1056980736, %v3000_v45  ;;  %v7907_v45 = vld [vmem:[#allocation62_spill] sm:$0xff] }
 0x88b   : > { %5208 = vtanh.bf16 %v2977_v24  ;;  %v4463_v60 = vadd.f32 %v4462_v44, %v4461_v40  ;;  %v3039_v52 = vmul.bf16 %v3023_v25, %v2959_v20  ;;  %v2920_v61 = vadd.f32 %v4460_v39, %v7904_v21 }
 0x88c   : > { %5210 = vtanh.bf16 %v2970_v43  ;;  %v3032_v44 = vmul.bf16 %v3016_v17, %v7107_v12  ;;  %v2972_v12 = vmul.bf16 1056980736, %v7123_v18 }
 0x88d   : > { %v2923_v46 = vadd.f32 %v4463_v60, %v7905_v6  ;;  %4484 = vmatprep.subr.bf16.mxu0 %v3039_v52  ;;  %v7906_v52 = vld [vmem:[#allocation63_spill] sm:$0xff] }
 0x88e   : > { %v5205_v5 = vpop.eup %5204  ;;  %4485 = vmatpush3.bf16.msra.mxu0 %v3031_v59 }
 0x88f   : > { %v7152_v33 = vpack.c.bf16 %v2923_v46, %v2920_v61  ;;  %v4464_v32 = vpop.f32.mrb[184].mxu1  ;;  %v3008_v63 = vmul.bf16 1056980736, %v5205_v5  ;;  %v5207_v24 = vpop.eup %5206 }
 0x890   : > { %v4465_v8 = vpop.f32.mrb[185].mxu1  ;;  %v3001_v60 = vmul.bf16 1056980736, %v5207_v24 }
 0x891   : > { %v2978_v20 = vmul.bf16 1056980736, %v7152_v33  ;;  %v4466_v40 = vadd.f32 %v4465_v8, %v4464_v32  ;;  %v4467_v56 = vpop.f32.mrb[186].mxu1  ;;  %v3024_v2 = vadd.bf16 1056980736, %v3008_v63 }
 0x892   : > { %v4468_v39 = vpop.f32.mrb[187].mxu1  ;;  %v3017_v63 = vadd.bf16 1056980736, %v3001_v60 }
 0x893   : > { %5212 = vtanh.bf16 %v2978_v20  ;;  %v4469_v25 = vadd.f32 %v4468_v39, %v4467_v56  ;;  %v3040_v43 = vmul.bf16 %v3024_v2, %v7138_v1  ;;  %v2928_v59 = vadd.f32 %v4466_v40, %v7906_v52 }
 0x894   : > { %5214 = vtanh.bf16 %v2971_v27  ;;  %v3033_v27 = vmul.bf16 %v3017_v63, %v7111_v38  ;;  %v2973_v38 = vmul.bf16 1056980736, %v7127_v42 }
 0x895   : > { %v2931_v61 = vadd.f32 %v4469_v25, %v7907_v45  ;;  %4486 = vmatprep.subr.bf16.mxu0 %v3040_v43  ;;  %v7908_v43 = vld [vmem:[#allocation67_spill] sm:$0xff] }
 0x896   : > { %v5209_v46 = vpop.eup %5208  ;;  %4487 = vmatpush3.bf16.msra.mxu0 %v3032_v44 }
 0x897   : > { %v2963_v8 = vpack.c.bf16 %v2931_v61, %v2928_v59  ;;  %v4470_v5 = vpop.f32.mrb[188].mxu1  ;;  %v3009_v32 = vmul.bf16 1056980736, %v5209_v46  ;;  %v5211_v20 = vpop.eup %5210  ;;  %v7909_v59 = vld [vmem:[#allocation66_spill] sm:$0xff] }
 0x898   : > { %v4471_v6 = vpop.f32.mrb[189].mxu1  ;;  %v3002_v25 = vmul.bf16 1056980736, %v5211_v20 }
 0x899   : > { %v2979_v56 = vmul.bf16 1056980736, %v2963_v8  ;;  %v4472_v39 = vadd.f32 %v4471_v6, %v4470_v5  ;;  %v4473_v1 = vpop.f32.mrb[190].mxu1  ;;  %v3025_v2 = vadd.bf16 1056980736, %v3009_v32 }
 0x89a   : > { %v4474_v17 = vpop.f32.mrb[191].mxu1  ;;  %v3018_v32 = vadd.bf16 1056980736, %v3002_v25 }
 0x89b   : > { %5216 = vtanh.bf16 %v2979_v56  ;;  %v4475_v24 = vadd.f32 %v4474_v17, %v4473_v1  ;;  %v3041_v40 = vmul.bf16 %v3025_v2, %v7145_v29  ;;  %v2936_v44 = vadd.f32 %v4472_v39, %v7908_v43 }
 0x89c   : > { %5218 = vtanh.bf16 %v2972_v12  ;;  %v3034_v12 = vmul.bf16 %v3018_v32, %v7115_v10 }
 0x89d   : > { %v2939_v60 = vadd.f32 %v4475_v24, %v7909_v59  ;;  %4488 = vmatprep.subr.bf16.mxu0 %v3041_v40  ;;  %v7910_v40 = vld [vmem:[#allocation70_spill] sm:$0xff] }
 0x89e   : > { %v5213_v61 = vpop.eup %5212  ;;  %4489 = vmatpush3.bf16.msra.mxu0 %v3033_v27 }
 0x89f   : > { %v2964_v6 = vpack.c.bf16 %v2939_v60, %v2936_v44  ;;  %v4476_v46 = vpop.f32.mrb[192].mxu1  ;;  %v3010_v5 = vmul.bf16 1056980736, %v5213_v61  ;;  %v5215_v56 = vpop.eup %5214  ;;  %v7911_v44 = vld [vmem:[#allocation71_spill] sm:$0xff] }
 0x8a0   : > { %v4477_v45 = vpop.f32.mrb[193].mxu1  ;;  %v3003_v24 = vmul.bf16 1056980736, %v5215_v56 }
 0x8a1   : > { %v2980_v1 = vmul.bf16 1056980736, %v2964_v6  ;;  %v4478_v17 = vadd.f32 %v4477_v45, %v4476_v46  ;;  %v4479_v29 = vpop.f32.mrb[194].mxu1  ;;  %v3026_v2 = vadd.bf16 1056980736, %v3010_v5 }
 0x8a2   : > { %v4480_v63 = vpop.f32.mrb[195].mxu1  ;;  %v3019_v46 = vadd.bf16 1056980736, %v3003_v24 }
 0x8a3   : > { %5220 = vtanh.bf16 %v2980_v1  ;;  %v4481_v20 = vadd.f32 %v4480_v63, %v4479_v29  ;;  %v3042_v39 = vmul.bf16 %v3026_v2, %v7152_v33  ;;  %v2944_v27 = vadd.f32 %v4478_v17, %v7910_v40 }
 0x8a4   : > { %5222 = vtanh.bf16 %v2973_v38  ;;  %v3035_v33 = vmul.bf16 %v3019_v46, %v7119_v19  ;;  %v7915_v46 = vld [vmem:[#allocation78_spill] sm:$0xff] }
 0x8a5   : > { %v2947_v25 = vadd.f32 %v4481_v20, %v7911_v44  ;;  %4490 = vmatprep.subr.bf16.mxu0 %v3042_v39  ;;  %v7940_v44 = vld [vmem:[#allocation35_spill] sm:$0xff] }
 0x8a6   : > { %v5217_v60 = vpop.eup %5216  ;;  %4491 = vmatpush3.bf16.msra.mxu0 %v3034_v12 }
 0x8a7   : > { %v2965_v45 = vpack.c.bf16 %v2947_v25, %v2944_v27  ;;  %v3011_v61 = vmul.bf16 1056980736, %v5217_v60  ;;  %v5219_v5 = vpop.eup %5218  ;;  %v7912_v25 = vld [vmem:[#allocation39_spill] sm:$0xff] }
 0x8a8   : > { %v3004_v10 = vmul.bf16 1056980736, %v5219_v5  ;;  %v7913_v60 = vld [vmem:[#allocation79_spill] sm:$0xff] }
 0x8a9   : > { %v2981_v59 = vmul.bf16 1056980736, %v2965_v45  ;;  %v3027_v1 = vadd.bf16 1056980736, %v3011_v61  ;;  %v5393_v61 = vld [vmem:[%s7595_s2] sm:$0xff]   ;;  %v5394_v5 = vld [vmem:[%s7595_s2 + $0x8] sm:$0xff]  }
 0x8aa   : > { %v3020_v17 = vadd.bf16 1056980736, %v3004_v10  ;;  %v5398_v10 = vld [vmem:[%s7595_s2 + $0x28] sm:$0xff]  }
 0x8ab   : > { %5224 = vtanh.bf16 %v2981_v59  ;;  %v3043_v29 = vmul.bf16 %v3027_v1, %v2963_v8  ;;  %v5395_v1 = vld [vmem:[%s7595_s2 + $0x10] sm:$0xff]  }
 0x8ac   : > { %v3036_v20 = vmul.bf16 %v3020_v17, %v7123_v18  ;;  %v5391_v18 = vld [vmem:[%s7599_s6 + $0x14] ss:$8 sps:$4 sm:$0xff]   ;;  %v5401_v17 = vld [vmem:[%s7595_s2 + $0x40] sm:$0xff]  }
 0x8ad   : > { %4492 = vmatprep.subr.bf16.mxu0 %v3043_v29  ;;  %v5396_v29 = vld [vmem:[%s7595_s2 + $0x18] sm:$0xff]  }
 0x8ae   : > { %v5221_v32 = vpop.eup %5220  ;;  %4493 = vmatpush3.bf16.msra.mxu0 %v3035_v33  ;;  %v5397_v33 = vld [vmem:[%s7595_s2 + $0x20] sm:$0xff]  }
 0x8af   : > { %v3012_v56 = vmul.bf16 1056980736, %v5221_v32  ;;  %v5223_v2 = vpop.eup %5222  ;;  %v5399_v32 = vld [vmem:[%s7595_s2 + $0x30] sm:$0xff]  }
 0x8b0   : > { %v3005_v39 = vmul.bf16 1056980736, %v5223_v2  ;;  %v5402_v2 = vld [vmem:[%s7595_s2 + $0x48] sm:$0xff]  }
 0x8b1   : > { %v3028_v63 = vadd.bf16 1056980736, %v3012_v56  ;;  %v5400_v56 = vld [vmem:[%s7595_s2 + $0x38] sm:$0xff]  }
 0x8b2   : > { %v3021_v59 = vadd.bf16 1056980736, %v3005_v39  ;;  %v5406_v39 = vld [vmem:[%s7595_s2 + $0x68] sm:$0xff]  }
 0x8b3   : > { %v3044_v38 = vmul.bf16 %v3028_v63, %v2964_v6  ;;  %v5390_v6 = vld [vmem:[%s7599_s6] ss:$8 sps:$4 sm:$0xff]   ;;  %v5403_v63 = vld [vmem:[%s7595_s2 + $0x50] sm:$0xff]  }
 0x8b4   : > { %v3037_v19 = vmul.bf16 %v3021_v59, %v7127_v42  ;;  %v7914_v42 = vld [vmem:[#allocation34_spill] sm:$0xff] }
 0x8b5   : > { %4494 = vmatprep.subr.bf16.mxu0 %v3044_v38  ;;  %v5404_v38 = vld [vmem:[%s7595_s2 + $0x58] sm:$0xff]   ;;  %v5409_v59 = vld [vmem:[%s7597_s4 + $0x4] ss:$8 sps:$4 sm:$0xff]  }
 0x8b6   : > { %v5225_v12 = vpop.eup %5224  ;;  %4495 = vmatpush3.bf16.msra.mxu0 %v3036_v20  ;;  %v5405_v20 = vld [vmem:[%s7595_s2 + $0x60] sm:$0xff]  }
 0x8b7   : > { %v3013_v24 = vmul.bf16 1056980736, %v5225_v12  ;;  %v5407_v12 = vld [vmem:[%s7595_s2 + $0x70] sm:$0xff]  }
 0x8b9   : > { %v3029_v8 = vadd.bf16 1056980736, %v3013_v24  ;;  %v5408_v24 = vld [vmem:[%s7595_s2 + $0x78] sm:$0xff]  }
 0x8bb   : > { %v3045_v27 = vmul.bf16 %v3029_v8, %v2965_v45  ;;  %v5392_v45 = vld [vmem:[%s7599_s6 + $0x10] ss:$8 sps:$4 sm:$0xff]  }
 0x8bd   : > { %4496 = vmatprep.subr.bf16.mxu0 %v3045_v27 }
 0x8be   : > { %4497 = vmatpush3.bf16.msra.mxu0 %v3037_v19 }
 0x8bf   : > { %4790 = vmatprep.subr.bf16.mxu0 %v7912_v25 }
 0x8c1   : > { %3079 = vmatmul.mubr.bf16.vlgmr.msra.gmra.mrb[108].mxu0 %v5390_v6 }
 0x8c2   : > { %4791 = vmatpush3.bf16.msra.mxu0 %v7912_v25  ;;  %3086 = vmatprep.mubr.bf16.mxu0 %v5391_v18 }
 0x8c3   : > { %4792 = vmatprep.subr.bf16.mxu0 %v7913_v60 }
 0x8c6   : > { %4793 = vmatpush3.bf16.msra.mxu0 %v7913_v60 }
 0x8c7   : > { %4794 = vmatprep.subr.bf16.mxu0 %v7914_v42 }
 0x8c9   : > { %3087 = vmatmul.mubr.bf16.gmra.mrb[112].mxu0 %v5392_v45 }
 0x8ca   : > { %4795 = vmatpush3.bf16.msra.mxu0 %v7914_v42  ;;  %4798 = vmatprep.mubr.msk.bf16.mxu0 %vm840_vm0, %v5393_v61 }
 0x8cb   : > { %4796 = vmatprep.subr.bf16.mxu0 %v7915_v46 }
 0x8ce   : > { %4797 = vmatpush3.bf16.msra.mxu0 %v7915_v46 }
 0x8d1   : > { %4799 = vmatmul.mubr.msk.bf16.vlgmr.msra.gmra.mrb[116].mxu0 %vm840_vm0, %v5394_v5 }
 0x8d2   : > { %4802 = vmatprep.mubr.msk.bf16.mxu0 %vm840_vm0, %v5395_v1 }
 0x8d9   : > { %4803 = vmatmul.mubr.msk.bf16.gmra.mrb[120].mxu0 %vm840_vm0, %v5396_v29 }
 0x8da   : > { %4806 = vmatprep.mubr.msk.bf16.mxu0 %vm840_vm0, %v5397_v33 }
 0x8e1   : > { %4807 = vmatmul.mubr.msk.bf16.gmra.mrb[124].mxu0 %vm840_vm0, %v5398_v10 }
 0x8e2   : > { %4810 = vmatprep.mubr.msk.bf16.mxu0 %vm840_vm0, %v5399_v32 }
 0x8e9   : > { %4811 = vmatmul.mubr.msk.bf16.gmra.mrb[128].mxu0 %vm840_vm0, %v5400_v56 }
 0x8ea   : > { %4814 = vmatprep.mubr.msk.bf16.mxu0 %vm840_vm0, %v5401_v17 }
 0x8f1   : > { %4815 = vmatmul.mubr.msk.bf16.gmra.mrb[132].mxu0 %vm840_vm0, %v5402_v2 }
 0x8f2   : > { %4818 = vmatprep.mubr.msk.bf16.mxu0 %vm840_vm0, %v5403_v63 }
 0x8f9   : > { %4819 = vmatmul.mubr.msk.bf16.gmra.mrb[136].mxu0 %vm840_vm0, %v5404_v38 }
 0x8fa   : > { %4822 = vmatprep.mubr.msk.bf16.mxu0 %vm840_vm0, %v5405_v20 }
 0x901   : > { %4823 = vmatmul.mubr.msk.bf16.gmra.mrb[140].mxu0 %vm840_vm0, %v5406_v39 }
 0x902   : > { %4826 = vmatprep.mubr.msk.bf16.mxu0 %vm840_vm0, %v5407_v12 }
 0x909   : > { %4827 = vmatmul.mubr.msk.bf16.gmra.mrb[144].mxu0 %vm840_vm0, %v5408_v24 }
 0x90a   : > { %3461 = vmatprep.mubr.bf16.mxu0 %v5409_v59 }
 0x994   : > { %v4498_v8 = vpop.f32.mrb[108].mxu0 }
 0x995   : > { %v4499_v27 = vpop.f32.mrb[109].mxu0 }
 0x996   : > { %v4500_v19 = vadd.f32 %v4499_v27, %v4498_v8  ;;  %v4501_v25 = vpop.f32.mrb[110].mxu0 }
 0x997   : > { %v4502_v6 = vpop.f32.mrb[111].mxu0 }
 0x998   : > { %v3081_v18 = vadd.f32 %v4500_v19, %v6492_v7  ;;  %v4503_v60 = vadd.f32 %v4502_v6, %v4501_v25  ;;  %v7916_v19 = vld [vmem:[#allocation25_spill] sm:$0xff]  ;;  %v7917_v6 = vld [vmem:[#allocation24_spill] sm:$0xff] }
 0x99a   : > { %3095 = vst [vmem:[%s6497_s22 + $0x10] sm:$0xff] %v3081_v18  ;;  %v3084_v42 = vadd.f32 %v4503_v60, %v6494_v13 }
 0x99c   : > { %4002 = vst [vmem:[%s6497_s22 + $0x30] sm:$0xff] %v3084_v42  ;;  %v4504_v45 = vpop.f32.mrb[112].mxu0 }
 0x99d   : > { %v4505_v61 = vpop.f32.mrb[113].mxu0 }
 0x99e   : > { %v4506_v46 = vadd.f32 %v4505_v61, %v4504_v45  ;;  %v4507_v5 = vpop.f32.mrb[114].mxu0 }
 0x99f   : > { %v4508_v1 = vpop.f32.mrb[115].mxu0 }
 0x9a0   : > { %v3089_v29 = vadd.f32 %v4506_v46, %v6502_v62  ;;  %v4509_v33 = vadd.f32 %v4508_v1, %v4507_v5  ;;  %v7920_v1 = vld [vmem:[#allocation33_spill] sm:$0xff] }
 0x9a2   : > { %4003 = vst [vmem:[%s6497_s22 + $0x50] sm:$0xff] %v3089_v29  ;;  %v3092_v10 = vadd.f32 %v4509_v33, %v7867_v53  ;;  %v7921_v33 = vld [vmem:[#allocation32_spill] sm:$0xff] }
 0x9a4   : > { %4004 = vst [vmem:[%s6497_s22 + $0x70] sm:$0xff] %v3092_v10  ;;  %v4800_v32 = vpop.f32.mrb[116].mxu0 }
 0x9a5   : > { %v3206_v56 = vpop.f32.mrb[117].mxu0  ;;  %v3215_v2 = vadd.f32 %v4800_v32, %v7868_v26  ;;  %v7918_v26 = vld [vmem:[#allocation21_spill] sm:$0xff] }
 0x9a6   : > { %v4801_v17 = vpop.f32.mrb[118].mxu0  ;;  %v3207_v20 = vadd.f32 %v3206_v56, %v7870_v9  ;;  %v7922_v56 = vld [vmem:[#allocation29_spill] sm:$0xff] }
 0x9a7   : > { %v3218_v63 = vadd.f32 %v4801_v17, %v7869_v22  ;;  %v3209_v38 = vpop.f32.mrb[119].mxu0  ;;  %v7919_v22 = vld [vmem:[#allocation20_spill] sm:$0xff] }
 0x9a8   : > { %v3210_v39 = vadd.f32 %v3209_v38, %v7871_v41 }
 0x9a9   : > { %v7269_v12 = vpack.c.bf16 %v3218_v63, %v3215_v2  ;;  %v7923_v2 = vld [vmem:[#allocation28_spill] sm:$0xff] }
 0x9aa   : > { %v7271_v24 = vpack.c.bf16 %v3210_v39, %v3207_v20 }
 0x9ac   : > { %v4804_v59 = vpop.f32.mrb[120].mxu0 }
 0x9ad   : > { %v3222_v8 = vpop.f32.mrb[121].mxu0  ;;  %v3231_v25 = vadd.f32 %v4804_v59, %v7916_v19 }
 0x9ae   : > { %v4805_v27 = vpop.f32.mrb[122].mxu0  ;;  %v3223_v42 = vadd.f32 %v3222_v8, %v7918_v26 }
 0x9af   : > { %v3234_v18 = vadd.f32 %v4805_v27, %v7917_v6  ;;  %v3225_v60 = vpop.f32.mrb[123].mxu0  ;;  %v7924_v27 = vld [vmem:[#allocation41_spill] sm:$0xff] }
 0x9b0   : > { %v3226_v45 = vadd.f32 %v3225_v60, %v7919_v22  ;;  %v7926_v60 = vld [vmem:[#allocation37_spill] sm:$0xff] }
 0x9b1   : > { %v7277_v61 = vpack.c.bf16 %v3234_v18, %v3231_v25  ;;  %v7925_v25 = vld [vmem:[#allocation40_spill] sm:$0xff] }
 0x9b2   : > { %v7279_v9 = vpack.c.bf16 %v3226_v45, %v3223_v42  ;;  %v7927_v42 = vld [vmem:[#allocation36_spill] sm:$0xff] }
 0x9b4   : > { %v4808_v41 = vpop.f32.mrb[124].mxu0 }
 0x9b5   : > { %v3238_v46 = vpop.f32.mrb[125].mxu0  ;;  %v3247_v29 = vadd.f32 %v4808_v41, %v7920_v1 }
 0x9b6   : > { %v4809_v5 = vpop.f32.mrb[126].mxu0  ;;  %v3239_v17 = vadd.f32 %v3238_v46, %v7922_v56 }
 0x9b7   : > { %v3250_v10 = vadd.f32 %v4809_v5, %v7921_v33  ;;  %v3241_v32 = vpop.f32.mrb[127].mxu0  ;;  %v3349_v5 = vmul.bf16 1056980736, %v7271_v24  ;;  %v7928_v33 = vld [vmem:[#allocation15_spill] sm:$0xff] }
 0x9b8   : > { %v3242_v63 = vadd.f32 %v3241_v32, %v7923_v2  ;;  %v7929_v32 = vld [vmem:[#allocation14_spill] sm:$0xff]  ;;  %v3350_v2 = vmul.bf16 1056980736, %v7269_v12 }
 0x9b9   : > { %v7285_v38 = vpack.c.bf16 %v3250_v10, %v3247_v29  ;;  %5226 = vtanh.bf16 %v3349_v5 }
 0x9ba   : > { %v7287_v20 = vpack.c.bf16 %v3242_v63, %v3239_v17  ;;  %v7930_v63 = vld [vmem:[#allocation10_spill] sm:$0xff]  ;;  %5228 = vtanh.bf16 %v3350_v2 }
 0x9bc   : > { %v4812_v39 = vpop.f32.mrb[128].mxu0 }
 0x9bd   : > { %v3254_v59 = vpop.f32.mrb[129].mxu0  ;;  %v3263_v19 = vadd.f32 %v4812_v39, %v7924_v27 }
 0x9be   : > { %v4813_v8 = vpop.f32.mrb[130].mxu0  ;;  %v3255_v26 = vadd.f32 %v3254_v59, %v7926_v60  ;;  %v7931_v59 = vld [vmem:[#allocation11_spill] sm:$0xff]  ;;  %v3351_v60 = vmul.bf16 1056980736, %v7279_v9 }
 0x9bf   : > { %v3266_v6 = vadd.f32 %v4813_v8, %v7925_v25  ;;  %v3257_v18 = vpop.f32.mrb[131].mxu0 }
 0x9c0   : > { %v3258_v22 = vadd.f32 %v3257_v18, %v7927_v42 }
 0x9c1   : > { %v7293_v45 = vpack.c.bf16 %v3266_v6, %v3263_v19 }
 0x9c2   : > { %v7295_v41 = vpack.c.bf16 %v3258_v22, %v3255_v26  ;;  %v7932_v22 = vld [vmem:[#allocation23_spill] sm:$0xff] }
 0x9c4   : > { %v4816_v46 = vpop.f32.mrb[132].mxu0 }
 0x9c5   : > { %v3270_v1 = vpop.f32.mrb[133].mxu0  ;;  %v3279_v10 = vadd.f32 %v4816_v46, %v7928_v33  ;;  %v3352_v33 = vmul.bf16 1056980736, %v7277_v61 }
 0x9c6   : > { %v4817_v29 = vpop.f32.mrb[134].mxu0  ;;  %v3271_v39 = vadd.f32 %v3270_v1, %v7930_v63  ;;  %v7933_v1 = vld [vmem:[#allocation22_spill] sm:$0xff] }
 0x9c7   : > { %v3282_v56 = vadd.f32 %v4817_v29, %v7929_v32  ;;  %v3273_v17 = vpop.f32.mrb[135].mxu0 }
 0x9c8   : > { %v3274_v8 = vadd.f32 %v3273_v17, %v7931_v59  ;;  %v5227_v59 = vpop.eup %5226 }
 0x9c9   : > { %v7303_v27 = vpack.c.bf16 %v3282_v56, %v3279_v10  ;;  %v7934_v10 = vld [vmem:[#allocation19_spill] sm:$0xff]  ;;  %v7935_v56 = vld [vmem:[#allocation18_spill] sm:$0xff] }
 0x9ca   : > { %v7305_v19 = vpack.c.bf16 %v3274_v8, %v3271_v39 }
 0x9cb   : > { %v3358_v25 = vmul.bf16 1056980736, %v7303_v27 }
 0x9cc   : > { %v3357_v6 = vmul.bf16 1056980736, %v7305_v19  ;;  %v4820_v18 = vpop.f32.mrb[136].mxu0 }
 0x9cd   : > { %5230 = vtanh.bf16 %v3358_v25  ;;  %v3286_v26 = vpop.f32.mrb[137].mxu0  ;;  %v3295_v46 = vadd.f32 %v4820_v18, %v7932_v22  ;;  %v3381_v22 = vmul.bf16 1056980736, %v5227_v59 }
 0x9ce   : > { %5232 = vtanh.bf16 %v3357_v6  ;;  %v4821_v42 = vpop.f32.mrb[138].mxu0  ;;  %v3287_v32 = vadd.f32 %v3286_v26, %v7934_v10  ;;  %v3353_v6 = vmul.bf16 1056980736, %v7287_v20 }
 0x9cf   : > { %v3298_v5 = vadd.f32 %v4821_v42, %v7933_v1  ;;  %v3289_v29 = vpop.f32.mrb[139].mxu0  ;;  %5234 = vtanh.bf16 %v3351_v60  ;;  %v5229_v42 = vpop.eup %5228  ;;  %v7936_v60 = vld [vmem:[#allocation31_spill] sm:$0xff]  ;;  %v7937_v1 = vld [vmem:[#allocation30_spill] sm:$0xff] }
 0x9d0   : > { %v3290_v17 = vadd.f32 %v3289_v29, %v7935_v56  ;;  %5236 = vtanh.bf16 %v3352_v33  ;;  %v7938_v33 = vld [vmem:[#allocation27_spill] sm:$0xff]  ;;  %v3382_v62 = vmul.bf16 1056980736, %v5229_v42 }
 0x9d1   : > { %v7315_v2 = vpack.c.bf16 %v3298_v5, %v3295_v46 }
 0x9d2   : > { %v7317_v63 = vpack.c.bf16 %v3290_v17, %v3287_v32  ;;  %v3354_v32 = vmul.bf16 1056980736, %v7285_v38 }
 0x9d3   : > { %v3360_v39 = vmul.bf16 1056980736, %v7315_v2 }
 0x9d4   : > { %v3359_v8 = vmul.bf16 1056980736, %v7317_v63  ;;  %v4824_v25 = vpop.f32.mrb[140].mxu0 }
 0x9d5   : > { %5238 = vtanh.bf16 %v3360_v39  ;;  %v3302_v18 = vpop.f32.mrb[141].mxu0  ;;  %v3311_v46 = vadd.f32 %v4824_v25, %v7936_v60  ;;  %v3397_v25 = vadd.bf16 1056980736, %v3381_v22 }
 0x9d6   : > { %5240 = vtanh.bf16 %v3359_v8  ;;  %v4825_v26 = vpop.f32.mrb[142].mxu0  ;;  %v3303_v56 = vadd.f32 %v3302_v18, %v7938_v33 }
 0x9d7   : > { %v3314_v5 = vadd.f32 %v4825_v26, %v7937_v1  ;;  %v3305_v29 = vpop.f32.mrb[143].mxu0  ;;  %5242 = vtanh.bf16 %v3353_v6  ;;  %v3413_v22 = vmul.bf16 %v3397_v25, %v7271_v24 }
 0x9d8   : > { %v5231_v10 = vpop.eup %5230  ;;  %v3306_v17 = vadd.f32 %v3305_v29, %v7895_v55  ;;  %5244 = vtanh.bf16 %v3354_v32  ;;  %v3355_v55 = vmul.bf16 1056980736, %v7295_v41  ;;  %v7939_v32 = vld [vmem:[#allocation38_spill] sm:$0xff] }
 0x9d9   : > { %v5233_v53 = vpop.eup %5232  ;;  %v7327_v39 = vpack.c.bf16 %v3314_v5, %v3311_v46  ;;  %v3390_v8 = vmul.bf16 1056980736, %v5231_v10  ;;  %v3398_v46 = vadd.bf16 1056980736, %v3382_v62 }
 0x9da   : > { %v7329_v13 = vpack.c.bf16 %v3306_v17, %v3303_v56  ;;  %v3389_v59 = vmul.bf16 1056980736, %v5233_v53  ;;  %v5235_v1 = vpop.eup %5234 }
 0x9db   : > { %v3362_v26 = vmul.bf16 1056980736, %v7327_v39  ;;  %v3406_v60 = vadd.bf16 1056980736, %v3390_v8  ;;  %v5237_v53 = vpop.eup %5236  ;;  %v3383_v29 = vmul.bf16 1056980736, %v5235_v1  ;;  %v3414_v1 = vmul.bf16 %v3398_v46, %v7269_v12 }
 0x9dc   : > { %v3361_v7 = vmul.bf16 1056980736, %v7329_v13  ;;  %v4828_v18 = vpop.f32.mrb[144].mxu0  ;;  %v3405_v33 = vadd.bf16 1056980736, %v3389_v59 }
 0x9dd   : > { %5246 = vtanh.bf16 %v3362_v26  ;;  %v3318_v6 = vpop.f32.mrb[145].mxu0  ;;  %v3327_v10 = vadd.f32 %v4828_v18, %v7838_v47  ;;  %v3356_v59 = vmul.bf16 1056980736, %v7293_v45  ;;  %v3384_v18 = vmul.bf16 1056980736, %v5237_v53 }
 0x9de   : > { %5248 = vtanh.bf16 %v3361_v7  ;;  %v4829_v42 = vpop.f32.mrb[146].mxu0  ;;  %v3421_v5 = vmul.bf16 %v3405_v33, %v7305_v19  ;;  %v3319_v26 = vadd.f32 %v3318_v6, %v7940_v44  ;;  %v3422_v7 = vmul.bf16 %v3406_v60, %v7303_v27 }
 0x9df   : > { %v3330_v56 = vadd.f32 %v4829_v42, %v7939_v32  ;;  %v3321_v17 = vpop.f32.mrb[147].mxu0  ;;  %5250 = vtanh.bf16 %v3355_v55  ;;  %v3399_v42 = vadd.bf16 1056980736, %v3383_v29 }
 0x9e0   : > { %v5239_v8 = vpop.eup %5238  ;;  %v3322_v62 = vadd.f32 %v3321_v17, %v7841_v48  ;;  %4530 = vmatprep.subr.bf16.mxu0 %v3421_v5  ;;  %5252 = vtanh.bf16 %v3356_v59 }
 0x9e1   : > { %v5241_v19 = vpop.eup %5240  ;;  %v7342_v33 = vpack.c.bf16 %v3330_v56, %v3327_v10  ;;  %4531 = vmatpush3.bf16.msra.mxu0 %v3413_v22  ;;  %v3392_v24 = vmul.bf16 1056980736, %v5239_v8  ;;  %v3400_v22 = vadd.bf16 1056980736, %v3384_v18  ;;  %v3415_v10 = vmul.bf16 %v3399_v42, %v7279_v9 }
 0x9e2   : > { %v3347_v47 = vpack.c.bf16 %v3322_v62, %v3319_v26  ;;  %4532 = vmatprep.subr.bf16.mxu0 %v3422_v7  ;;  %v3391_v25 = vmul.bf16 1056980736, %v5241_v19  ;;  %v5243_v6 = vpop.eup %5242 }
 0x9e3   : > { %v3364_v44 = vmul.bf16 1056980736, %v7342_v33  ;;  %v3408_v27 = vadd.bf16 1056980736, %v3392_v24  ;;  %v5245_v55 = vpop.eup %5244  ;;  %v3385_v32 = vmul.bf16 1056980736, %v5243_v6  ;;  %v3416_v17 = vmul.bf16 %v3400_v22, %v7277_v61 }
 0x9e4   : > { %v3363_v48 = vmul.bf16 1056980736, %v3347_v47  ;;  %v3407_v5 = vadd.bf16 1056980736, %v3391_v25  ;;  %v3386_v8 = vmul.bf16 1056980736, %v5245_v55 }
 0x9e5   : > { %5254 = vtanh.bf16 %v3364_v44  ;;  %4533 = vmatpush3.bf16.msra.mxu0 %v3414_v1  ;;  %v3424_v46 = vmul.bf16 %v3408_v27, %v7315_v2  ;;  %v3401_v59 = vadd.bf16 1056980736, %v3385_v32  ;;  %v5415_v22 = vld [vmem:[%s7597_s4 + $0x34] ss:$8 sps:$4 sm:$0xff]   ;;  %v5417_v32 = vld [vmem:[%s7597_s4 + $0x44] ss:$8 sps:$4 sm:$0xff]  }
 0x9e6   : > { %5256 = vtanh.bf16 %v3363_v48  ;;  %v3423_v60 = vmul.bf16 %v3407_v5, %v7317_v63  ;;  %v3402_v19 = vadd.bf16 1056980736, %v3386_v8  ;;  %v5424_v8 = vld [vmem:[%s7597_s4 + $0x70] ss:$8 sps:$4 sm:$0xff]  }
 0x9e7   : > { %v3417_v24 = vmul.bf16 %v3401_v59, %v7287_v20  ;;  %v5425_v59 = vld [vmem:[%s7597_s4 + $0x84] ss:$8 sps:$4 sm:$0xff]  }
 0x9e8   : > { %v5247_v12 = vpop.eup %5246  ;;  %4534 = vmatprep.subr.bf16.mxu0 %v3423_v60  ;;  %v3418_v44 = vmul.bf16 %v3402_v19, %v7285_v38  ;;  %v5410_v38 = vld [vmem:[%s7597_s4] ss:$8 sps:$4 sm:$0xff]   ;;  %v5431_v19 = vld [vmem:[%s7597_s4 + $0xb4] ss:$8 sps:$4 sm:$0xff]  }
 0x9e9   : > { %v5249_v53 = vpop.eup %5248  ;;  %4535 = vmatpush3.bf16.msra.mxu0 %v3415_v10  ;;  %v3394_v29 = vmul.bf16 1056980736, %v5247_v12  ;;  %v5416_v10 = vld [vmem:[%s7597_s4 + $0x30] ss:$8 sps:$4 sm:$0xff]   ;;  %v5418_v12 = vld [vmem:[%s7597_s4 + $0x40] ss:$8 sps:$4 sm:$0xff]  }
 0x9ea   : > { %4536 = vmatprep.subr.bf16.mxu0 %v3424_v46  ;;  %v3393_v56 = vmul.bf16 1056980736, %v5249_v53  ;;  %v5251_v26 = vpop.eup %5250  ;;  %v5419_v46 = vld [vmem:[%s7597_s4 + $0x54] ss:$8 sps:$4 sm:$0xff]   ;;  %v5420_v53 = vld [vmem:[%s7597_s4 + $0x50] ss:$8 sps:$4 sm:$0xff]  }
 0x9eb   : > { %v3410_v62 = vadd.bf16 1056980736, %v3394_v29  ;;  %v5253_v7 = vpop.eup %5252  ;;  %v3387_v2 = vmul.bf16 1056980736, %v5251_v26  ;;  %v5421_v29 = vld [vmem:[%s7597_s4 + $0x64] ss:$8 sps:$4 sm:$0xff]  }
 0x9ec   : > { %v3409_v63 = vadd.bf16 1056980736, %v3393_v56  ;;  %v3388_v6 = vmul.bf16 1056980736, %v5253_v7  ;;  %v5422_v56 = vld [vmem:[%s7597_s4 + $0x60] ss:$8 sps:$4 sm:$0xff]  }
 0x9ed   : > { %4537 = vmatpush3.bf16.msra.mxu0 %v3416_v17  ;;  %v3426_v1 = vmul.bf16 %v3410_v62, %v7327_v39  ;;  %v3403_v48 = vadd.bf16 1056980736, %v3387_v2  ;;  %v5423_v17 = vld [vmem:[%s7597_s4 + $0x74] ss:$8 sps:$4 sm:$0xff]   ;;  %v5426_v26 = vld [vmem:[%s7597_s4 + $0x80] ss:$8 sps:$4 sm:$0xff]  }
 0x9ee   : > { %v3425_v9 = vmul.bf16 %v3409_v63, %v7329_v13  ;;  %v3404_v60 = vadd.bf16 1056980736, %v3388_v6  ;;  %v5427_v63 = vld [vmem:[%s7597_s4 + $0x94] ss:$8 sps:$4 sm:$0xff]   ;;  %v5428_v62 = vld [vmem:[%s7597_s4 + $0x90] ss:$8 sps:$4 sm:$0xff]  }
 0x9ef   : > { %v3419_v20 = vmul.bf16 %v3403_v48, %v7295_v41  ;;  %v5412_v41 = vld [vmem:[%s7597_s4 + $0x10] ss:$8 sps:$4 sm:$0xff]   ;;  %v5430_v7 = vld [vmem:[%s7597_s4 + $0xa0] ss:$8 sps:$4 sm:$0xff]   ;;  %v5433_v2 = vld [vmem:[%s7597_s4 + $0xc4] ss:$8 sps:$4 sm:$0xff]  }
 0x9f0   : > { %v5255_v25 = vpop.eup %5254  ;;  %4538 = vmatprep.subr.bf16.mxu0 %v3425_v9  ;;  %v3420_v39 = vmul.bf16 %v3404_v60, %v7293_v45  ;;  %v5413_v45 = vld [vmem:[%s7597_s4 + $0x24] ss:$8 sps:$4 sm:$0xff]   ;;  %v5440_v6 = vld [vmem:[%s7597_s4 + $0xf0] ss:$8 sps:$4 sm:$0xff]  }
 0x9f1   : > { %v5257_v18 = vpop.eup %5256  ;;  %4539 = vmatpush3.bf16.msra.mxu0 %v3417_v24  ;;  %v3396_v61 = vmul.bf16 1056980736, %v5255_v25  ;;  %v5429_v9 = vld [vmem:[%s7597_s4 + $0xa4] ss:$8 sps:$4 sm:$0xff]   ;;  %v5432_v24 = vld [vmem:[%s7597_s4 + $0xb0] ss:$8 sps:$4 sm:$0xff]  }
 0x9f2   : > { %4540 = vmatprep.subr.bf16.mxu0 %v3426_v1  ;;  %v3395_v42 = vmul.bf16 1056980736, %v5257_v18  ;;  %v5434_v25 = vld [vmem:[%s7597_s4 + $0xc0] ss:$8 sps:$4 sm:$0xff]   ;;  %v5435_v1 = vld [vmem:[%s7597_s4 + $0xd4] ss:$8 sps:$4 sm:$0xff]  }
 0x9f3   : > { %v3412_v13 = vadd.bf16 1056980736, %v3396_v61  ;;  %v5436_v18 = vld [vmem:[%s7597_s4 + $0xd0] ss:$8 sps:$4 sm:$0xff]   ;;  %v5437_v61 = vld [vmem:[%s7597_s4 + $0xe4] ss:$8 sps:$4 sm:$0xff]  }
 0x9f4   : > { %v3411_v5 = vadd.bf16 1056980736, %v3395_v42  ;;  %v5438_v42 = vld [vmem:[%s7597_s4 + $0xe0] ss:$8 sps:$4 sm:$0xff]  }
 0x9f5   : > { %4541 = vmatpush3.bf16.msra.mxu0 %v3418_v44  ;;  %v3428_v55 = vmul.bf16 %v3412_v13, %v7342_v33  ;;  %v5414_v33 = vld [vmem:[%s7597_s4 + $0x20] ss:$8 sps:$4 sm:$0xff]   ;;  %v5439_v44 = vld [vmem:[%s7597_s4 + $0xf4] ss:$8 sps:$4 sm:$0xff]  }
 0x9f6   : > { %v3427_v27 = vmul.bf16 %v3411_v5, %v3347_v47  ;;  %v5411_v47 = vld [vmem:[%s7597_s4 + $0x14] ss:$8 sps:$4 sm:$0xff]  }
 0x9f8   : > { %4542 = vmatprep.subr.bf16.mxu0 %v3427_v27 }
 0x9f9   : > { %4543 = vmatpush3.bf16.msra.mxu0 %v3419_v20 }
 0x9fa   : > { %4544 = vmatprep.subr.bf16.mxu0 %v3428_v55 }
 0x9fd   : > { %4545 = vmatpush3.bf16.msra.mxu0 %v3420_v39 }
 0xa00   : > { %3462 = vmatmul.mubr.bf16.vlgmr.msra.gmra.mrb[148].mxu0 %v5410_v38 }
 0xa01   : > { %3469 = vmatprep.mubr.bf16.mxu0 %v5411_v47 }
 0xa08   : > { %3470 = vmatmul.mubr.bf16.gmra.mrb[152].mxu0 %v5412_v41 }
 0xa09   : > { %3477 = vmatprep.mubr.bf16.mxu0 %v5413_v45 }
 0xa10   : > { %3478 = vmatmul.mubr.bf16.gmra.mrb[156].mxu0 %v5414_v33 }
 0xa11   : > { %3485 = vmatprep.mubr.bf16.mxu0 %v5415_v22 }
 0xa18   : > { %3486 = vmatmul.mubr.bf16.gmra.mrb[160].mxu0 %v5416_v10 }
 0xa19   : > { %3493 = vmatprep.mubr.bf16.mxu0 %v5417_v32 }
 0xa20   : > { %3494 = vmatmul.mubr.bf16.gmra.mrb[164].mxu0 %v5418_v12 }
 0xa21   : > { %3501 = vmatprep.mubr.bf16.mxu0 %v5419_v46 }
 0xa28   : > { %3502 = vmatmul.mubr.bf16.gmra.mrb[168].mxu0 %v5420_v53 }
 0xa29   : > { %3509 = vmatprep.mubr.bf16.mxu0 %v5421_v29 }
 0xa30   : > { %3510 = vmatmul.mubr.bf16.gmra.mrb[172].mxu0 %v5422_v56 }
 0xa31   : > { %3517 = vmatprep.mubr.bf16.mxu0 %v5423_v17 }
 0xa38   : > { %3518 = vmatmul.mubr.bf16.gmra.mrb[176].mxu0 %v5424_v8 }
 0xa39   : > { %3525 = vmatprep.mubr.bf16.mxu0 %v5425_v59 }
 0xa40   : > { %3526 = vmatmul.mubr.bf16.gmra.mrb[180].mxu0 %v5426_v26 }
 0xa41   : > { %3533 = vmatprep.mubr.bf16.mxu0 %v5427_v63 }
 0xa48   : > { %3534 = vmatmul.mubr.bf16.gmra.mrb[184].mxu0 %v5428_v62 }
 0xa49   : > { %3541 = vmatprep.mubr.bf16.mxu0 %v5429_v9 }
 0xa50   : > { %3542 = vmatmul.mubr.bf16.gmra.mrb[188].mxu0 %v5430_v7 }
 0xa51   : > { %3549 = vmatprep.mubr.bf16.mxu0 %v5431_v19 }
 0xa58   : > { %3550 = vmatmul.mubr.bf16.gmra.mrb[192].mxu0 %v5432_v24 }
 0xa59   : > { %3557 = vmatprep.mubr.bf16.mxu0 %v5433_v2 }
 0xa60   : > { %3558 = vmatmul.mubr.bf16.gmra.mrb[196].mxu0 %v5434_v25 }
 0xa61   : > { %3565 = vmatprep.mubr.bf16.mxu0 %v5435_v1 }
 0xa68   : > { %3566 = vmatmul.mubr.bf16.gmra.mrb[200].mxu0 %v5436_v18 }
 0xa69   : > { %3573 = vmatprep.mubr.bf16.mxu0 %v5437_v61 }
 0xa70   : > { %3574 = vmatmul.mubr.bf16.gmra.mrb[204].mxu0 %v5438_v42 }
 0xa71   : > { %3581 = vmatprep.mubr.bf16.mxu0 %v5439_v44 }
 0xa78   : > { %3582 = vmatmul.mubr.bf16.gmra.mrb[208].mxu0 %v5440_v6 }
 0xad3   : > { %v4546_v48 = vpop.f32.mrb[148].mxu0 }
 0xad4   : > { %v4547_v5 = vpop.f32.mrb[149].mxu0 }
 0xad5   : > { %v4548_v13 = vadd.f32 %v4547_v5, %v4546_v48  ;;  %v4549_v27 = vpop.f32.mrb[150].mxu0 }
 0xad6   : > { %v4550_v60 = vpop.f32.mrb[151].mxu0 }
 0xad7   : > { %v4551_v20 = vadd.f32 %v4550_v60, %v4549_v27  ;;  %v3464_v55 = vadd.f32 %v4548_v13, %v7846_v34 }
 0xad9   : > { %v3467_v39 = vadd.f32 %v4551_v20, %v7848_v54 }
 0xadb   : > { %v7452_v38 = vpack.c.bf16 %v3467_v39, %v3464_v55  ;;  %v4552_v47 = vpop.f32.mrb[152].mxu0 }
 0xadc   : > { %v4553_v41 = vpop.f32.mrb[153].mxu0 }
 0xadd   : > { %v4554_v45 = vadd.f32 %v4553_v41, %v4552_v47  ;;  %v4555_v33 = vpop.f32.mrb[154].mxu0 }
 0xade   : > { %v4556_v22 = vpop.f32.mrb[155].mxu0 }
 0xadf   : > { %v4557_v10 = vadd.f32 %v4556_v22, %v4555_v33  ;;  %v3472_v32 = vadd.f32 %v4554_v45, %v7850_v15 }
 0xae1   : > { %v3475_v12 = vadd.f32 %v4557_v10, %v7851_v0 }
 0xae3   : > { %v7456_v46 = vpack.c.bf16 %v3475_v12, %v3472_v32  ;;  %v4558_v53 = vpop.f32.mrb[156].mxu0 }
 0xae4   : > { %v4559_v29 = vpop.f32.mrb[157].mxu0 }
 0xae5   : > { %v4560_v56 = vadd.f32 %v4559_v29, %v4558_v53  ;;  %v4561_v34 = vpop.f32.mrb[158].mxu0 }
 0xae6   : > { %v4562_v17 = vpop.f32.mrb[159].mxu0 }
 0xae7   : > { %v4563_v54 = vadd.f32 %v4562_v17, %v4561_v34  ;;  %v3480_v8 = vadd.f32 %v4560_v56, %v7853_v35 }
 0xae9   : > { %v3483_v59 = vadd.f32 %v4563_v54, %v7854_v30 }
 0xaeb   : > { %v7460_v26 = vpack.c.bf16 %v3483_v59, %v3480_v8  ;;  %v4564_v63 = vpop.f32.mrb[160].mxu0 }
 0xaec   : > { %v4565_v62 = vpop.f32.mrb[161].mxu0 }
 0xaed   : > { %v4566_v9 = vadd.f32 %v4565_v62, %v4564_v63  ;;  %v4567_v15 = vpop.f32.mrb[162].mxu0 }
 0xaee   : > { %v4568_v7 = vpop.f32.mrb[163].mxu0 }
 0xaef   : > { %v4569_v0 = vadd.f32 %v4568_v7, %v4567_v15  ;;  %v3488_v19 = vadd.f32 %v4566_v9, %v7855_v4 }
 0xaf1   : > { %v3491_v24 = vadd.f32 %v4569_v0, %v7856_v23 }
 0xaf3   : > { %v7464_v2 = vpack.c.bf16 %v3491_v24, %v3488_v19  ;;  %v4570_v25 = vpop.f32.mrb[164].mxu0 }
 0xaf4   : > { %v4571_v1 = vpop.f32.mrb[165].mxu0 }
 0xaf5   : > { %v4572_v18 = vadd.f32 %v4571_v1, %v4570_v25  ;;  %v4573_v35 = vpop.f32.mrb[166].mxu0  ;;  %v3607_v25 = vmul.bf16 1056980736, %v7456_v46 }
 0xaf6   : > { %v4574_v61 = vpop.f32.mrb[167].mxu0 }
 0xaf7   : > { %v4575_v30 = vadd.f32 %v4574_v61, %v4573_v35  ;;  %v3496_v42 = vadd.f32 %v4572_v18, %v7857_v16 }
 0xaf9   : > { %v3499_v44 = vadd.f32 %v4575_v30, %v7858_v11 }
 0xafb   : > { %v7468_v6 = vpack.c.bf16 %v3499_v44, %v3496_v42  ;;  %v4576_v48 = vpop.f32.mrb[168].mxu0 }
 0xafc   : > { %v4577_v5 = vpop.f32.mrb[169].mxu0 }
 0xafd   : > { %v4578_v13 = vadd.f32 %v4577_v5, %v4576_v48  ;;  %v4579_v4 = vpop.f32.mrb[170].mxu0 }
 0xafe   : > { %v4580_v27 = vpop.f32.mrb[171].mxu0 }
 0xaff   : > { %v4581_v23 = vadd.f32 %v4580_v27, %v4579_v4  ;;  %v3504_v60 = vadd.f32 %v4578_v13, %v7859_v31  ;;  %v3608_v13 = vmul.bf16 1056980736, %v7460_v26 }
 0xb01   : > { %v3507_v20 = vadd.f32 %v4581_v23, %v7860_v49 }
 0xb03   : > { %v7472_v55 = vpack.c.bf16 %v3507_v20, %v3504_v60  ;;  %v4582_v39 = vpop.f32.mrb[172].mxu0  ;;  %v7941_v60 = vld [vmem:[#allocation46_spill] sm:$0xff] }
 0xb04   : > { %v4583_v47 = vpop.f32.mrb[173].mxu0 }
 0xb05   : > { %v4584_v41 = vadd.f32 %v4583_v47, %v4582_v39  ;;  %v4585_v16 = vpop.f32.mrb[174].mxu0  ;;  %v7942_v39 = vld [vmem:[#allocation54_spill] sm:$0xff] }
 0xb06   : > { %v4586_v45 = vpop.f32.mrb[175].mxu0 }
 0xb07   : > { %v4587_v11 = vadd.f32 %v4586_v45, %v4585_v16  ;;  %v3512_v33 = vadd.f32 %v4584_v41, %v7861_v58 }
 0xb09   : > { %v3515_v22 = vadd.f32 %v4587_v11, %v7862_v36  ;;  %v3606_v36 = vmul.bf16 1056980736, %v7452_v38 }
 0xb0b   : > { %v7476_v10 = vpack.c.bf16 %v3515_v22, %v3512_v33  ;;  %v4588_v32 = vpop.f32.mrb[176].mxu0  ;;  %5258 = vtanh.bf16 %v3606_v36 }
 0xb0c   : > { %v4589_v12 = vpop.f32.mrb[177].mxu0 }
 0xb0d   : > { %v4590_v53 = vadd.f32 %v4589_v12, %v4588_v32  ;;  %v4591_v31 = vpop.f32.mrb[178].mxu0 }
 0xb0e   : > { %v4592_v29 = vpop.f32.mrb[179].mxu0 }
 0xb0f   : > { %v4593_v49 = vadd.f32 %v4592_v29, %v4591_v31  ;;  %v3520_v56 = vadd.f32 %v4590_v53, %v7863_v28  ;;  %v3609_v31 = vmul.bf16 1056980736, %v7464_v2 }
 0xb11   : > { %v3523_v34 = vadd.f32 %v4593_v49, %v7864_v37 }
 0xb13   : > { %v7480_v17 = vpack.c.bf16 %v3523_v34, %v3520_v56  ;;  %v4594_v54 = vpop.f32.mrb[180].mxu0 }
 0xb14   : > { %v4595_v8 = vpop.f32.mrb[181].mxu0 }
 0xb15   : > { %v4596_v59 = vadd.f32 %v4595_v8, %v4594_v54  ;;  %v4597_v58 = vpop.f32.mrb[182].mxu0 }
 0xb16   : > { %v4598_v63 = vpop.f32.mrb[183].mxu0  ;;  %v5259_v42 = vpop.eup %5258 }
 0xb17   : > { %v4599_v62 = vadd.f32 %v4598_v63, %v4597_v58  ;;  %v3528_v9 = vadd.f32 %v4596_v59, %v7896_v57  ;;  %v3638_v23 = vmul.bf16 1056980736, %v5259_v42  ;;  %v7943_v59 = vld [vmem:[#allocation53_spill] sm:$0xff] }
 0xb19   : > { %v3531_v15 = vadd.f32 %v4599_v62, %v7897_v50  ;;  %v3654_v45 = vadd.bf16 1056980736, %v3638_v23 }
 0xb1b   : > { %v3598_v7 = vpack.c.bf16 %v3531_v15, %v3528_v9  ;;  %v4600_v0 = vpop.f32.mrb[184].mxu0  ;;  %v3670_v34 = vmul.bf16 %v3654_v45, %v7452_v38  ;;  %v7945_v45 = vld [vmem:[#allocation62_spill] sm:$0xff] }
 0xb1c   : > { %v4601_v28 = vpop.f32.mrb[185].mxu0 }
 0xb1d   : > { %v3614_v19 = vmul.bf16 1056980736, %v3598_v7  ;;  %v4602_v37 = vadd.f32 %v4601_v28, %v4600_v0  ;;  %v4603_v24 = vpop.f32.mrb[186].mxu0 }
 0xb1e   : > { %v4604_v1 = vpop.f32.mrb[187].mxu0 }
 0xb1f   : > { %5260 = vtanh.bf16 %v3614_v19  ;;  %v4605_v18 = vadd.f32 %v4604_v1, %v4603_v24  ;;  %v3536_v35 = vadd.f32 %v4602_v37, %v7898_v51 }
 0xb20   : > { %5262 = vtanh.bf16 %v3607_v25 }
 0xb21   : > { %v3539_v61 = vadd.f32 %v4605_v18, %v7899_v3 }
 0xb23   : > { %v3599_v57 = vpack.c.bf16 %v3539_v61, %v3536_v35  ;;  %v4606_v30 = vpop.f32.mrb[188].mxu0 }
 0xb24   : > { %v4607_v50 = vpop.f32.mrb[189].mxu0 }
 0xb25   : > { %v3615_v44 = vmul.bf16 1056980736, %v3599_v57  ;;  %v4608_v48 = vadd.f32 %v4607_v50, %v4606_v30  ;;  %v4609_v5 = vpop.f32.mrb[190].mxu0  ;;  %v7944_v30 = vld [vmem:[#allocation59_spill] sm:$0xff] }
 0xb26   : > { %v4610_v4 = vpop.f32.mrb[191].mxu0 }
 0xb27   : > { %5264 = vtanh.bf16 %v3615_v44  ;;  %v4611_v27 = vadd.f32 %v4610_v4, %v4609_v5  ;;  %v3544_v20 = vadd.f32 %v4608_v48, %v7941_v60 }
 0xb28   : > { %5266 = vtanh.bf16 %v3608_v13 }
 0xb29   : > { %v3547_v51 = vadd.f32 %v4611_v27, %v7942_v39 }
 0xb2a   : > { %v5261_v47 = vpop.eup %5260 }
 0xb2b   : > { %v7491_v3 = vpack.c.bf16 %v3547_v51, %v3544_v20  ;;  %v4612_v41 = vpop.f32.mrb[192].mxu0  ;;  %v3646_v16 = vmul.bf16 1056980736, %v5261_v47  ;;  %v5263_v33 = vpop.eup %5262 }
 0xb2c   : > { %v4613_v11 = vpop.f32.mrb[193].mxu0  ;;  %v3639_v54 = vmul.bf16 1056980736, %v5263_v33 }
 0xb2d   : > { %v3616_v22 = vmul.bf16 1056980736, %v7491_v3  ;;  %v4614_v32 = vadd.f32 %v4613_v11, %v4612_v41  ;;  %v4615_v12 = vpop.f32.mrb[194].mxu0  ;;  %v3662_v53 = vadd.bf16 1056980736, %v3646_v16 }
 0xb2e   : > { %v4616_v29 = vpop.f32.mrb[195].mxu0  ;;  %v3655_v15 = vadd.bf16 1056980736, %v3639_v54 }
 0xb2f   : > { %5268 = vtanh.bf16 %v3616_v22  ;;  %v4617_v49 = vadd.f32 %v4616_v29, %v4615_v12  ;;  %v3678_v56 = vmul.bf16 %v3662_v53, %v3598_v7  ;;  %v3552_v8 = vadd.f32 %v4614_v32, %v7902_v14 }
 0xb30   : > { %5270 = vtanh.bf16 %v3609_v31  ;;  %v3610_v14 = vmul.bf16 1056980736, %v7468_v6  ;;  %v3671_v18 = vmul.bf16 %v3655_v15, %v7456_v46 }
 0xb31   : > { %v3555_v58 = vadd.f32 %v4617_v49, %v7943_v59  ;;  %4642 = vmatprep.subr.bf16.mxu1 %v3678_v56 }
 0xb32   : > { %v5265_v36 = vpop.eup %5264  ;;  %4643 = vmatpush3.bf16.msra.mxu1 %v3670_v34 }
 0xb33   : > { %v7498_v63 = vpack.c.bf16 %v3555_v58, %v3552_v8  ;;  %v4618_v62 = vpop.f32.mrb[196].mxu0  ;;  %v3647_v9 = vmul.bf16 1056980736, %v5265_v36  ;;  %v5267_v28 = vpop.eup %5266 }
 0xb34   : > { %v4619_v0 = vpop.f32.mrb[197].mxu0  ;;  %v3640_v35 = vmul.bf16 1056980736, %v5267_v28 }
 0xb35   : > { %v3617_v7 = vmul.bf16 1056980736, %v7498_v63  ;;  %v4620_v19 = vadd.f32 %v4619_v0, %v4618_v62  ;;  %v4621_v38 = vpop.f32.mrb[198].mxu0  ;;  %v3663_v37 = vadd.bf16 1056980736, %v3647_v9  ;;  %v7946_v62 = vld [vmem:[#allocation66_spill] sm:$0xff] }
 0xb36   : > { %v4622_v24 = vpop.f32.mrb[199].mxu0  ;;  %v3656_v13 = vadd.bf16 1056980736, %v3640_v35 }
 0xb37   : > { %5272 = vtanh.bf16 %v3617_v7  ;;  %v4623_v25 = vadd.f32 %v4622_v24, %v4621_v38  ;;  %v3679_v1 = vmul.bf16 %v3663_v37, %v3599_v57  ;;  %v3560_v61 = vadd.f32 %v4620_v19, %v7904_v21 }
 0xb38   : > { %5274 = vtanh.bf16 %v3610_v14  ;;  %v3611_v21 = vmul.bf16 1056980736, %v7472_v55  ;;  %v3672_v47 = vmul.bf16 %v3656_v13, %v7460_v26  ;;  %v3612_v26 = vmul.bf16 1056980736, %v7476_v10 }
 0xb39   : > { %v3563_v50 = vadd.f32 %v4623_v25, %v7944_v30  ;;  %4644 = vmatprep.subr.bf16.mxu1 %v3679_v1 }
 0xb3a   : > { %v5269_v42 = vpop.eup %5268  ;;  %4645 = vmatpush3.bf16.msra.mxu1 %v3671_v18 }
 0xb3b   : > { %v7505_v44 = vpack.c.bf16 %v3563_v50, %v3560_v61  ;;  %v4624_v48 = vpop.f32.mrb[200].mxu0  ;;  %v3648_v5 = vmul.bf16 1056980736, %v5269_v42  ;;  %v5271_v27 = vpop.eup %5270  ;;  %v7947_v50 = vld [vmem:[#allocation71_spill] sm:$0xff] }
 0xb3c   : > { %v4625_v4 = vpop.f32.mrb[201].mxu0  ;;  %v3641_v41 = vmul.bf16 1056980736, %v5271_v27 }
 0xb3d   : > { %v3618_v57 = vmul.bf16 1056980736, %v7505_v44  ;;  %v4626_v23 = vadd.f32 %v4625_v4, %v4624_v48  ;;  %v4627_v46 = vpop.f32.mrb[202].mxu0  ;;  %v3664_v60 = vadd.bf16 1056980736, %v3648_v5 }
 0xb3e   : > { %v4628_v20 = vpop.f32.mrb[203].mxu0  ;;  %v3657_v53 = vadd.bf16 1056980736, %v3641_v41 }
 0xb3f   : > { %5276 = vtanh.bf16 %v3618_v57  ;;  %v4629_v39 = vadd.f32 %v4628_v20, %v4627_v46  ;;  %v3680_v51 = vmul.bf16 %v3664_v60, %v7491_v3  ;;  %v3568_v16 = vadd.f32 %v4626_v23, %v7906_v52 }
 0xb40   : > { %5278 = vtanh.bf16 %v3611_v21  ;;  %v3673_v59 = vmul.bf16 %v3657_v53, %v7464_v2  ;;  %v3613_v2 = vmul.bf16 1056980736, %v7480_v17 }
 0xb41   : > { %v3571_v11 = vadd.f32 %v4629_v39, %v7945_v45  ;;  %4646 = vmatprep.subr.bf16.mxu1 %v3680_v51 }
 0xb42   : > { %v5273_v33 = vpop.eup %5272  ;;  %4647 = vmatpush3.bf16.msra.mxu1 %v3672_v47 }
 0xb43   : > { %v3603_v22 = vpack.c.bf16 %v3571_v11, %v3568_v16  ;;  %v4630_v32 = vpop.f32.mrb[204].mxu0  ;;  %v3649_v12 = vmul.bf16 1056980736, %v5273_v33  ;;  %v5275_v29 = vpop.eup %5274 }
 0xb44   : > { %v4631_v31 = vpop.f32.mrb[205].mxu0  ;;  %v3642_v58 = vmul.bf16 1056980736, %v5275_v29 }
 0xb45   : > { %v3619_v49 = vmul.bf16 1056980736, %v3603_v22  ;;  %v4632_v56 = vadd.f32 %v4631_v31, %v4630_v32  ;;  %v4633_v3 = vpop.f32.mrb[206].mxu0  ;;  %v3665_v34 = vadd.bf16 1056980736, %v3649_v12 }
 0xb46   : > { %v4634_v54 = vpop.f32.mrb[207].mxu0  ;;  %v3658_v19 = vadd.bf16 1056980736, %v3642_v58  ;;  %v5441_v32 = vld [vmem:[%s7599_s6] ss:$8 sps:$4 sm:$0xff]  }
 0xb47   : > { %5280 = vtanh.bf16 %v3619_v49  ;;  %v4635_v52 = vadd.f32 %v4634_v54, %v4633_v3  ;;  %v3681_v8 = vmul.bf16 %v3665_v34, %v7498_v63  ;;  %v3576_v36 = vadd.f32 %v4632_v56, %v7908_v43  ;;  %v5443_v12 = vld [vmem:[%s7599_s6 + $0x10] ss:$8 sps:$4 sm:$0xff]   ;;  %v7948_v56 = vld [vmem:[#allocation74_spill] sm:$0xff] }
 0xb48   : > { %5282 = vtanh.bf16 %v3612_v26  ;;  %v3674_v35 = vmul.bf16 %v3658_v19, %v7468_v6  ;;  %v7949_v26 = vld [vmem:[#allocation75_spill] sm:$0xff] }
 0xb49   : > { %v3579_v9 = vadd.f32 %v4635_v52, %v7946_v62  ;;  %4648 = vmatprep.subr.bf16.mxu1 %v3681_v8  ;;  %v7950_v62 = vld [vmem:[#allocation76_spill] sm:$0xff] }
 0xb4a   : > { %v5277_v15 = vpop.eup %5276  ;;  %4649 = vmatpush3.bf16.msra.mxu1 %v3673_v59 }
 0xb4b   : > { %v3604_v0 = vpack.c.bf16 %v3579_v9, %v3576_v36  ;;  %v4636_v28 = vpop.f32.mrb[208].mxu0  ;;  %v3650_v7 = vmul.bf16 1056980736, %v5277_v15  ;;  %v5279_v37 = vpop.eup %5278 }
 0xb4c   : > { %v4637_v38 = vpop.f32.mrb[209].mxu0  ;;  %v3643_v61 = vmul.bf16 1056980736, %v5279_v37 }
 0xb4d   : > { %v3620_v14 = vmul.bf16 1056980736, %v3604_v0  ;;  %v4638_v24 = vadd.f32 %v4637_v38, %v4636_v28  ;;  %v4639_v63 = vpop.f32.mrb[210].mxu0  ;;  %v3666_v25 = vadd.bf16 1056980736, %v3650_v7 }
 0xb4e   : > { %v4640_v1 = vpop.f32.mrb[211].mxu0  ;;  %v3659_v4 = vadd.bf16 1056980736, %v3643_v61 }
 0xb4f   : > { %5284 = vtanh.bf16 %v3620_v14  ;;  %v4641_v43 = vadd.f32 %v4640_v1, %v4639_v63  ;;  %v3682_v18 = vmul.bf16 %v3666_v25, %v7505_v44  ;;  %v3584_v30 = vadd.f32 %v4638_v24, %v7910_v40 }
 0xb50   : > { %5286 = vtanh.bf16 %v3613_v2  ;;  %v3675_v44 = vmul.bf16 %v3659_v4, %v7472_v55 }
 0xb51   : > { %v3587_v42 = vadd.f32 %v4641_v43, %v7947_v50  ;;  %4650 = vmatprep.subr.bf16.mxu1 %v3682_v18 }
 0xb52   : > { %v5281_v48 = vpop.eup %5280  ;;  %4651 = vmatpush3.bf16.msra.mxu1 %v3674_v35 }
 0xb53   : > { %v3605_v5 = vpack.c.bf16 %v3587_v42, %v3584_v30  ;;  %v3651_v13 = vmul.bf16 1056980736, %v5281_v48  ;;  %v5283_v27 = vpop.eup %5282 }
 0xb54   : > { %v3644_v6 = vmul.bf16 1056980736, %v5283_v27 }
 0xb55   : > { %v3621_v57 = vmul.bf16 1056980736, %v3605_v5  ;;  %v3667_v23 = vadd.bf16 1056980736, %v3651_v13 }
 0xb56   : > { %v3660_v21 = vadd.bf16 1056980736, %v3644_v6 }
 0xb57   : > { %5288 = vtanh.bf16 %v3621_v57  ;;  %v3683_v46 = vmul.bf16 %v3667_v23, %v3603_v22 }
 0xb58   : > { %v3676_v47 = vmul.bf16 %v3660_v21, %v7476_v10  ;;  %v5442_v10 = vld [vmem:[%s7599_s6 + $0x14] ss:$8 sps:$4 sm:$0xff]  }
 0xb59   : > { %4652 = vmatprep.subr.bf16.mxu1 %v3683_v46 }
 0xb5a   : > { %v5285_v60 = vpop.eup %5284  ;;  %4653 = vmatpush3.bf16.msra.mxu1 %v3675_v44 }
 0xb5b   : > { %v3652_v40 = vmul.bf16 1056980736, %v5285_v60  ;;  %v5287_v20 = vpop.eup %5286 }
 0xb5c   : > { %v3645_v41 = vmul.bf16 1056980736, %v5287_v20 }
 0xb5d   : > { %v3668_v39 = vadd.bf16 1056980736, %v3652_v40 }
 0xb5e   : > { %v3661_v11 = vadd.bf16 1056980736, %v3645_v41 }
 0xb5f   : > { %v3684_v51 = vmul.bf16 %v3668_v39, %v3604_v0  ;;  %v7951_v0 = vld [vmem:[#allocation77_spill] sm:$0xff] }
 0xb60   : > { %v3677_v55 = vmul.bf16 %v3661_v11, %v7480_v17 }
 0xb61   : > { %4654 = vmatprep.subr.bf16.mxu1 %v3684_v51 }
 0xb62   : > { %v5289_v16 = vpop.eup %5288  ;;  %4655 = vmatpush3.bf16.msra.mxu1 %v3676_v47 }
 0xb63   : > { %v3653_v45 = vmul.bf16 1056980736, %v5289_v16 }
 0xb65   : > { %v3669_v33 = vadd.bf16 1056980736, %v3653_v45 }
 0xb67   : > { %v3685_v22 = vmul.bf16 %v3669_v33, %v3605_v5 }
 0xb69   : > { %4656 = vmatprep.subr.bf16.mxu1 %v3685_v22 }
 0xb6a   : > { %4657 = vmatpush3.bf16.msra.mxu1 %v3677_v55 }
 0xb6d   : > { %3719 = vmatmul.mubr.bf16.vlgmr.msra.gmra.mrb[196].mxu1 %v5441_v32 }
 0xb6e   : > { %3726 = vmatprep.mubr.bf16.mxu1 %v5442_v10 }
 0xb75   : > { %3727 = vmatmul.mubr.bf16.gmra.mrb[200].mxu1 %v5443_v12 }
 0xc40   : > { %v4658_v17 = vpop.f32.mrb[196].mxu1 }
 0xc41   : > { %v4659_v53 = vpop.f32.mrb[197].mxu1 }
 0xc42   : > { %v4660_v31 = vadd.f32 %v4659_v53, %v4658_v17  ;;  %v4661_v29 = vpop.f32.mrb[198].mxu1 }
 0xc43   : > { %v4662_v49 = vpop.f32.mrb[199].mxu1 }
 0xc44   : > { %v3721_v3 = vadd.f32 %v4660_v31, %v7948_v56  ;;  %v4663_v34 = vadd.f32 %v4662_v49, %v4661_v29 }
 0xc46   : > { %3735 = vst [vmem:[%s6497_s22 + $0x18] sm:$0xff] %v3721_v3  ;;  %v3724_v54 = vadd.f32 %v4663_v34, %v7949_v26 }
 0xc48   : > { %4021 = vst [vmem:[%s6497_s22 + $0x38] sm:$0xff] %v3724_v54  ;;  %v4664_v52 = vpop.f32.mrb[200].mxu1 }
 0xc49   : > { %v4665_v8 = vpop.f32.mrb[201].mxu1 }
 0xc4a   : > { %v4666_v59 = vadd.f32 %v4665_v8, %v4664_v52  ;;  %v4667_v58 = vpop.f32.mrb[202].mxu1 }
 0xc4b   : > { %v4668_v36 = vpop.f32.mrb[203].mxu1 }
 0xc4c   : > { %v3729_v9 = vadd.f32 %v4666_v59, %v7950_v62  ;;  %v4669_v15 = vadd.f32 %v4668_v36, %v4667_v58 }
 0xc4e   : > { %4022 = vst [vmem:[%s6497_s22 + $0x58] sm:$0xff] %v3729_v9  ;;  %v3732_v28 = vadd.f32 %v4669_v15, %v7951_v0 }
 0xc50   : > { %4023 = vst [vmem:[%s6497_s22 + $0x78] sm:$0xff] %v3732_v28 }
 0xc51   : > { %s4026_s0 = sshll.u32 %s5498_s9, 6  ;;  %s3772_s21 = sshll.u32 %s6497_s22, 4  ;;  %s3773_s21 = int_to_ptr.vmem [resolvable:$true] %s3772_s21 }
 0xc52   : > { %s3753_s30 = sadd.s32 %s4026_s0, %s5639_s24  ;;  %s5515_s20 = smov 512  }
 0xc53   : > { %s4027_s26 = sshll.u32 %s3753_s30, 7  ;;  %4846 = sst [smem:[#allocation6]] (%p5618_p3), %s5515_s20 }
 0xc54   : > { %s3755_s14 = scalar_lea.hbm %s7601_s8, %s4027_s26  ;;  %s5516_s15 = smov 2048  }
 0xc55   : > { %4847 = sst [smem:[#allocation6 + $0x1]] (%p5618_p3), %s5516_s15  ;;  %s5517_s17 = smov 4  }
 0xc56   : > { %4848 = sst [smem:[#allocation6 + $0x2]] (%p5618_p3), %s5517_s17  ;;  %s5518_s9 = smov 128  }
 0xc57   : > { %4849 = sst [smem:[#allocation6 + $0x3]] (%p5618_p3), %s5518_s9  ;;  %s5519_s24 = smov 8  }
 0xc58   : > { %4850 = sst [smem:[#allocation6 + $0x4]] (%p5618_p3), %s5518_s9  ;;  %s5520_s22 = smov [#allocation5]  }
 0xc59   : > { %4851 = sst [smem:[#allocation6 + $0x5]] (%p5618_p3), %s5519_s24  ;;  %s5521_s16 = smov 0  }
 0xc5a   : > { %4852 = dma.general (%p5618_p3), %s3773_s21, 2048, %s3755_s14, %s3740_s25, %s5520_s22, [#allocation6], %s5521_s16, 0  }
 0xc5b PF: > { %p4858_p0 = scmp.ge.s32.totalorder %s5510_s12, 2  ;;  %s3800_s0 = sand.u32 1, %s5482_s27  }
 0xc5c   : > { %s3801_s30 = scalar_lea.sflag [#allocation4], %s3800_s0 }
 0xc5d   : > { %p4855_p1 = pnand %p4858_p0, %p5627_p8 }
 0xc5f   : > { %5477 = dma.done.wait (!%p4855_p1), %s3801_s30, 2048  }
 0xc60   : > { %5479 = vsyncadd (!%p4855_p1), %s3801_s30, 4294965248  ;;  %s21_s12 = sadd.s32 1, %s5510_s12   ;;  %s7952_s18 = sld [smem:[#allocation8_spill]] }
 0xc61   : > { %p18_p2 = scmp.ge.s32.totalorder %s21_s12, 10   ;;  %s7953_s25 = sld [smem:[#allocation9_spill]] }
 0xc62   : > { %s7954_s27 = smov %s5486_s28  ;;  %s7955_s28 = smov %s5490_s29 }
 0xc63   : > { %s7956_s29 = smov %s5636_s23  ;;  %s7957_s30 = smov %s5502_s10 }
 0xc64   : > { %s7958_s9 = smov %s5506_s11  ;;  %20 = sbr.rel (!%p18_p2) target bundleno = 8 (0x8), region = 98 }
 0xc66   : > { %s7959_s10 = smov %s7952_s18 }
 0xc67   : > { %s7960_s11 = smov %s7953_s25 }
 0xc6b   :  { %3806 = vsyncpa [#allocation4], 1 }
 0xc6c   :  { %3808 = vsyncpa [#allocation4 + $0x1], 1 }

</bundles_post_ra>
